<compile_context>
chip_gen: v6e
topology: v6e:2x2x1
jax: 0.10.0
libtpu: 0.0.40
codegen_flags: <defaults>
</compile_context>

<pallas_src>
import numpy as np
import jax
import jax.numpy as jnp
from jax.experimental import pallas as pl
from jax.experimental.pallas import tpu as pltpu

# ---------------- dimensions (small, consistent with AdaptNet) ---------------
N  = 2      # batch / n_inst
T  = 8      # sequence length
D1 = 16     # state_dim1 (rnn1 input size)
D2 = 16     # state_dim2 (rnn2 input size)
G1 = 8      # g_dim1
G2 = 8      # original g_dim2 (before the "+= g_dim1" bookkeeping)
GE = 4      # extra g_dim passed to AdaptNet.__init__ (g_dim > 0 path)
L1 = 32     # latent_dim1 == rnn1 hidden == embed_goal1 out_features
L2 = 32     # latent_dim2
LD = L1 + L2
HF = 2 * LD          # fused GRU hidden width: [rnn1|rnn2|meta1.rnn|meta2.rnn]
EH = max(LD, 1024)   # embed hidden width, exactly max(latent_dim, 1024)
MH = 32     # meta mlp hidden width
A1 = 8      # meta1 action dim
A2 = 8      # meta2 action dim
A  = A1 + A2
NP = ((N + 7) // 8) * 8   # batch rows padded to a sublane multiple (8)

_VSPEC = pl.BlockSpec(memory_space=pltpu.MemorySpace.VMEM)
_ASPEC = pl.BlockSpec(memory_space=pl.ANY)


# ============================ fused forward kernel ============================
def adaptnet_kernel(x_ref, end_ref, g_ref,
                    wi_ref, wh_ref, bi_ref, bh_ref,
                    egw_ref, egb_ref,
                    e0b_ref, e1b_ref, e2b_ref,
                    mw0_ref, mb0_ref, mw1_ref, mb1_ref,
                    hw_ref, hb_ref,
                    e0w_hbm, e1w_hbm, e2w_hbm,
                    mu_ref, sig_ref,
                    e0w_v, e1w_v, e2w_v, dma_sem):
    f32, bf16 = jnp.float32, jnp.bfloat16

    def mm(a, b):
        return jnp.dot(a, b, preferred_element_type=f32)

    # (1) Kick off the embed-MLP weight DMAs immediately so the ~2.3 MiB of
    #     bf16 weights stream in underneath the serial GRU recurrence.
    cp0 = pltpu.make_async_copy(e0w_hbm, e0w_v, dma_sem.at[0]); cp0.start()
    cp1 = pltpu.make_async_copy(e1w_hbm, e1w_v, dma_sem.at[1]); cp1.start()
    cp2 = pltpu.make_async_copy(e2w_hbm, e2w_v, dma_sem.at[2]); cp2.start()

    # (2) One block-diagonal GRU recurrence for rnn1/rnn2/meta1.rnn/meta2.rnn.
    #     x rows per step are [n=0..N-1 real, pad to 8]; features are
    #     [ob1|ob2|ob1_|ob2_] so the fused (64 -> 3*128) input projection and
    #     (128 -> 3*128) recurrence weights are block-diagonal per gate.
    x = x_ref[...]                                   # (T*NP, 2*(D1+D2)) f32
    end = end_ref[...]                               # (NP, 1) int32, -1 on pad rows
    wi = wi_ref[...]                                 # (2*(D1+D2), 3*HF) bf16
    wh = wh_ref[...]                                 # (HF, 3*HF) bf16
    bh = bh_ref[...]                                 # (1, 3*HF) f32
    # Hoisted input projection: one matmul for all T steps, fused gates.
    gi_all = mm(x.astype(bf16), wi) + bi_ref[...]    # (T*NP, 3*HF) f32

    h = jnp.zeros((NP, HF), f32)
    out = jnp.zeros((NP, HF), f32)
    for t in range(T):                               # T small & static -> unrolled
        gi = gi_all[t * NP:(t + 1) * NP, :]          # 8-sublane-aligned static slice
        gh = mm(h.astype(bf16), wh) + bh             # single fused gate matmul / step
        rg = jax.nn.sigmoid(gi[:, :HF] + gh[:, :HF])
        zg = jax.nn.sigmoid(gi[:, HF:2 * HF] + gh[:, HF:2 * HF])
        ng = jnp.tanh(gi[:, 2 * HF:] + rg * gh[:, 2 * HF:])
        h = (1.0 - zg) * ng + zg * h
        out = jnp.where(end == t, h, out)            # "[ind]" gather as a select

    # (3) All four embed_goal linears in one matmul:
    #     columns = [eg1 | eg2 | meta1.eg | meta2.eg]  (matches `out`'s layout).
    g = g_ref[...]                                   # (N, G1+G2+GE)
    eg = mm(g[:, :G1 + G2], egw_ref[...]) + egb_ref[...]   # (N, 2*LD)

    sv = out[:N, :LD] + eg[:, :LD]                   # [s1 | s2]          (N, LD)
    hc = jnp.concatenate([sv, g[:, G1 + G2:]], axis=-1)    # cat(s1,s2,g)  (N, LD+GE)

    # (4) embed MLP: bf16 weights (manually DMA'd above), f32 accumulation.
    cp0.wait()
    hm = jax.nn.relu(mm(hc.astype(bf16), e0w_v[...]) + e0b_ref[...])
    cp1.wait()
    hm = jax.nn.relu(mm(hm.astype(bf16), e1w_v[...]) + e1b_ref[...])
    cp2.wait()
    zlat = mm(hm.astype(bf16), e2w_v[...]) + e2b_ref[...]  # (N, LD); embed[-1] zero-init

    # (5) Fused meta MLPs + fused mu/log_sigma heads.
    #     [z1 | z2] = meta rnn outputs + embed output + meta embed_goals.
    zz = out[:N, LD:] + zlat + eg[:, LD:]            # (N, LD)
    zz = jax.nn.relu(mm(zz, mw0_ref[...]) + mb0_ref[...])  # both meta mlp layer-0s
    zz = jax.nn.relu(mm(zz, mw1_ref[...]) + mb1_ref[...])  # both meta mlp layer-1s
    o = mm(zz, hw_ref[...]) + hb_ref[...]            # (N, 2A) = [mu1|mu2|ls1|ls2]

    mu_ref[...] = o[:, :A]
    sig_ref[...] = jnp.exp(o[:, A:]) + 1e-8


# ============================== forward (glue) ===============================
def adaptnet_forward(kp, s, seq_end_frame, g):
    s0, s1 = s
    WI, WH, BI, BH = kp["gru"]
    EGW, EGB = kp["eg"]
    e0w, e0b = kp["e0"]
    e1w, e1b = kp["e1"]
    e2w, e2b = kp["e2"]
    MW0, MB0 = kp["mlp0"]
    MW1, MB1 = kp["mlp1"]
    HW, HB = kp["head"]

    # Time-major rows, features [s0 | s1] = [ob1|ob2|ob1_|ob2_], batch rows
    # padded to a sublane multiple so per-step slices in the kernel are aligned.
    xs = jnp.concatenate([s0, s1], axis=-1)                       # (N, T, 64)
    xs = jnp.transpose(xs, (1, 0, 2))                             # (T, N, 64)
    xs = jnp.concatenate(
        [xs, jnp.zeros((T, NP - N, xs.shape[-1]), xs.dtype)], axis=1)
    x = xs.reshape(T * NP, 2 * (D1 + D2))

    end = jnp.minimum(seq_end_frame.astype(jnp.int32), T - 1).reshape(N, 1)
    end = jnp.concatenate(
        [end, jnp.full((NP - N, 1), -1, jnp.int32)], axis=0)      # pad rows never match

    args = (x, end, g,
            WI, WH, BI, BH,
            EGW, EGB,
            e0b, e1b, e2b,
            MW0, MB0, MW1, MB1,
            HW, HB,
            e0w, e1w, e2w)                                        # last 3 via pl.ANY

    mu, sigma = pl.pallas_call(
        adaptnet_kernel,
        out_shape=(jax.ShapeDtypeStruct((N, A), jnp.float32),
                   jax.ShapeDtypeStruct((N, A), jnp.float32)),
        in_specs=[_VSPEC] * 18 + [_ASPEC] * 3,
        out_specs=(_VSPEC, _VSPEC),
        scratch_shapes=[pltpu.VMEM((LD + GE, EH), jnp.bfloat16),
                        pltpu.VMEM((EH, EH), jnp.bfloat16),
                        pltpu.VMEM((EH, LD), jnp.bfloat16),
                        pltpu.SemaphoreType.DMA((3,))],
    )(*args)
    return mu, sigma


# =================== host-side one-time weight fusion (prep) ==================
def _fuse_grus(plist):
    """Block-diagonal (per gate) fusion of several fused-[r|z|n] GRUs."""
    dins = [q[0].shape[0] for q in plist]
    hs = [q[1].shape[0] for q in plist]
    DIN, HT = sum(dins), sum(hs)
    WI = jnp.zeros((DIN, 3 * HT), jnp.float32)
    WH = jnp.zeros((HT, 3 * HT), jnp.float32)
    BI = jnp.zeros((1, 3 * HT), jnp.float32)
    BH = jnp.zeros((1, 3 * HT), jnp.float32)
    r0 = c0 = 0
    for (wi, wh, bi, bh), din, hk in zip(plist, dins, hs):
        wi = wi.astype(jnp.float32)
        wh = wh.astype(jnp.float32)
        for gk in range(3):
            WI = WI.at[r0:r0 + din, gk * HT + c0:gk * HT + c0 + hk].set(
                wi[:, gk * hk:(gk + 1) * hk])
            WH = WH.at[c0:c0 + hk, gk * HT + c0:gk * HT + c0 + hk].set(
                wh[:, gk * hk:(gk + 1) * hk])
            BI = BI.at[:, gk * HT + c0:gk * HT + c0 + hk].set(bi[:, gk * hk:(gk + 1) * hk])
            BH = BH.at[:, gk * HT + c0:gk * HT + c0 + hk].set(bh[:, gk * hk:(gk + 1) * hk])
        r0 += din
        c0 += hk
    return WI.astype(jnp.bfloat16), WH.astype(jnp.bfloat16), BI, BH


def _fuse_embed_goals(eg1, eg2, eg1m, eg2m):
    """Input [g1|g2] -> output [eg1 | eg2 | meta1.eg | meta2.eg]."""
    w1, b1 = eg1; w2, b2 = eg2; w1m, b1m = eg1m; w2m, b2m = eg2m
    W = jnp.zeros((G1 + G2, 2 * LD), jnp.float32)
    W = W.at[:G1, 0:L1].set(w1)
    W = W.at[G1:, L1:LD].set(w2)
    W = W.at[:G1, LD:LD + L1].set(w1m)
    W = W.at[G1:, LD + L1:].set(w2m)
    B = jnp.concatenate([b1, b2, b1m, b2m], axis=-1)
    return W, B


def _blockdiag_linear(pa, pb):
    wa, ba = pa
    wb, bb = pb
    ia, oa = wa.shape
    ib, ob_ = wb.shape
    W = jnp.zeros((ia + ib, oa + ob_), jnp.float32)
    W = W.at[:ia, :oa].set(wa).at[ia:, oa:].set(wb)
    B = jnp.concatenate([ba, bb], axis=-1)
    return W, B


def _fuse_heads(mu1, mu2, ls1, ls2):
    """Input [meta1 feats | meta2 feats] -> output [mu1|mu2|log_sig1|log_sig2]."""
    w_mu1, b_mu1 = mu1; w_mu2, b_mu2 = mu2
    w_ls1, b_ls1 = ls1; w_ls2, b_ls2 = ls2
    W = jnp.zeros((2 * MH, 2 * A), jnp.float32)
    W = W.at[:MH, :A1].set(w_mu1)
    W = W.at[MH:, A1:A].set(w_mu2)
    W = W.at[:MH, A:A + A1].set(w_ls1)
    W = W.at[MH:, A + A1:].set(w_ls2)
    B = jnp.concatenate([b_mu1, b_mu2, b_ls1, b_ls2], axis=-1)
    return W, B


def prepare_kernel_params(p):
    """One-time (per checkpoint) fusion of the PyTorch-structured params."""
    return {
        "gru": _fuse_grus([p["rnn1"], p["rnn2"], p["meta1_rnn"], p["meta2_rnn"]]),
        "eg": _fuse_embed_goals(p["eg1"], p["eg2"], p["meta1_eg"], p["meta2_eg"]),
        "e0": p["e0"], "e1": p["e1"], "e2": p["e2"],
        "mlp0": _blockdiag_linear(p["m1_0"], p["m2_0"]),
        "mlp1": _blockdiag_linear(p["m1_1"], p["m2_1"]),
        "head": _fuse_heads(p["mu1"], p["mu2"], p["ls1"], p["ls2"]),
    }


# ============================ pure-JAX reference =============================
def _gru_last_ref(x_tm, end, p):
    wi, wh, bi, bh = p
    wi = wi.astype(jnp.float32)
    wh = wh.astype(jnp.float32)
    H = wh.shape[0]
    h = jnp.zeros((x_tm.shape[1], H), jnp.float32)
    out = jnp.zeros_like(h)
    for t in range(x_tm.shape[0]):
        gi = x_tm[t] @ wi + bi
        gh = h @ wh + bh
        r = jax.nn.sigmoid(gi[:, :H] + gh[:, :H])
        z = jax.nn.sigmoid(gi[:, H:2 * H] + gh[:, H:2 * H])
        n = jnp.tanh(gi[:, 2 * H:] + r * gh[:, 2 * H:])
        h = (1.0 - z) * n + z * h
        out = jnp.where(end == t, h, out)
    return out


def adaptnet_forward_ref(params, s, seq_end_frame, g):
    # Structured like the PyTorch module: four separate recurrences, separate
    # embed_goal / meta.embed_goal linears, separate meta MLPs and heads.
    s0, s1 = s
    ob1, ob2 = s0[..., :D1], s0[..., D1:]
    ob1_, ob2_ = s1[..., :D1], s1[..., D1:]
    g1 = g[..., :G1]
    g2 = g[..., G1:G1 + G2]
    gex = g[..., G1 + G2:]
    end = jnp.minimum(seq_end_frame.astype(jnp.int32), T - 1).reshape(N, 1)
    tm = lambda a: jnp.transpose(a, (1, 0, 2))
    up = lambda w: w.astype(jnp.float32)

    r1 = _gru_last_ref(tm(ob1), end, params["rnn1"])
    r2 = _gru_last_ref(tm(ob2), end, params["rnn2"])
    r1m = _gru_last_ref(tm(ob1_), end, params["meta1_rnn"])
    r2m = _gru_last_ref(tm(ob2_), end, params["meta2_rnn"])

    eg1w, eg1b = params["eg1"]; eg2w, eg2b = params["eg2"]
    e1mw, e1mb = params["meta1_eg"]; e2mw, e2mb = params["meta2_eg"]
    e0w, e0b = params["e0"]; e1w, e1b = params["e1"]; e2w, e2b = params["e2"]

    s1v = r1 + g1 @ eg1w + eg1b
    s2v = r2 + g2 @ eg2w + eg2b
    h = jax.nn.relu(jnp.concatenate([s1v, s2v, gex], -1) @ up(e0w) + e0b)
    h = jax.nn.relu(h @ up(e1w) + e1b)
    z = h @ up(e2w) + e2b
    z1 = r1m + z[:, :L1] + (g1 @ e1mw + e1mb)
    z2 = r2m + z[:, L1:] + (g2 @ e2mw + e2mb)

    m1w0, m1b0 = params["m1_0"]; m1w1, m1b1 = params["m1_1"]
    m2w0, m2b0 = params["m2_0"]; m2w1, m2b1 = params["m2_1"]
    z1 = jax.nn.relu(jax.nn.relu(z1 @ m1w0 + m1b0) @ m1w1 + m1b1)
    z2 = jax.nn.relu(jax.nn.relu(z2 @ m2w0 + m2b0) @ m2w1 + m2b1)

    mu1w, mu1b = params["mu1"]; ls1w, ls1b = params["ls1"]
    mu2w, mu2b = params["mu2"]; ls2w, ls2b = params["ls2"]
    mu = jnp.concatenate([z1 @ mu1w + mu1b, z2 @ mu2w + mu2b], -1)
    sigma = jnp.exp(jnp.concatenate([z1 @ ls1w + ls1b, z2 @ ls2w + ls2b], -1)) + 1e-8
    return mu, sigma


# ============================ parameter creation =============================
def _uniform(key, shape, scale, dtype=jnp.float32):
    return jax.random.uniform(key, shape, jnp.float32, -scale, scale).astype(dtype)


def gru_params(key, in_dim, hidden):
    # Fused [r|z|n] gate layout. Weights stored bf16 (kernel feeds them to the
    # MXU directly), biases f32.
    ks = jax.random.split(key, 4)
    s = 1.0 / np.sqrt(hidden)
    return (_uniform(ks[0], (in_dim, 3 * hidden), s, jnp.bfloat16),
            _uniform(ks[1], (hidden, 3 * hidden), s, jnp.bfloat16),
            _uniform(ks[2], (1, 3 * hidden), s),
            _uniform(ks[3], (1, 3 * hidden), s))


def linear_params(key, in_dim, out_dim, w_dtype=jnp.float32):
    k1, k2 = jax.random.split(key)
    s = 1.0 / np.sqrt(in_dim)
    return _uniform(k1, (in_dim, out_dim), s, w_dtype), _uniform(k2, (1, out_dim), s)


def init_params(key):
    ks = jax.random.split(key, 18)
    return {
        "rnn1": gru_params(ks[0], D1, L1),
        "rnn2": gru_params(ks[1], D2, L2),
        # AdaptNet.__init__ makes meta*.rnn / meta*.embed_goal deepcopies of
        # rnn*/embed_goal*, but they are independent parameters (rnn1 trains,
        # meta* is frozen -> they diverge).  Initialise independently so the
        # 4-way block-diagonal fusion is exercised in the general case.
        "meta1_rnn": gru_params(ks[2], D1, L1),
        "meta2_rnn": gru_params(ks[3], D2, L2),
        "eg1": linear_params(ks[4], G1, L1),
        "eg2": linear_params(ks[5], G2, L2),
        "meta1_eg": linear_params(ks[6], G1, L1),
        "meta2_eg": linear_params(ks[7], G2, L2),
        # embed[0]/embed[1]/embed[2]: bf16 weights (f32 MXU accum), f32 biases
        "e0": linear_params(ks[8], LD + GE, EH, jnp.bfloat16),
        "e1": linear_params(ks[9], EH, EH, jnp.bfloat16),
        # embed[-1] is explicitly zero-initialized in AdaptNet.__init__
        "e2": (jnp.zeros((EH, LD), jnp.bfloat16), jnp.zeros((1, LD), jnp.float32)),
        "m1_0": linear_params(ks[10], L1, MH),
        "m1_1": linear_params(ks[11], MH, MH),
        "m2_0": linear_params(ks[12], L2, MH),
        "m2_1": linear_params(ks[13], MH, MH),
        "mu1": linear_params(ks[14], MH, A1),
        "ls1": linear_params(ks[15], MH, A1),
        "mu2": linear_params(ks[16], MH, A2),
        "ls2": linear_params(ks[17], MH, A2),
    }


# ==================================== main ===================================
if __name__ == "__main__":
    key = jax.random.PRNGKey(0)
    pk, xk = jax.random.split(key)
    params = init_params(pk)
    kparams = prepare_kernel_params(params)        # one-time host-side fusion

    k1, k2, k3 = jax.random.split(xk, 3)
    s0 = jax.random.normal(k1, (N, T, D1 + D2), jnp.float32)
    s1 = jax.random.normal(k2, (N, T, D1 + D2), jnp.float32)
    g = jax.random.normal(k3, (N, G1 + G2 + GE), jnp.float32)
    seq_end_frame = jnp.array([3, 9], dtype=jnp.int32)  # second value exercises clip to T-1

    fwd = jax.jit(adaptnet_forward)
    mu, sigma = fwd(kparams, (s0, s1), seq_end_frame, g)
    jax.block_until_ready((mu, sigma))

    with jax.default_matmul_precision("highest"):
        mu_ref, sigma_ref = adaptnet_forward_ref(params, (s0, s1), seq_end_frame, g)

    assert mu.shape == (N, A) and sigma.shape == (N, A)
    np.testing.assert_allclose(np.asarray(mu), np.asarray(mu_ref), rtol=2e-2, atol=2e-2)
    np.testing.assert_allclose(np.asarray(sigma), np.asarray(sigma_ref), rtol=2e-2, atol=2e-2)
    assert bool(jnp.all(sigma > 0.0))

    # Extra numerical check with a non-zero embed[-1] (non-spec test weights) so
    # the bf16 embed-MLP path actually influences the outputs.
    params2 = dict(params)
    params2["e2"] = ((0.02 * jax.random.normal(jax.random.PRNGKey(7), (EH, LD),
                                               jnp.float32)).astype(jnp.bfloat16),
                     jnp.zeros((1, LD), jnp.float32))
    kparams2 = prepare_kernel_params(params2)
    mu2, sigma2 = fwd(kparams2, (s0, s1), seq_end_frame, g)
    jax.block_until_ready((mu2, sigma2))
    with jax.default_matmul_precision("highest"):
        mu2_ref, sigma2_ref = adaptnet_forward_ref(params2, (s0, s1), seq_end_frame, g)
    np.testing.assert_allclose(np.asarray(mu2), np.asarray(mu2_ref), rtol=2e-2, atol=2e-2)
    np.testing.assert_allclose(np.asarray(sigma2), np.asarray(sigma2_ref), rtol=2e-2, atol=2e-2)

    print("KERNEL_OK")
</pallas_src>

<mosaic_0001>
module attributes {stable_mosaic.version = 11 : i64} {
  func.func @adaptnet_kernel(%arg0: memref<64x64xf32, #tpu.memory_space<vmem>>, %arg1: memref<8x1xi32, #tpu.memory_space<vmem>>, %arg2: memref<2x20xf32, #tpu.memory_space<vmem>>, %arg3: memref<64x384xbf16, #tpu.memory_space<vmem>>, %arg4: memref<128x384xbf16, #tpu.memory_space<vmem>>, %arg5: memref<1x384xf32, #tpu.memory_space<vmem>>, %arg6: memref<1x384xf32, #tpu.memory_space<vmem>>, %arg7: memref<16x128xf32, #tpu.memory_space<vmem>>, %arg8: memref<1x128xf32, #tpu.memory_space<vmem>>, %arg9: memref<1x1024xf32, #tpu.memory_space<vmem>>, %arg10: memref<1x1024xf32, #tpu.memory_space<vmem>>, %arg11: memref<1x64xf32, #tpu.memory_space<vmem>>, %arg12: memref<64x64xf32, #tpu.memory_space<vmem>>, %arg13: memref<1x64xf32, #tpu.memory_space<vmem>>, %arg14: memref<64x64xf32, #tpu.memory_space<vmem>>, %arg15: memref<1x64xf32, #tpu.memory_space<vmem>>, %arg16: memref<64x32xf32, #tpu.memory_space<vmem>>, %arg17: memref<1x32xf32, #tpu.memory_space<vmem>>, %arg18: memref<68x1024xbf16, #tpu.memory_space<any>>, %arg19: memref<1024x1024xbf16, #tpu.memory_space<any>>, %arg20: memref<1024x64xbf16, #tpu.memory_space<any>>, %arg21: memref<2x16xf32, #tpu.memory_space<vmem>>, %arg22: memref<2x16xf32, #tpu.memory_space<vmem>>, %arg23: memref<68x1024xbf16, #tpu.memory_space<vmem>>, %arg24: memref<1024x1024xbf16, #tpu.memory_space<vmem>>, %arg25: memref<1024x64xbf16, #tpu.memory_space<vmem>>, %arg26: memref<3x!tpu.dma_semaphore, #tpu.memory_space<semaphore_mem>>) attributes {dimension_semantics = [], scalar_prefetch = 0 : i64, scratch_operands = 4 : i64, tpu.core_type = #tpu.core_type<tc>} {
    %c0_i32 = arith.constant 0 : i32
    %0 = tpu.memref_slice %arg26[%c0_i32] : memref<3x!tpu.dma_semaphore, #tpu.memory_space<semaphore_mem>> -> memref<1x!tpu.dma_semaphore, #tpu.memory_space<semaphore_mem>>
    %1 = tpu.memref_squeeze %0 : memref<1x!tpu.dma_semaphore, #tpu.memory_space<semaphore_mem>> -> memref<!tpu.dma_semaphore, #tpu.memory_space<semaphore_mem>>
    tpu.enqueue_dma source(%arg18 : memref<68x1024xbf16, #tpu.memory_space<any>>) target(%arg23 : memref<68x1024xbf16, #tpu.memory_space<vmem>>) target_semaphore(%1 : memref<!tpu.dma_semaphore, #tpu.memory_space<semaphore_mem>>)
    %c1_i32 = arith.constant 1 : i32
    %2 = tpu.memref_slice %arg26[%c1_i32] : memref<3x!tpu.dma_semaphore, #tpu.memory_space<semaphore_mem>> -> memref<1x!tpu.dma_semaphore, #tpu.memory_space<semaphore_mem>>
    %3 = tpu.memref_squeeze %2 : memref<1x!tpu.dma_semaphore, #tpu.memory_space<semaphore_mem>> -> memref<!tpu.dma_semaphore, #tpu.memory_space<semaphore_mem>>
    tpu.enqueue_dma source(%arg19 : memref<1024x1024xbf16, #tpu.memory_space<any>>) target(%arg24 : memref<1024x1024xbf16, #tpu.memory_space<vmem>>) target_semaphore(%3 : memref<!tpu.dma_semaphore, #tpu.memory_space<semaphore_mem>>)
    %c2_i32 = arith.constant 2 : i32
    %4 = tpu.memref_slice %arg26[%c2_i32] : memref<3x!tpu.dma_semaphore, #tpu.memory_space<semaphore_mem>> -> memref<1x!tpu.dma_semaphore, #tpu.memory_space<semaphore_mem>>
    %5 = tpu.memref_squeeze %4 : memref<1x!tpu.dma_semaphore, #tpu.memory_space<semaphore_mem>> -> memref<!tpu.dma_semaphore, #tpu.memory_space<semaphore_mem>>
    tpu.enqueue_dma source(%arg20 : memref<1024x64xbf16, #tpu.memory_space<any>>) target(%arg25 : memref<1024x64xbf16, #tpu.memory_space<vmem>>) target_semaphore(%5 : memref<!tpu.dma_semaphore, #tpu.memory_space<semaphore_mem>>)
    %c0 = arith.constant 0 : index
    %c0_0 = arith.constant 0 : index
    %6 = vector.load %arg0[%c0, %c0_0] : memref<64x64xf32, #tpu.memory_space<vmem>>, vector<64x64xf32>
    %c0_1 = arith.constant 0 : index
    %c0_2 = arith.constant 0 : index
    %7 = vector.load %arg1[%c0_1, %c0_2] : memref<8x1xi32, #tpu.memory_space<vmem>>, vector<8x1xi32>
    %c0_3 = arith.constant 0 : index
    %c0_4 = arith.constant 0 : index
    %8 = vector.load %arg3[%c0_3, %c0_4] : memref<64x384xbf16, #tpu.memory_space<vmem>>, vector<64x384xbf16>
    %c0_5 = arith.constant 0 : index
    %c0_6 = arith.constant 0 : index
    %9 = vector.load %arg4[%c0_5, %c0_6] : memref<128x384xbf16, #tpu.memory_space<vmem>>, vector<128x384xbf16>
    %c0_7 = arith.constant 0 : index
    %c0_8 = arith.constant 0 : index
    %10 = vector.load %arg6[%c0_7, %c0_8] : memref<1x384xf32, #tpu.memory_space<vmem>>, vector<1x384xf32>
    %11 = arith.truncf %6 : vector<64x64xf32> to vector<64x64xbf16>
    %cst = arith.constant dense<0.000000e+00> : vector<64x384xf32>
    %12 = tpu.matmul %11, %8, %cst {dimension_numbers = #tpu.dot_dimension_numbers<[1], [0], [0], [1], [0, 0, 1, 1], [], []>} : vector<64x64xbf16>, vector<64x384xbf16>, vector<64x384xf32> -> vector<64x384xf32>
    %c0_9 = arith.constant 0 : index
    %c0_10 = arith.constant 0 : index
    %13 = vector.load %arg5[%c0_9, %c0_10] : memref<1x384xf32, #tpu.memory_space<vmem>>, vector<1x384xf32>
    %14 = vector.broadcast %13 : vector<1x384xf32> to vector<64x384xf32>
    %15 = arith.addf %12, %14 : vector<64x384xf32>
    %cst_11 = arith.constant 0.000000e+00 : f32
    %16 = vector.broadcast %cst_11 : f32 to vector<8x128xf32>
    %cst_12 = arith.constant 0.000000e+00 : f32
    %17 = vector.broadcast %cst_12 : f32 to vector<8x128xf32>
    %18 = vector.extract_strided_slice %15 {offsets = [0, 0], sizes = [8, 384], strides = [1, 1]} : vector<64x384xf32> to vector<8x384xf32>
    %19 = arith.truncf %16 : vector<8x128xf32> to vector<8x128xbf16>
    %cst_13 = arith.constant dense<0.000000e+00> : vector<8x384xf32>
    %20 = tpu.matmul %19, %9, %cst_13 {dimension_numbers = #tpu.dot_dimension_numbers<[1], [0], [0], [1], [0, 0, 1, 1], [], []>} : vector<8x128xbf16>, vector<128x384xbf16>, vector<8x384xf32> -> vector<8x384xf32>
    %21 = vector.broadcast %10 : vector<1x384xf32> to vector<8x384xf32>
    %22 = arith.addf %20, %21 : vector<8x384xf32>
    %23 = vector.extract_strided_slice %18 {offsets = [0, 0], sizes = [8, 128], strides = [1, 1]} : vector<8x384xf32> to vector<8x128xf32>
    %24 = vector.extract_strided_slice %22 {offsets = [0, 0], sizes = [8, 128], strides = [1, 1]} : vector<8x384xf32> to vector<8x128xf32>
    %25 = arith.addf %23, %24 : vector<8x128xf32>
    %26 = arith.negf %25 : vector<8x128xf32>
    %27 = math.exp %26 : vector<8x128xf32>
    %cst_14 = arith.constant 1.000000e+00 : f32
    %28 = vector.broadcast %cst_14 : f32 to vector<8x128xf32>
    %29 = arith.addf %28, %27 : vector<8x128xf32>
    %30 = arith.divf %28, %29 : vector<8x128xf32>
    %31 = vector.extract_strided_slice %18 {offsets = [0, 128], sizes = [8, 128], strides = [1, 1]} : vector<8x384xf32> to vector<8x128xf32>
    %32 = vector.extract_strided_slice %22 {offsets = [0, 128], sizes = [8, 128], strides = [1, 1]} : vector<8x384xf32> to vector<8x128xf32>
    %33 = arith.addf %31, %32 : vector<8x128xf32>
    %34 = arith.negf %33 : vector<8x128xf32>
    %35 = math.exp %34 : vector<8x128xf32>
    %cst_15 = arith.constant 1.000000e+00 : f32
    %36 = vector.broadcast %cst_15 : f32 to vector<8x128xf32>
    %37 = arith.addf %36, %35 : vector<8x128xf32>
    %38 = arith.divf %36, %37 : vector<8x128xf32>
    %39 = vector.extract_strided_slice %18 {offsets = [0, 256], sizes = [8, 128], strides = [1, 1]} : vector<8x384xf32> to vector<8x128xf32>
    %40 = vector.extract_strided_slice %22 {offsets = [0, 256], sizes = [8, 128], strides = [1, 1]} : vector<8x384xf32> to vector<8x128xf32>
    %41 = arith.mulf %30, %40 : vector<8x128xf32>
    %42 = arith.addf %39, %41 : vector<8x128xf32>
    %43 = math.tanh %42 : vector<8x128xf32>
    %cst_16 = arith.constant 1.000000e+00 : f32
    %44 = vector.broadcast %cst_16 : f32 to vector<8x128xf32>
    %45 = arith.subf %44, %38 : vector<8x128xf32>
    %46 = arith.mulf %45, %43 : vector<8x128xf32>
    %47 = arith.mulf %38, %16 : vector<8x128xf32>
    %48 = arith.addf %46, %47 : vector<8x128xf32>
    %c0_i32_17 = arith.constant 0 : i32
    %49 = vector.broadcast %c0_i32_17 : i32 to vector<8x1xi32>
    %50 = arith.cmpi eq, %7, %49 : vector<8x1xi32>
    %51 = vector.shape_cast %50 : vector<8x1xi1> to vector<8x1xi1>
    %52 = vector.broadcast %51 : vector<8x1xi1> to vector<8x128xi1>
    %53 = arith.select %52, %48, %17 : vector<8x128xi1>, vector<8x128xf32>
    %54 = vector.extract_strided_slice %15 {offsets = [8, 0], sizes = [8, 384], strides = [1, 1]} : vector<64x384xf32> to vector<8x384xf32>
    %55 = arith.truncf %48 : vector<8x128xf32> to vector<8x128xbf16>
    %cst_18 = arith.constant dense<0.000000e+00> : vector<8x384xf32>
    %56 = tpu.matmul %55, %9, %cst_18 {dimension_numbers = #tpu.dot_dimension_numbers<[1], [0], [0], [1], [0, 0, 1, 1], [], []>} : vector<8x128xbf16>, vector<128x384xbf16>, vector<8x384xf32> -> vector<8x384xf32>
    %57 = vector.broadcast %10 : vector<1x384xf32> to vector<8x384xf32>
    %58 = arith.addf %56, %57 : vector<8x384xf32>
    %59 = vector.extract_strided_slice %54 {offsets = [0, 0], sizes = [8, 128], strides = [1, 1]} : vector<8x384xf32> to vector<8x128xf32>
    %60 = vector.extract_strided_slice %58 {offsets = [0, 0], sizes = [8, 128], strides = [1, 1]} : vector<8x384xf32> to vector<8x128xf32>
    %61 = arith.addf %59, %60 : vector<8x128xf32>
    %62 = arith.negf %61 : vector<8x128xf32>
    %63 = math.exp %62 : vector<8x128xf32>
    %cst_19 = arith.constant 1.000000e+00 : f32
    %64 = vector.broadcast %cst_19 : f32 to vector<8x128xf32>
    %65 = arith.addf %64, %63 : vector<8x128xf32>
    %66 = arith.divf %64, %65 : vector<8x128xf32>
    %67 = vector.extract_strided_slice %54 {offsets = [0, 128], sizes = [8, 128], strides = [1, 1]} : vector<8x384xf32> to vector<8x128xf32>
    %68 = vector.extract_strided_slice %58 {offsets = [0, 128], sizes = [8, 128], strides = [1, 1]} : vector<8x384xf32> to vector<8x128xf32>
    %69 = arith.addf %67, %68 : vector<8x128xf32>
    %70 = arith.negf %69 : vector<8x128xf32>
    %71 = math.exp %70 : vector<8x128xf32>
    %cst_20 = arith.constant 1.000000e+00 : f32
    %72 = vector.broadcast %cst_20 : f32 to vector<8x128xf32>
    %73 = arith.addf %72, %71 : vector<8x128xf32>
    %74 = arith.divf %72, %73 : vector<8x128xf32>
    %75 = vector.extract_strided_slice %54 {offsets = [0, 256], sizes = [8, 128], strides = [1, 1]} : vector<8x384xf32> to vector<8x128xf32>
    %76 = vector.extract_strided_slice %58 {offsets = [0, 256], sizes = [8, 128], strides = [1, 1]} : vector<8x384xf32> to vector<8x128xf32>
    %77 = arith.mulf %66, %76 : vector<8x128xf32>
    %78 = arith.addf %75, %77 : vector<8x128xf32>
    %79 = math.tanh %78 : vector<8x128xf32>
    %cst_21 = arith.constant 1.000000e+00 : f32
    %80 = vector.broadcast %cst_21 : f32 to vector<8x128xf32>
    %81 = arith.subf %80, %74 : vector<8x128xf32>
    %82 = arith.mulf %81, %79 : vector<8x128xf32>
    %83 = arith.mulf %74, %48 : vector<8x128xf32>
    %84 = arith.addf %82, %83 : vector<8x128xf32>
    %c1_i32_22 = arith.constant 1 : i32
    %85 = vector.broadcast %c1_i32_22 : i32 to vector<8x1xi32>
    %86 = arith.cmpi eq, %7, %85 : vector<8x1xi32>
    %87 = vector.shape_cast %86 : vector<8x1xi1> to vector<8x1xi1>
    %88 = vector.broadcast %87 : vector<8x1xi1> to vector<8x128xi1>
    %89 = arith.select %88, %84, %53 : vector<8x128xi1>, vector<8x128xf32>
    %90 = vector.extract_strided_slice %15 {offsets = [16, 0], sizes = [8, 384], strides = [1, 1]} : vector<64x384xf32> to vector<8x384xf32>
    %91 = arith.truncf %84 : vector<8x128xf32> to vector<8x128xbf16>
    %cst_23 = arith.constant dense<0.000000e+00> : vector<8x384xf32>
    %92 = tpu.matmul %91, %9, %cst_23 {dimension_numbers = #tpu.dot_dimension_numbers<[1], [0], [0], [1], [0, 0, 1, 1], [], []>} : vector<8x128xbf16>, vector<128x384xbf16>, vector<8x384xf32> -> vector<8x384xf32>
    %93 = vector.broadcast %10 : vector<1x384xf32> to vector<8x384xf32>
    %94 = arith.addf %92, %93 : vector<8x384xf32>
    %95 = vector.extract_strided_slice %90 {offsets = [0, 0], sizes = [8, 128], strides = [1, 1]} : vector<8x384xf32> to vector<8x128xf32>
    %96 = vector.extract_strided_slice %94 {offsets = [0, 0], sizes = [8, 128], strides = [1, 1]} : vector<8x384xf32> to vector<8x128xf32>
    %97 = arith.addf %95, %96 : vector<8x128xf32>
    %98 = arith.negf %97 : vector<8x128xf32>
    %99 = math.exp %98 : vector<8x128xf32>
    %cst_24 = arith.constant 1.000000e+00 : f32
    %100 = vector.broadcast %cst_24 : f32 to vector<8x128xf32>
    %101 = arith.addf %100, %99 : vector<8x128xf32>
    %102 = arith.divf %100, %101 : vector<8x128xf32>
    %103 = vector.extract_strided_slice %90 {offsets = [0, 128], sizes = [8, 128], strides = [1, 1]} : vector<8x384xf32> to vector<8x128xf32>
    %104 = vector.extract_strided_slice %94 {offsets = [0, 128], sizes = [8, 128], strides = [1, 1]} : vector<8x384xf32> to vector<8x128xf32>
    %105 = arith.addf %103, %104 : vector<8x128xf32>
    %106 = arith.negf %105 : vector<8x128xf32>
    %107 = math.exp %106 : vector<8x128xf32>
    %cst_25 = arith.constant 1.000000e+00 : f32
    %108 = vector.broadcast %cst_25 : f32 to vector<8x128xf32>
    %109 = arith.addf %108, %107 : vector<8x128xf32>
    %110 = arith.divf %108, %109 : vector<8x128xf32>
    %111 = vector.extract_strided_slice %90 {offsets = [0, 256], sizes = [8, 128], strides = [1, 1]} : vector<8x384xf32> to vector<8x128xf32>
    %112 = vector.extract_strided_slice %94 {offsets = [0, 256], sizes = [8, 128], strides = [1, 1]} : vector<8x384xf32> to vector<8x128xf32>
    %113 = arith.mulf %102, %112 : vector<8x128xf32>
    %114 = arith.addf %111, %113 : vector<8x128xf32>
    %115 = math.tanh %114 : vector<8x128xf32>
    %cst_26 = arith.constant 1.000000e+00 : f32
    %116 = vector.broadcast %cst_26 : f32 to vector<8x128xf32>
    %117 = arith.subf %116, %110 : vector<8x128xf32>
    %118 = arith.mulf %117, %115 : vector<8x128xf32>
    %119 = arith.mulf %110, %84 : vector<8x128xf32>
    %120 = arith.addf %118, %119 : vector<8x128xf32>
    %c2_i32_27 = arith.constant 2 : i32
    %121 = vector.broadcast %c2_i32_27 : i32 to vector<8x1xi32>
    %122 = arith.cmpi eq, %7, %121 : vector<8x1xi32>
    %123 = vector.shape_cast %122 : vector<8x1xi1> to vector<8x1xi1>
    %124 = vector.broadcast %123 : vector<8x1xi1> to vector<8x128xi1>
    %125 = arith.select %124, %120, %89 : vector<8x128xi1>, vector<8x128xf32>
    %126 = vector.extract_strided_slice %15 {offsets = [24, 0], sizes = [8, 384], strides = [1, 1]} : vector<64x384xf32> to vector<8x384xf32>
    %127 = arith.truncf %120 : vector<8x128xf32> to vector<8x128xbf16>
    %cst_28 = arith.constant dense<0.000000e+00> : vector<8x384xf32>
    %128 = tpu.matmul %127, %9, %cst_28 {dimension_numbers = #tpu.dot_dimension_numbers<[1], [0], [0], [1], [0, 0, 1, 1], [], []>} : vector<8x128xbf16>, vector<128x384xbf16>, vector<8x384xf32> -> vector<8x384xf32>
    %129 = vector.broadcast %10 : vector<1x384xf32> to vector<8x384xf32>
    %130 = arith.addf %128, %129 : vector<8x384xf32>
    %131 = vector.extract_strided_slice %126 {offsets = [0, 0], sizes = [8, 128], strides = [1, 1]} : vector<8x384xf32> to vector<8x128xf32>
    %132 = vector.extract_strided_slice %130 {offsets = [0, 0], sizes = [8, 128], strides = [1, 1]} : vector<8x384xf32> to vector<8x128xf32>
    %133 = arith.addf %131, %132 : vector<8x128xf32>
    %134 = arith.negf %133 : vector<8x128xf32>
    %135 = math.exp %134 : vector<8x128xf32>
    %cst_29 = arith.constant 1.000000e+00 : f32
    %136 = vector.broadcast %cst_29 : f32 to vector<8x128xf32>
    %137 = arith.addf %136, %135 : vector<8x128xf32>
    %138 = arith.divf %136, %137 : vector<8x128xf32>
    %139 = vector.extract_strided_slice %126 {offsets = [0, 128], sizes = [8, 128], strides = [1, 1]} : vector<8x384xf32> to vector<8x128xf32>
    %140 = vector.extract_strided_slice %130 {offsets = [0, 128], sizes = [8, 128], strides = [1, 1]} : vector<8x384xf32> to vector<8x128xf32>
    %141 = arith.addf %139, %140 : vector<8x128xf32>
    %142 = arith.negf %141 : vector<8x128xf32>
    %143 = math.exp %142 : vector<8x128xf32>
    %cst_30 = arith.constant 1.000000e+00 : f32
    %144 = vector.broadcast %cst_30 : f32 to vector<8x128xf32>
    %145 = arith.addf %144, %143 : vector<8x128xf32>
    %146 = arith.divf %144, %145 : vector<8x128xf32>
    %147 = vector.extract_strided_slice %126 {offsets = [0, 256], sizes = [8, 128], strides = [1, 1]} : vector<8x384xf32> to vector<8x128xf32>
    %148 = vector.extract_strided_slice %130 {offsets = [0, 256], sizes = [8, 128], strides = [1, 1]} : vector<8x384xf32> to vector<8x128xf32>
    %149 = arith.mulf %138, %148 : vector<8x128xf32>
    %150 = arith.addf %147, %149 : vector<8x128xf32>
    %151 = math.tanh %150 : vector<8x128xf32>
    %cst_31 = arith.constant 1.000000e+00 : f32
    %152 = vector.broadcast %cst_31 : f32 to vector<8x128xf32>
    %153 = arith.subf %152, %146 : vector<8x128xf32>
    %154 = arith.mulf %153, %151 : vector<8x128xf32>
    %155 = arith.mulf %146, %120 : vector<8x128xf32>
    %156 = arith.addf %154, %155 : vector<8x128xf32>
    %c3_i32 = arith.constant 3 : i32
    %157 = vector.broadcast %c3_i32 : i32 to vector<8x1xi32>
    %158 = arith.cmpi eq, %7, %157 : vector<8x1xi32>
    %159 = vector.shape_cast %158 : vector<8x1xi1> to vector<8x1xi1>
    %160 = vector.broadcast %159 : vector<8x1xi1> to vector<8x128xi1>
    %161 = arith.select %160, %156, %125 : vector<8x128xi1>, vector<8x128xf32>
    %162 = vector.extract_strided_slice %15 {offsets = [32, 0], sizes = [8, 384], strides = [1, 1]} : vector<64x384xf32> to vector<8x384xf32>
    %163 = arith.truncf %156 : vector<8x128xf32> to vector<8x128xbf16>
    %cst_32 = arith.constant dense<0.000000e+00> : vector<8x384xf32>
    %164 = tpu.matmul %163, %9, %cst_32 {dimension_numbers = #tpu.dot_dimension_numbers<[1], [0], [0], [1], [0, 0, 1, 1], [], []>} : vector<8x128xbf16>, vector<128x384xbf16>, vector<8x384xf32> -> vector<8x384xf32>
    %165 = vector.broadcast %10 : vector<1x384xf32> to vector<8x384xf32>
    %166 = arith.addf %164, %165 : vector<8x384xf32>
    %167 = vector.extract_strided_slice %162 {offsets = [0, 0], sizes = [8, 128], strides = [1, 1]} : vector<8x384xf32> to vector<8x128xf32>
    %168 = vector.extract_strided_slice %166 {offsets = [0, 0], sizes = [8, 128], strides = [1, 1]} : vector<8x384xf32> to vector<8x128xf32>
    %169 = arith.addf %167, %168 : vector<8x128xf32>
    %170 = arith.negf %169 : vector<8x128xf32>
    %171 = math.exp %170 : vector<8x128xf32>
    %cst_33 = arith.constant 1.000000e+00 : f32
    %172 = vector.broadcast %cst_33 : f32 to vector<8x128xf32>
    %173 = arith.addf %172, %171 : vector<8x128xf32>
    %174 = arith.divf %172, %173 : vector<8x128xf32>
    %175 = vector.extract_strided_slice %162 {offsets = [0, 128], sizes = [8, 128], strides = [1, 1]} : vector<8x384xf32> to vector<8x128xf32>
    %176 = vector.extract_strided_slice %166 {offsets = [0, 128], sizes = [8, 128], strides = [1, 1]} : vector<8x384xf32> to vector<8x128xf32>
    %177 = arith.addf %175, %176 : vector<8x128xf32>
    %178 = arith.negf %177 : vector<8x128xf32>
    %179 = math.exp %178 : vector<8x128xf32>
    %cst_34 = arith.constant 1.000000e+00 : f32
    %180 = vector.broadcast %cst_34 : f32 to vector<8x128xf32>
    %181 = arith.addf %180, %179 : vector<8x128xf32>
    %182 = arith.divf %180, %181 : vector<8x128xf32>
    %183 = vector.extract_strided_slice %162 {offsets = [0, 256], sizes = [8, 128], strides = [1, 1]} : vector<8x384xf32> to vector<8x128xf32>
    %184 = vector.extract_strided_slice %166 {offsets = [0, 256], sizes = [8, 128], strides = [1, 1]} : vector<8x384xf32> to vector<8x128xf32>
    %185 = arith.mulf %174, %184 : vector<8x128xf32>
    %186 = arith.addf %183, %185 : vector<8x128xf32>
    %187 = math.tanh %186 : vector<8x128xf32>
    %cst_35 = arith.constant 1.000000e+00 : f32
    %188 = vector.broadcast %cst_35 : f32 to vector<8x128xf32>
    %189 = arith.subf %188, %182 : vector<8x128xf32>
    %190 = arith.mulf %189, %187 : vector<8x128xf32>
    %191 = arith.mulf %182, %156 : vector<8x128xf32>
    %192 = arith.addf %190, %191 : vector<8x128xf32>
    %c4_i32 = arith.constant 4 : i32
    %193 = vector.broadcast %c4_i32 : i32 to vector<8x1xi32>
    %194 = arith.cmpi eq, %7, %193 : vector<8x1xi32>
    %195 = vector.shape_cast %194 : vector<8x1xi1> to vector<8x1xi1>
    %196 = vector.broadcast %195 : vector<8x1xi1> to vector<8x128xi1>
    %197 = arith.select %196, %192, %161 : vector<8x128xi1>, vector<8x128xf32>
    %198 = vector.extract_strided_slice %15 {offsets = [40, 0], sizes = [8, 384], strides = [1, 1]} : vector<64x384xf32> to vector<8x384xf32>
    %199 = arith.truncf %192 : vector<8x128xf32> to vector<8x128xbf16>
    %cst_36 = arith.constant dense<0.000000e+00> : vector<8x384xf32>
    %200 = tpu.matmul %199, %9, %cst_36 {dimension_numbers = #tpu.dot_dimension_numbers<[1], [0], [0], [1], [0, 0, 1, 1], [], []>} : vector<8x128xbf16>, vector<128x384xbf16>, vector<8x384xf32> -> vector<8x384xf32>
    %201 = vector.broadcast %10 : vector<1x384xf32> to vector<8x384xf32>
    %202 = arith.addf %200, %201 : vector<8x384xf32>
    %203 = vector.extract_strided_slice %198 {offsets = [0, 0], sizes = [8, 128], strides = [1, 1]} : vector<8x384xf32> to vector<8x128xf32>
    %204 = vector.extract_strided_slice %202 {offsets = [0, 0], sizes = [8, 128], strides = [1, 1]} : vector<8x384xf32> to vector<8x128xf32>
    %205 = arith.addf %203, %204 : vector<8x128xf32>
    %206 = arith.negf %205 : vector<8x128xf32>
    %207 = math.exp %206 : vector<8x128xf32>
    %cst_37 = arith.constant 1.000000e+00 : f32
    %208 = vector.broadcast %cst_37 : f32 to vector<8x128xf32>
    %209 = arith.addf %208, %207 : vector<8x128xf32>
    %210 = arith.divf %208, %209 : vector<8x128xf32>
    %211 = vector.extract_strided_slice %198 {offsets = [0, 128], sizes = [8, 128], strides = [1, 1]} : vector<8x384xf32> to vector<8x128xf32>
    %212 = vector.extract_strided_slice %202 {offsets = [0, 128], sizes = [8, 128], strides = [1, 1]} : vector<8x384xf32> to vector<8x128xf32>
    %213 = arith.addf %211, %212 : vector<8x128xf32>
    %214 = arith.negf %213 : vector<8x128xf32>
    %215 = math.exp %214 : vector<8x128xf32>
    %cst_38 = arith.constant 1.000000e+00 : f32
    %216 = vector.broadcast %cst_38 : f32 to vector<8x128xf32>
    %217 = arith.addf %216, %215 : vector<8x128xf32>
    %218 = arith.divf %216, %217 : vector<8x128xf32>
    %219 = vector.extract_strided_slice %198 {offsets = [0, 256], sizes = [8, 128], strides = [1, 1]} : vector<8x384xf32> to vector<8x128xf32>
    %220 = vector.extract_strided_slice %202 {offsets = [0, 256], sizes = [8, 128], strides = [1, 1]} : vector<8x384xf32> to vector<8x128xf32>
    %221 = arith.mulf %210, %220 : vector<8x128xf32>
    %222 = arith.addf %219, %221 : vector<8x128xf32>
    %223 = math.tanh %222 : vector<8x128xf32>
    %cst_39 = arith.constant 1.000000e+00 : f32
    %224 = vector.broadcast %cst_39 : f32 to vector<8x128xf32>
    %225 = arith.subf %224, %218 : vector<8x128xf32>
    %226 = arith.mulf %225, %223 : vector<8x128xf32>
    %227 = arith.mulf %218, %192 : vector<8x128xf32>
    %228 = arith.addf %226, %227 : vector<8x128xf32>
    %c5_i32 = arith.constant 5 : i32
    %229 = vector.broadcast %c5_i32 : i32 to vector<8x1xi32>
    %230 = arith.cmpi eq, %7, %229 : vector<8x1xi32>
    %231 = vector.shape_cast %230 : vector<8x1xi1> to vector<8x1xi1>
    %232 = vector.broadcast %231 : vector<8x1xi1> to vector<8x128xi1>
    %233 = arith.select %232, %228, %197 : vector<8x128xi1>, vector<8x128xf32>
    %234 = vector.extract_strided_slice %15 {offsets = [48, 0], sizes = [8, 384], strides = [1, 1]} : vector<64x384xf32> to vector<8x384xf32>
    %235 = arith.truncf %228 : vector<8x128xf32> to vector<8x128xbf16>
    %cst_40 = arith.constant dense<0.000000e+00> : vector<8x384xf32>
    %236 = tpu.matmul %235, %9, %cst_40 {dimension_numbers = #tpu.dot_dimension_numbers<[1], [0], [0], [1], [0, 0, 1, 1], [], []>} : vector<8x128xbf16>, vector<128x384xbf16>, vector<8x384xf32> -> vector<8x384xf32>
    %237 = vector.broadcast %10 : vector<1x384xf32> to vector<8x384xf32>
    %238 = arith.addf %236, %237 : vector<8x384xf32>
    %239 = vector.extract_strided_slice %234 {offsets = [0, 0], sizes = [8, 128], strides = [1, 1]} : vector<8x384xf32> to vector<8x128xf32>
    %240 = vector.extract_strided_slice %238 {offsets = [0, 0], sizes = [8, 128], strides = [1, 1]} : vector<8x384xf32> to vector<8x128xf32>
    %241 = arith.addf %239, %240 : vector<8x128xf32>
    %242 = arith.negf %241 : vector<8x128xf32>
    %243 = math.exp %242 : vector<8x128xf32>
    %cst_41 = arith.constant 1.000000e+00 : f32
    %244 = vector.broadcast %cst_41 : f32 to vector<8x128xf32>
    %245 = arith.addf %244, %243 : vector<8x128xf32>
    %246 = arith.divf %244, %245 : vector<8x128xf32>
    %247 = vector.extract_strided_slice %234 {offsets = [0, 128], sizes = [8, 128], strides = [1, 1]} : vector<8x384xf32> to vector<8x128xf32>
    %248 = vector.extract_strided_slice %238 {offsets = [0, 128], sizes = [8, 128], strides = [1, 1]} : vector<8x384xf32> to vector<8x128xf32>
    %249 = arith.addf %247, %248 : vector<8x128xf32>
    %250 = arith.negf %249 : vector<8x128xf32>
    %251 = math.exp %250 : vector<8x128xf32>
    %cst_42 = arith.constant 1.000000e+00 : f32
    %252 = vector.broadcast %cst_42 : f32 to vector<8x128xf32>
    %253 = arith.addf %252, %251 : vector<8x128xf32>
    %254 = arith.divf %252, %253 : vector<8x128xf32>
    %255 = vector.extract_strided_slice %234 {offsets = [0, 256], sizes = [8, 128], strides = [1, 1]} : vector<8x384xf32> to vector<8x128xf32>
    %256 = vector.extract_strided_slice %238 {offsets = [0, 256], sizes = [8, 128], strides = [1, 1]} : vector<8x384xf32> to vector<8x128xf32>
    %257 = arith.mulf %246, %256 : vector<8x128xf32>
    %258 = arith.addf %255, %257 : vector<8x128xf32>
    %259 = math.tanh %258 : vector<8x128xf32>
    %cst_43 = arith.constant 1.000000e+00 : f32
    %260 = vector.broadcast %cst_43 : f32 to vector<8x128xf32>
    %261 = arith.subf %260, %254 : vector<8x128xf32>
    %262 = arith.mulf %261, %259 : vector<8x128xf32>
    %263 = arith.mulf %254, %228 : vector<8x128xf32>
    %264 = arith.addf %262, %263 : vector<8x128xf32>
    %c6_i32 = arith.constant 6 : i32
    %265 = vector.broadcast %c6_i32 : i32 to vector<8x1xi32>
    %266 = arith.cmpi eq, %7, %265 : vector<8x1xi32>
    %267 = vector.shape_cast %266 : vector<8x1xi1> to vector<8x1xi1>
    %268 = vector.broadcast %267 : vector<8x1xi1> to vector<8x128xi1>
    %269 = arith.select %268, %264, %233 : vector<8x128xi1>, vector<8x128xf32>
    %270 = vector.extract_strided_slice %15 {offsets = [56, 0], sizes = [8, 384], strides = [1, 1]} : vector<64x384xf32> to vector<8x384xf32>
    %271 = arith.truncf %264 : vector<8x128xf32> to vector<8x128xbf16>
    %cst_44 = arith.constant dense<0.000000e+00> : vector<8x384xf32>
    %272 = tpu.matmul %271, %9, %cst_44 {dimension_numbers = #tpu.dot_dimension_numbers<[1], [0], [0], [1], [0, 0, 1, 1], [], []>} : vector<8x128xbf16>, vector<128x384xbf16>, vector<8x384xf32> -> vector<8x384xf32>
    %273 = vector.broadcast %10 : vector<1x384xf32> to vector<8x384xf32>
    %274 = arith.addf %272, %273 : vector<8x384xf32>
    %275 = vector.extract_strided_slice %270 {offsets = [0, 0], sizes = [8, 128], strides = [1, 1]} : vector<8x384xf32> to vector<8x128xf32>
    %276 = vector.extract_strided_slice %274 {offsets = [0, 0], sizes = [8, 128], strides = [1, 1]} : vector<8x384xf32> to vector<8x128xf32>
    %277 = arith.addf %275, %276 : vector<8x128xf32>
    %278 = arith.negf %277 : vector<8x128xf32>
    %279 = math.exp %278 : vector<8x128xf32>
    %cst_45 = arith.constant 1.000000e+00 : f32
    %280 = vector.broadcast %cst_45 : f32 to vector<8x128xf32>
    %281 = arith.addf %280, %279 : vector<8x128xf32>
    %282 = arith.divf %280, %281 : vector<8x128xf32>
    %283 = vector.extract_strided_slice %270 {offsets = [0, 128], sizes = [8, 128], strides = [1, 1]} : vector<8x384xf32> to vector<8x128xf32>
    %284 = vector.extract_strided_slice %274 {offsets = [0, 128], sizes = [8, 128], strides = [1, 1]} : vector<8x384xf32> to vector<8x128xf32>
    %285 = arith.addf %283, %284 : vector<8x128xf32>
    %286 = arith.negf %285 : vector<8x128xf32>
    %287 = math.exp %286 : vector<8x128xf32>
    %cst_46 = arith.constant 1.000000e+00 : f32
    %288 = vector.broadcast %cst_46 : f32 to vector<8x128xf32>
    %289 = arith.addf %288, %287 : vector<8x128xf32>
    %290 = arith.divf %288, %289 : vector<8x128xf32>
    %291 = vector.extract_strided_slice %270 {offsets = [0, 256], sizes = [8, 128], strides = [1, 1]} : vector<8x384xf32> to vector<8x128xf32>
    %292 = vector.extract_strided_slice %274 {offsets = [0, 256], sizes = [8, 128], strides = [1, 1]} : vector<8x384xf32> to vector<8x128xf32>
    %293 = arith.mulf %282, %292 : vector<8x128xf32>
    %294 = arith.addf %291, %293 : vector<8x128xf32>
    %295 = math.tanh %294 : vector<8x128xf32>
    %cst_47 = arith.constant 1.000000e+00 : f32
    %296 = vector.broadcast %cst_47 : f32 to vector<8x128xf32>
    %297 = arith.subf %296, %290 : vector<8x128xf32>
    %298 = arith.mulf %297, %295 : vector<8x128xf32>
    %299 = arith.mulf %290, %264 : vector<8x128xf32>
    %300 = arith.addf %298, %299 : vector<8x128xf32>
    %c7_i32 = arith.constant 7 : i32
    %301 = vector.broadcast %c7_i32 : i32 to vector<8x1xi32>
    %302 = arith.cmpi eq, %7, %301 : vector<8x1xi32>
    %303 = vector.shape_cast %302 : vector<8x1xi1> to vector<8x1xi1>
    %304 = vector.broadcast %303 : vector<8x1xi1> to vector<8x128xi1>
    %305 = arith.select %304, %300, %269 : vector<8x128xi1>, vector<8x128xf32>
    %c0_48 = arith.constant 0 : index
    %c0_49 = arith.constant 0 : index
    %306 = vector.load %arg2[%c0_48, %c0_49] : memref<2x20xf32, #tpu.memory_space<vmem>>, vector<2x20xf32>
    %307 = vector.extract_strided_slice %306 {offsets = [0, 0], sizes = [2, 16], strides = [1, 1]} : vector<2x20xf32> to vector<2x16xf32>
    %c0_50 = arith.constant 0 : index
    %c0_51 = arith.constant 0 : index
    %308 = vector.load %arg7[%c0_50, %c0_51] : memref<16x128xf32, #tpu.memory_space<vmem>>, vector<16x128xf32>
    %cst_52 = arith.constant dense<0.000000e+00> : vector<2x128xf32>
    %309 = tpu.matmul %307, %308, %cst_52 {dimension_numbers = #tpu.dot_dimension_numbers<[1], [0], [0], [1], [0, 0, 1, 1], [], []>} : vector<2x16xf32>, vector<16x128xf32>, vector<2x128xf32> -> vector<2x128xf32>
    %c0_53 = arith.constant 0 : index
    %c0_54 = arith.constant 0 : index
    %310 = vector.load %arg8[%c0_53, %c0_54] : memref<1x128xf32, #tpu.memory_space<vmem>>, vector<1x128xf32>
    %311 = vector.broadcast %310 : vector<1x128xf32> to vector<2x128xf32>
    %312 = arith.addf %309, %311 : vector<2x128xf32>
    %313 = vector.extract_strided_slice %305 {offsets = [0, 0], sizes = [2, 64], strides = [1, 1]} : vector<8x128xf32> to vector<2x64xf32>
    %314 = vector.extract_strided_slice %312 {offsets = [0, 0], sizes = [2, 64], strides = [1, 1]} : vector<2x128xf32> to vector<2x64xf32>
    %315 = arith.addf %313, %314 : vector<2x64xf32>
    %316 = vector.extract_strided_slice %306 {offsets = [0, 16], sizes = [2, 4], strides = [1, 1]} : vector<2x20xf32> to vector<2x4xf32>
    %317 = tpu.concatenate %315, %316 in 1 : vector<2x64xf32>, vector<2x4xf32> -> vector<2x68xf32>
    %c0_i32_55 = arith.constant 0 : i32
    %318 = tpu.memref_slice %arg26[%c0_i32_55] : memref<3x!tpu.dma_semaphore, #tpu.memory_space<semaphore_mem>> -> memref<1x!tpu.dma_semaphore, #tpu.memory_space<semaphore_mem>>
    %319 = tpu.memref_squeeze %318 : memref<1x!tpu.dma_semaphore, #tpu.memory_space<semaphore_mem>> -> memref<!tpu.dma_semaphore, #tpu.memory_space<semaphore_mem>>
    tpu.wait_dma2 semaphore(%319 : memref<!tpu.dma_semaphore, #tpu.memory_space<semaphore_mem>>) src(%arg18 : memref<68x1024xbf16, #tpu.memory_space<any>>) dst(%arg23 : memref<68x1024xbf16, #tpu.memory_space<vmem>>)
    %320 = arith.truncf %317 : vector<2x68xf32> to vector<2x68xbf16>
    %c0_56 = arith.constant 0 : index
    %c0_57 = arith.constant 0 : index
    %321 = vector.load %arg23[%c0_56, %c0_57] : memref<68x1024xbf16, #tpu.memory_space<vmem>>, vector<68x1024xbf16>
    %cst_58 = arith.constant dense<0.000000e+00> : vector<2x1024xf32>
    %322 = tpu.matmul %320, %321, %cst_58 {dimension_numbers = #tpu.dot_dimension_numbers<[1], [0], [0], [1], [0, 0, 1, 1], [], []>} : vector<2x68xbf16>, vector<68x1024xbf16>, vector<2x1024xf32> -> vector<2x1024xf32>
    %c0_59 = arith.constant 0 : index
    %c0_60 = arith.constant 0 : index
    %323 = vector.load %arg9[%c0_59, %c0_60] : memref<1x1024xf32, #tpu.memory_space<vmem>>, vector<1x1024xf32>
    %324 = vector.broadcast %323 : vector<1x1024xf32> to vector<2x1024xf32>
    %325 = arith.addf %322, %324 : vector<2x1024xf32>
    %cst_61 = arith.constant 0.000000e+00 : f32
    %326 = vector.broadcast %cst_61 : f32 to vector<2x1024xf32>
    %327 = arith.maximumf %325, %326 : vector<2x1024xf32>
    %c1_i32_62 = arith.constant 1 : i32
    %328 = tpu.memref_slice %arg26[%c1_i32_62] : memref<3x!tpu.dma_semaphore, #tpu.memory_space<semaphore_mem>> -> memref<1x!tpu.dma_semaphore, #tpu.memory_space<semaphore_mem>>
    %329 = tpu.memref_squeeze %328 : memref<1x!tpu.dma_semaphore, #tpu.memory_space<semaphore_mem>> -> memref<!tpu.dma_semaphore, #tpu.memory_space<semaphore_mem>>
    tpu.wait_dma2 semaphore(%329 : memref<!tpu.dma_semaphore, #tpu.memory_space<semaphore_mem>>) src(%arg19 : memref<1024x1024xbf16, #tpu.memory_space<any>>) dst(%arg24 : memref<1024x1024xbf16, #tpu.memory_space<vmem>>)
    %330 = arith.truncf %327 : vector<2x1024xf32> to vector<2x1024xbf16>
    %c0_63 = arith.constant 0 : index
    %c0_64 = arith.constant 0 : index
    %331 = vector.load %arg24[%c0_63, %c0_64] : memref<1024x1024xbf16, #tpu.memory_space<vmem>>, vector<1024x1024xbf16>
    %cst_65 = arith.constant dense<0.000000e+00> : vector<2x1024xf32>
    %332 = tpu.matmul %330, %331, %cst_65 {dimension_numbers = #tpu.dot_dimension_numbers<[1], [0], [0], [1], [0, 0, 1, 1], [], []>} : vector<2x1024xbf16>, vector<1024x1024xbf16>, vector<2x1024xf32> -> vector<2x1024xf32>
    %c0_66 = arith.constant 0 : index
    %c0_67 = arith.constant 0 : index
    %333 = vector.load %arg10[%c0_66, %c0_67] : memref<1x1024xf32, #tpu.memory_space<vmem>>, vector<1x1024xf32>
    %334 = vector.broadcast %333 : vector<1x1024xf32> to vector<2x1024xf32>
    %335 = arith.addf %332, %334 : vector<2x1024xf32>
    %cst_68 = arith.constant 0.000000e+00 : f32
    %336 = vector.broadcast %cst_68 : f32 to vector<2x1024xf32>
    %337 = arith.maximumf %335, %336 : vector<2x1024xf32>
    %c2_i32_69 = arith.constant 2 : i32
    %338 = tpu.memref_slice %arg26[%c2_i32_69] : memref<3x!tpu.dma_semaphore, #tpu.memory_space<semaphore_mem>> -> memref<1x!tpu.dma_semaphore, #tpu.memory_space<semaphore_mem>>
    %339 = tpu.memref_squeeze %338 : memref<1x!tpu.dma_semaphore, #tpu.memory_space<semaphore_mem>> -> memref<!tpu.dma_semaphore, #tpu.memory_space<semaphore_mem>>
    tpu.wait_dma2 semaphore(%339 : memref<!tpu.dma_semaphore, #tpu.memory_space<semaphore_mem>>) src(%arg20 : memref<1024x64xbf16, #tpu.memory_space<any>>) dst(%arg25 : memref<1024x64xbf16, #tpu.memory_space<vmem>>)
    %340 = arith.truncf %337 : vector<2x1024xf32> to vector<2x1024xbf16>
    %c0_70 = arith.constant 0 : index
    %c0_71 = arith.constant 0 : index
    %341 = vector.load %arg25[%c0_70, %c0_71] : memref<1024x64xbf16, #tpu.memory_space<vmem>>, vector<1024x64xbf16>
    %cst_72 = arith.constant dense<0.000000e+00> : vector<2x64xf32>
    %342 = tpu.matmul %340, %341, %cst_72 {dimension_numbers = #tpu.dot_dimension_numbers<[1], [0], [0], [1], [0, 0, 1, 1], [], []>} : vector<2x1024xbf16>, vector<1024x64xbf16>, vector<2x64xf32> -> vector<2x64xf32>
    %c0_73 = arith.constant 0 : index
    %c0_74 = arith.constant 0 : index
    %343 = vector.load %arg11[%c0_73, %c0_74] : memref<1x64xf32, #tpu.memory_space<vmem>>, vector<1x64xf32>
    %344 = vector.broadcast %343 : vector<1x64xf32> to vector<2x64xf32>
    %345 = arith.addf %342, %344 : vector<2x64xf32>
    %346 = vector.extract_strided_slice %305 {offsets = [0, 64], sizes = [2, 64], strides = [1, 1]} : vector<8x128xf32> to vector<2x64xf32>
    %347 = arith.addf %346, %345 : vector<2x64xf32>
    %348 = vector.extract_strided_slice %312 {offsets = [0, 64], sizes = [2, 64], strides = [1, 1]} : vector<2x128xf32> to vector<2x64xf32>
    %349 = arith.addf %347, %348 : vector<2x64xf32>
    %c0_75 = arith.constant 0 : index
    %c0_76 = arith.constant 0 : index
    %350 = vector.load %arg12[%c0_75, %c0_76] : memref<64x64xf32, #tpu.memory_space<vmem>>, vector<64x64xf32>
    %cst_77 = arith.constant dense<0.000000e+00> : vector<2x64xf32>
    %351 = tpu.matmul %349, %350, %cst_77 {dimension_numbers = #tpu.dot_dimension_numbers<[1], [0], [0], [1], [0, 0, 1, 1], [], []>} : vector<2x64xf32>, vector<64x64xf32>, vector<2x64xf32> -> vector<2x64xf32>
    %c0_78 = arith.constant 0 : index
    %c0_79 = arith.constant 0 : index
    %352 = vector.load %arg13[%c0_78, %c0_79] : memref<1x64xf32, #tpu.memory_space<vmem>>, vector<1x64xf32>
    %353 = vector.broadcast %352 : vector<1x64xf32> to vector<2x64xf32>
    %354 = arith.addf %351, %353 : vector<2x64xf32>
    %cst_80 = arith.constant 0.000000e+00 : f32
    %355 = vector.broadcast %cst_80 : f32 to vector<2x64xf32>
    %356 = arith.maximumf %354, %355 : vector<2x64xf32>
    %c0_81 = arith.constant 0 : index
    %c0_82 = arith.constant 0 : index
    %357 = vector.load %arg14[%c0_81, %c0_82] : memref<64x64xf32, #tpu.memory_space<vmem>>, vector<64x64xf32>
    %cst_83 = arith.constant dense<0.000000e+00> : vector<2x64xf32>
    %358 = tpu.matmul %356, %357, %cst_83 {dimension_numbers = #tpu.dot_dimension_numbers<[1], [0], [0], [1], [0, 0, 1, 1], [], []>} : vector<2x64xf32>, vector<64x64xf32>, vector<2x64xf32> -> vector<2x64xf32>
    %c0_84 = arith.constant 0 : index
    %c0_85 = arith.constant 0 : index
    %359 = vector.load %arg15[%c0_84, %c0_85] : memref<1x64xf32, #tpu.memory_space<vmem>>, vector<1x64xf32>
    %360 = vector.broadcast %359 : vector<1x64xf32> to vector<2x64xf32>
    %361 = arith.addf %358, %360 : vector<2x64xf32>
    %cst_86 = arith.constant 0.000000e+00 : f32
    %362 = vector.broadcast %cst_86 : f32 to vector<2x64xf32>
    %363 = arith.maximumf %361, %362 : vector<2x64xf32>
    %c0_87 = arith.constant 0 : index
    %c0_88 = arith.constant 0 : index
    %364 = vector.load %arg16[%c0_87, %c0_88] : memref<64x32xf32, #tpu.memory_space<vmem>>, vector<64x32xf32>
    %cst_89 = arith.constant dense<0.000000e+00> : vector<2x32xf32>
    %365 = tpu.matmul %363, %364, %cst_89 {dimension_numbers = #tpu.dot_dimension_numbers<[1], [0], [0], [1], [0, 0, 1, 1], [], []>} : vector<2x64xf32>, vector<64x32xf32>, vector<2x32xf32> -> vector<2x32xf32>
    %c0_90 = arith.constant 0 : index
    %c0_91 = arith.constant 0 : index
    %366 = vector.load %arg17[%c0_90, %c0_91] : memref<1x32xf32, #tpu.memory_space<vmem>>, vector<1x32xf32>
    %367 = vector.broadcast %366 : vector<1x32xf32> to vector<2x32xf32>
    %368 = arith.addf %365, %367 : vector<2x32xf32>
    %369 = vector.extract_strided_slice %368 {offsets = [0, 0], sizes = [2, 16], strides = [1, 1]} : vector<2x32xf32> to vector<2x16xf32>
    %c0_92 = arith.constant 0 : index
    %c0_93 = arith.constant 0 : index
    %370 = vector.load %arg21[%c0_92, %c0_93] : memref<2x16xf32, #tpu.memory_space<vmem>>, vector<2x16xf32>
    tpu.vector_store %arg21[%c0_92, %c0_93], %369 {strides = array<i32>} : memref<2x16xf32, #tpu.memory_space<vmem>>, vector<2x16xf32>,
    %371 = vector.extract_strided_slice %368 {offsets = [0, 16], sizes = [2, 16], strides = [1, 1]} : vector<2x32xf32> to vector<2x16xf32>
    %372 = math.exp %371 : vector<2x16xf32>
    %cst_94 = arith.constant 9.99999993E-9 : f32
    %373 = vector.broadcast %cst_94 : f32 to vector<2x16xf32>
    %374 = arith.addf %372, %373 : vector<2x16xf32>
    %c0_95 = arith.constant 0 : index
    %c0_96 = arith.constant 0 : index
    %375 = vector.load %arg22[%c0_95, %c0_96] : memref<2x16xf32, #tpu.memory_space<vmem>>, vector<2x16xf32>
    tpu.vector_store %arg22[%c0_95, %c0_96], %374 {strides = array<i32>} : memref<2x16xf32, #tpu.memory_space<vmem>>, vector<2x16xf32>,
    return
  }
}

</mosaic_0001>

<bundles_post_ra>
// kernel: adaptnet_forward.1
= control target key start
LH: loop header
LB: loop body
LE: loop exit
PB: predicated region body
PF: predicated region fallthrough
CT: control target
= control target key end

     0   :  { %s10174_s0 = inlined_call_operand.vmem [shape: f32[64,64], index: 0, kind: input, shape index: {}]   ;;  %s10175_s1 = inlined_call_operand.vmem [shape: s32[8,1], index: 1, kind: input, shape index: {}]   ;;  %s10176_s2 = inlined_call_operand.hbm [shape: f32[2,20], index: 2, kind: input, shape index: {}]   ;;  %s10177_s3 = inlined_call_operand.hbm [shape: bf16[64,384], index: 3, kind: input, shape index: {}]   ;;  %s10178_s4 = inlined_call_operand.hbm [shape: bf16[128,384], index: 4, kind: input, shape index: {}]   ;;  %s10179_s5 = inlined_call_operand.hbm [shape: f32[1,384], index: 5, kind: input, shape index: {}]   ;;  %s10180_s6 = inlined_call_operand.hbm [shape: f32[1,384], index: 6, kind: input, shape index: {}]   ;;  %s10181_s7 = inlined_call_operand.hbm [shape: f32[16,128], index: 7, kind: input, shape index: {}]   ;;  %s10182_s8 = inlined_call_operand.hbm [shape: f32[1,128], index: 8, kind: input, shape index: {}]   ;;  %s10183_s9 = inlined_call_operand.hbm [shape: f32[1,1024], index: 9, kind: input, shape index: {}]   ;;  %s10184_s10 = inlined_call_operand.hbm [shape: f32[1,1024], index: 10, kind: input, shape index: {}]   ;;  %s10185_s11 = inlined_call_operand.hbm [shape: f32[1,64], index: 11, kind: input, shape index: {}]   ;;  %s10186_s12 = inlined_call_operand.hbm [shape: f32[64,64], index: 12, kind: input, shape index: {}]   ;;  %s10187_s13 = inlined_call_operand.hbm [shape: f32[1,64], index: 13, kind: input, shape index: {}]   ;;  %s10188_s14 = inlined_call_operand.hbm [shape: f32[64,64], index: 14, kind: input, shape index: {}]   ;;  %s10189_s15 = inlined_call_operand.hbm [shape: f32[1,64], index: 15, kind: input, shape index: {}]   ;;  %s10190_s16 = inlined_call_operand.vmem [shape: f32[64,32], index: 16, kind: input, shape index: {}]   ;;  %s10191_s17 = inlined_call_operand.hbm [shape: f32[1,32], index: 17, kind: input, shape index: {}]   ;;  %s10192_s18 = inlined_call_operand.hbm [shape: bf16[68,1024], index: 18, kind: input, shape index: {}]   ;;  %s10193_s19 = inlined_call_operand.hbm [shape: bf16[1024,1024], index: 19, kind: input, shape index: {}]   ;;  %s10194_s20 = inlined_call_operand.vmem [shape: bf16[1024,64], index: 20, kind: input, shape index: {}]   ;;  %s10195_s21 = inlined_call_operand.hbm [shape: f32[2,16], index: 21, kind: output, shape index: {0}]   ;;  %s10196_s22 = inlined_call_operand.hbm [shape: f32[2,16], index: 22, kind: output, shape index: {1}]  }
   0x1   :  { %10209 = sst [smem:[#allocation64_spill]] %s10174_s0 }
   0x2   :  { %10210 = sst [smem:[#allocation65_spill]] %s10175_s1 }
   0x3   :  { %10211 = sst [smem:[#allocation66_spill]] %s10176_s2 }
   0x4   :  { %10212 = sst [smem:[#allocation67_spill]] %s10177_s3 }
   0x5   :  { %10213 = sst [smem:[#allocation68_spill]] %s10178_s4 }
   0x6   :  { %10214 = sst [smem:[#allocation69_spill]] %s10179_s5 }
   0x7   :  { %10215 = sst [smem:[#allocation70_spill]] %s10180_s6 }
   0x8   :  { %28 = vsyncpa [#allocation7], 0 }
   0x9   :  { %29 = vsyncpa [#allocation10], 0 }
   0xa   :  { %30 = vsyncpa [#allocation13], 0 }
   0xb   :  { %31 = vsyncpa [#allocation16], 0 }
   0xc   :  { %32 = vsyncpa [#allocation19], 0 }
   0xd   :  { %33 = vsyncpa [#allocation22], 0 }
   0xe   :  { %34 = vsyncpa [#allocation25], 0 }
   0xf   :  { %35 = vsyncpa [#allocation28], 0 }
  0x10   :  { %36 = vsyncpa [#allocation8], 0 }
  0x11   :  { %37 = vsyncpa [#allocation32], 0  ;;  %s8940_s3 = smov [#allocation9]  }
  0x12   :  { %s57_s28 = sshll.u32 %s8940_s3, 4  ;;  %s58_s28 = int_to_ptr.vmem [resolvable:$true] %s57_s28 }
  0x13   :  { %s8542_s29 = scalar_lea.vmem %s58_s28, 1536  ;;  %p8547_p1 = scmp.lt.s32.totalorder %s58_s28, %s58_s28 }
  0x14   :  { %p8543_p0 = scmp.ne.s32.totalorder %s58_s28, %s8542_s29  ;;  %p8548_p2 = scmp.lt.s32.totalorder %s8542_s29, %s8542_s29 }
  0x16   :  { %p8549_p3 = por %p8548_p2, %p8547_p1 }
  0x18   :  { %p8550_p4 = pnand %p8549_p3, %p8543_p0 }
  0x1a   :  { %8553 = shalt.err (!%p8550_p4)
}
  0x1b   :  { %s8941_s30 = smov 192   ;;  %s8942_s4 = smov 12  }
  0x1c   :  { %s10216_s1 = sld [smem:[#allocation67_spill]]  ;;  %s8943_s5 = smov [#allocation12]  }
  0x1d   :  { %s82_s24 = sshll.u32 %s8943_s5, 4  ;;  %s8944_s6 = smov [#allocation15]   ;;  %s83_s24 = int_to_ptr.vmem [resolvable:$true] %s82_s24 }
  0x1e   :  { %s101_s25 = sshll.u32 %s8944_s6, 4  ;;  %s8562_s26 = scalar_lea.vmem %s83_s24, 48  ;;  %s102_s25 = int_to_ptr.vmem [resolvable:$true] %s101_s25 }
  0x1f   :  { %p8563_p5 = scmp.ne.s32.totalorder %s83_s24, %s8562_s26  ;;  %s8566_s2 = scalar_lea.vmem %s83_s24, 64 }
  0x20   :  { %p8567_p6 = scmp.lt.s32.totalorder %s83_s24, %s83_s24  ;;  %p8568_p7 = scmp.lt.s32.totalorder %s8566_s2, %s8562_s26 }
  0x22   :  { %63 = dma.hbm_to_vmem [thread:$0]  %s10216_s1, 1536, %s58_s28, [#allocation10], %s8941_s30, %s8941_s30, %s8942_s4  }
  0x23   :  { %p8569_p8 = por %p8568_p7, %p8567_p6 }
  0x25   :  { %p8570_p9 = pnand %p8569_p8, %p8563_p5 }
  0x27   :  { %8573 = shalt.err (!%p8570_p9)
}
  0x28   :  { %s10217_s29 = sld [smem:[#allocation69_spill]]  ;;  %s8582_s0 = scalar_lea.vmem %s102_s25, 256 }
  0x29   :  { %p8583_p10 = scmp.ne.s32.totalorder %s102_s25, %s8582_s0  ;;  %p8587_p11 = scmp.lt.s32.totalorder %s102_s25, %s102_s25 }
  0x2a   :  { %p8588_p12 = scmp.lt.s32.totalorder %s8582_s0, %s8582_s0 }
  0x2c   :  { %p8589_p13 = por %p8588_p12, %p8587_p11 }
  0x2e   :  { %85 = dma.hbm_to_vmem [thread:$0]  %s10217_s29, 48, %s83_s24, [#allocation13]  }
  0x2f   :  { %p8590_p0 = pnand %p8589_p13, %p8583_p10 }
  0x31   :  { %8593 = shalt.err (!%p8590_p0)
}
  0x32   :  { %s8945_s28 = smov 128   ;;  %s8946_s23 = smov 8  }
  0x33   :  { %107 = dma.hbm_to_vmem [thread:$0]  %s10181_s7, 256, %s102_s25, [#allocation16], %s8945_s28, %s8945_s28, %s8946_s23  }
  0x34   :  { %s8947_s6 = smov [#allocation18]   ;;  %s8948_s24 = smov [#allocation21]  }
  0x35   :  { %s124_s26 = sshll.u32 %s8947_s6, 4  ;;  %s144_s2 = sshll.u32 %s8948_s24, 4  ;;  %s125_s26 = int_to_ptr.vmem [resolvable:$true] %s124_s26  ;;  %s145_s2 = int_to_ptr.vmem [resolvable:$true] %s144_s2 }
  0x36   :  { %s8602_s27 = scalar_lea.vmem %s125_s26, 128  ;;  %p8607_p2 = scmp.lt.s32.totalorder %s125_s26, %s125_s26 }
  0x37   :  { %p8603_p1 = scmp.ne.s32.totalorder %s125_s26, %s8602_s27  ;;  %p8608_p3 = scmp.lt.s32.totalorder %s8602_s27, %s8602_s27 }
  0x39   :  { %p8609_p4 = por %p8608_p3, %p8607_p2 }
  0x3b   :  { %p8610_p5 = pnand %p8609_p4, %p8603_p1 }
  0x3d   :  { %8613 = shalt.err (!%p8610_p5)
}
  0x3e   :  { %127 = dma.hbm_to_vmem [thread:$0]  %s10183_s9, 128, %s125_s26, [#allocation19]  }
  0x3f   :  { %s8622_s0 = scalar_lea.vmem %s145_s2, 16  ;;  %s8626_s7 = scalar_lea.vmem %s145_s2, 32 }
  0x40   :  { %p8623_p6 = scmp.ne.s32.totalorder %s145_s2, %s8622_s0  ;;  %p8627_p7 = scmp.lt.s32.totalorder %s145_s2, %s145_s2 }
  0x41   :  { %p8628_p8 = scmp.lt.s32.totalorder %s8626_s7, %s8622_s0 }
  0x43   :  { %p8629_p9 = por %p8628_p8, %p8627_p7 }
  0x45   :  { %p8630_p10 = pnand %p8629_p9, %p8623_p6 }
  0x47   :  { %8633 = shalt.err (!%p8630_p10)
}
  0x48   :  { %147 = dma.hbm_to_vmem [thread:$0]  %s10185_s11, 16, %s145_s2, [#allocation22]  }
  0x49   :  { %s8949_s5 = smov [#allocation24]   ;;  %s8950_s24 = smov [#allocation27]  }
  0x4a   :  { %s166_s6 = sshll.u32 %s8949_s5, 4  ;;  %s188_s27 = sshll.u32 %s8950_s24, 4  ;;  %s167_s6 = int_to_ptr.vmem [resolvable:$true] %s166_s6  ;;  %s189_s27 = int_to_ptr.vmem [resolvable:$true] %s188_s27 }
  0x4b   :  { %s8642_s3 = scalar_lea.vmem %s167_s6, 16  ;;  %s8646_s9 = scalar_lea.vmem %s167_s6, 32 }
  0x4c   :  { %p8643_p11 = scmp.ne.s32.totalorder %s167_s6, %s8642_s3  ;;  %p8647_p12 = scmp.lt.s32.totalorder %s167_s6, %s167_s6 }
  0x4d   :  { %p8648_p13 = scmp.lt.s32.totalorder %s8646_s9, %s8642_s3 }
  0x4f   :  { %p8649_p0 = por %p8648_p13, %p8647_p12 }
  0x51   :  { %p8650_p1 = pnand %p8649_p0, %p8643_p11 }
  0x53   :  { %8653 = shalt.err (!%p8650_p1)
}
  0x54   :  { %169 = dma.hbm_to_vmem [thread:$0]  %s10187_s13, 16, %s167_s6, [#allocation25]  }
  0x55   :  { %s8662_s0 = scalar_lea.vmem %s189_s27, 16  ;;  %s8666_s11 = scalar_lea.vmem %s189_s27, 32 }
  0x56   :  { %p8663_p2 = scmp.ne.s32.totalorder %s189_s27, %s8662_s0  ;;  %p8667_p3 = scmp.lt.s32.totalorder %s189_s27, %s189_s27 }
  0x57   :  { %p8668_p4 = scmp.lt.s32.totalorder %s8666_s11, %s8662_s0 }
  0x59   :  { %p8669_p5 = por %p8668_p4, %p8667_p3 }
  0x5b   :  { %p8670_p6 = pnand %p8669_p5, %p8663_p2 }
  0x5d   :  { %8673 = shalt.err (!%p8670_p6)
}
  0x5e   :  { %191 = dma.hbm_to_vmem [thread:$0]  %s10189_s15, 16, %s189_s27, [#allocation28]  }
  0x5f   :  { %s8951_s25 = smov [#allocation6]   ;;  %s8952_s5 = smov [#allocation11]  }
  0x60   :  { %s48_s1 = sshll.u32 %s8951_s25, 4  ;;  %s69_s24 = sshll.u32 %s8952_s5, 4  ;;  %s49_s1 = int_to_ptr.vmem [resolvable:$true] %s48_s1  ;;  %s70_s24 = int_to_ptr.vmem [resolvable:$true] %s69_s24 }
  0x61   :  { %s8682_s3 = scalar_lea.vmem %s49_s1, 32  ;;  %p8687_p8 = scmp.lt.s32.totalorder %s49_s1, %s49_s1 }
  0x62   :  { %p8683_p7 = scmp.ne.s32.totalorder %s49_s1, %s8682_s3  ;;  %p8688_p9 = scmp.lt.s32.totalorder %s8682_s3, %s8682_s3 }
  0x64   :  { %p8689_p10 = por %p8688_p9, %p8687_p8 }
  0x66   :  { %p8690_p11 = pnand %p8689_p10, %p8683_p7 }
  0x68   :  { %8693 = shalt.err (!%p8690_p11)
}
  0x69   :  { %s10218_s9 = sld [smem:[#allocation66_spill]]  ;;  %s8702_s26 = scalar_lea.vmem %s70_s24, 3072 }
  0x6a   :  { %p8703_p12 = scmp.ne.s32.totalorder %s70_s24, %s8702_s26  ;;  %p8707_p13 = scmp.lt.s32.totalorder %s70_s24, %s70_s24 }
  0x6b   :  { %p8708_p0 = scmp.lt.s32.totalorder %s8702_s26, %s8702_s26 }
  0x6d   :  { %p8709_p1 = por %p8708_p0, %p8707_p13 }
  0x6f   :  { %51 = dma.hbm_to_vmem [thread:$0]  %s10218_s9, 32, %s49_s1, [#allocation7]  }
  0x70   :  { %p8710_p2 = pnand %p8709_p1, %p8703_p12 }
  0x72   :  { %8713 = shalt.err (!%p8710_p2)
}
  0x73   :  { %s10219_s29 = sld [smem:[#allocation68_spill]]  ;;  %s8953_s0 = smov [#allocation14]  }
  0x74   :  { %s92_s11 = sshll.u32 %s8953_s0, 4  ;;  %s8954_s2 = smov [#allocation17]   ;;  %s93_s11 = int_to_ptr.vmem [resolvable:$true] %s92_s11 }
  0x75   :  { %s114_s7 = sshll.u32 %s8954_s2, 4  ;;  %s8722_s25 = scalar_lea.vmem %s93_s11, 48  ;;  %s115_s7 = int_to_ptr.vmem [resolvable:$true] %s114_s7 }
  0x76   :  { %p8723_p3 = scmp.ne.s32.totalorder %s93_s11, %s8722_s25  ;;  %s8726_s1 = scalar_lea.vmem %s93_s11, 64 }
  0x77   :  { %p8727_p4 = scmp.lt.s32.totalorder %s93_s11, %s93_s11  ;;  %p8728_p5 = scmp.lt.s32.totalorder %s8726_s1, %s8722_s25 }
  0x79   :  { %75 = dma.hbm_to_vmem [thread:$0]  %s10219_s29, 3072, %s70_s24, [#allocation10], %s8941_s30, %s8941_s30, %s8942_s4  }
  0x7a   :  { %p8729_p6 = por %p8728_p5, %p8727_p4 }
  0x7c   :  { %p8730_p7 = pnand %p8729_p6, %p8723_p3 }
  0x7e   :  { %8733 = shalt.err (!%p8730_p7)
}
  0x7f   :  { %s10220_s13 = sld [smem:[#allocation70_spill]]  ;;  %s8742_s6 = scalar_lea.vmem %s115_s7, 16 }
  0x80   :  { %p8743_p8 = scmp.ne.s32.totalorder %s115_s7, %s8742_s6  ;;  %s8746_s30 = scalar_lea.vmem %s115_s7, 32 }
  0x81   :  { %p8747_p9 = scmp.lt.s32.totalorder %s115_s7, %s115_s7  ;;  %p8748_p10 = scmp.lt.s32.totalorder %s8746_s30, %s8742_s6 }
  0x83   :  { %p8749_p11 = por %p8748_p10, %p8747_p9 }
  0x85   :  { %95 = dma.hbm_to_vmem [thread:$0]  %s10220_s13, 48, %s93_s11, [#allocation13]  }
  0x86   :  { %p8750_p12 = pnand %p8749_p11, %p8743_p8 }
  0x88   :  { %8753 = shalt.err (!%p8750_p12)
}
  0x89   :  { %117 = dma.hbm_to_vmem [thread:$0]  %s10182_s8, 16, %s115_s7, [#allocation16]  }
  0x8a   :  { %s8955_s9 = smov [#allocation20]   ;;  %s8956_s15 = smov [#allocation23]  }
  0x8b   :  { %s134_s26 = sshll.u32 %s8955_s9, 4  ;;  %s153_s27 = sshll.u32 %s8956_s15, 4  ;;  %s135_s26 = int_to_ptr.vmem [resolvable:$true] %s134_s26  ;;  %s154_s27 = int_to_ptr.vmem [resolvable:$true] %s153_s27 }
  0x8c   :  { %s8762_s29 = scalar_lea.vmem %s135_s26, 128  ;;  %p8767_p0 = scmp.lt.s32.totalorder %s135_s26, %s135_s26 }
  0x8d   :  { %p8763_p13 = scmp.ne.s32.totalorder %s135_s26, %s8762_s29  ;;  %p8768_p1 = scmp.lt.s32.totalorder %s8762_s29, %s8762_s29 }
  0x8f   :  { %p8769_p2 = por %p8768_p1, %p8767_p0 }
  0x91   :  { %p8770_p3 = pnand %p8769_p2, %p8763_p13 }
  0x93   :  { %8773 = shalt.err (!%p8770_p3)
}
  0x94   :  { %137 = dma.hbm_to_vmem [thread:$0]  %s10184_s10, 128, %s135_s26, [#allocation19]  }
  0x95   :  { %s8782_s2 = scalar_lea.vmem %s154_s27, 1024  ;;  %p8787_p5 = scmp.lt.s32.totalorder %s154_s27, %s154_s27 }
  0x96   :  { %p8783_p4 = scmp.ne.s32.totalorder %s154_s27, %s8782_s2  ;;  %p8788_p6 = scmp.lt.s32.totalorder %s8782_s2, %s8782_s2 }
  0x98   :  { %p8789_p7 = por %p8788_p6, %p8787_p5 }
  0x9a   :  { %p8790_p8 = pnand %p8789_p7, %p8783_p4 }
  0x9c   :  { %8793 = shalt.err (!%p8790_p8)
}
  0x9d   :  { %159 = dma.hbm_to_vmem [thread:$0]  %s10186_s12, 1024, %s154_s27, [#allocation22], %s8945_s28, %s8945_s28, %s8946_s23  }
  0x9e   :  { %s8957_s25 = smov [#allocation26]   ;;  %s8958_s5 = smov [#allocation29]  }
  0x9f   :  { %s175_s1 = sshll.u32 %s8957_s25, 4  ;;  %s200_s10 = sshll.u32 %s8958_s5, 4  ;;  %s176_s1 = int_to_ptr.vmem [resolvable:$true] %s175_s1  ;;  %s201_s10 = int_to_ptr.vmem [resolvable:$true] %s200_s10 }
  0xa0   :  { %s8802_s3 = scalar_lea.vmem %s176_s1, 1024  ;;  %p8807_p10 = scmp.lt.s32.totalorder %s176_s1, %s176_s1 }
  0xa1   :  { %p8803_p9 = scmp.ne.s32.totalorder %s176_s1, %s8802_s3  ;;  %p8808_p11 = scmp.lt.s32.totalorder %s8802_s3, %s8802_s3 }
  0xa3   :  { %p8809_p12 = por %p8808_p11, %p8807_p10 }
  0xa5   :  { %p8810_p13 = pnand %p8809_p12, %p8803_p9 }
  0xa7   :  { %8813 = shalt.err (!%p8810_p13)
}
  0xa8   :  { %181 = dma.hbm_to_vmem [thread:$0]  %s10188_s14, 1024, %s176_s1, [#allocation25], %s8945_s28, %s8945_s28, %s8946_s23  }
  0xa9   :  { %s8822_s12 = scalar_lea.vmem %s201_s10, 16  ;;  %s8826_s30 = scalar_lea.vmem %s201_s10, 32 }
  0xaa   :  { %p8823_p0 = scmp.ne.s32.totalorder %s201_s10, %s8822_s12  ;;  %p8827_p1 = scmp.lt.s32.totalorder %s201_s10, %s201_s10 }
  0xab   :  { %p8828_p2 = scmp.lt.s32.totalorder %s8826_s30, %s8822_s12 }
  0xad   :  { %p8829_p3 = por %p8828_p2, %p8827_p1 }
  0xaf   :  { %p8830_p4 = pnand %p8829_p3, %p8823_p0 }
  0xb1   :  { %8833 = shalt.err (!%p8830_p4)
}
  0xb2   :  { %203 = dma.hbm_to_vmem [thread:$0]  %s10191_s17, 16, %s201_s10, [#allocation28]  }
  0xb3   :  { %8914 = dma.done.wait [#allocation7], 32  }
  0xb4   :  { %8915 = vsyncadd [#allocation7], 4294967264 }
  0xb5   :  { %8916 = dma.done.wait [#allocation10], 4608  }
  0xb6   :  { %8917 = vsyncadd [#allocation10], 4294962688 }
  0xb7   :  { %8918 = dma.done.wait [#allocation13], 96  }
  0xb8   :  { %8919 = vsyncadd [#allocation13], 4294967200 }
  0xb9   :  { %8920 = dma.done.wait [#allocation16], 272  }
  0xba   :  { %8921 = vsyncadd [#allocation16], 4294967024 }
  0xbb   :  { %8922 = dma.done.wait [#allocation19], 256  }
  0xbc   :  { %8923 = vsyncadd [#allocation19], 4294967040 }
  0xbd   :  { %8924 = dma.done.wait [#allocation22], 1040  }
  0xbe   :  { %8925 = vsyncadd [#allocation22], 4294966256 }
  0xbf   :  { %8926 = dma.done.wait [#allocation25], 1040  }
  0xc0   :  { %8927 = vsyncadd [#allocation25], 4294966256 }
  0xc1   :  { %8928 = dma.done.wait [#allocation28], 32  }
  0xc2   :  { %8929 = vsyncadd [#allocation28], 4294967264  ;;  %s8959_s14 = smov [#allocation2]   ;;  %s8960_s23 = smov [#allocation3]  }
  0xc3   :  { %s257_s28 = sshll.u32 %s8959_s14, 4  ;;  %s269_s17 = sshll.u32 %s8960_s23, 4  ;;  %s258_s28 = int_to_ptr.vmem [resolvable:$true] %s257_s28  ;;  %s270_s17 = int_to_ptr.vmem [resolvable:$true] %s269_s17 }
  0xc4   :  { %s8842_s9 = scalar_lea.vmem %s258_s28, 4608  ;;  %p8847_p6 = scmp.lt.s32.totalorder %s258_s28, %s258_s28 }
  0xc5   :  { %p8843_p5 = scmp.ne.s32.totalorder %s258_s28, %s8842_s9  ;;  %p8848_p7 = scmp.lt.s32.totalorder %s8842_s9, %s8842_s9 }
  0xc7   :  { %p8849_p8 = por %p8848_p7, %p8847_p6 }
  0xc9   :  { %p8850_p9 = pnand %p8849_p8, %p8843_p5 }
  0xcb   :  { %8853 = shalt.err (!%p8850_p9)  }
  0xcc   :  { %260 = dma.hbm_to_vmem [thread:$0]  %s10192_s18, 4608, %s258_s28, [#allocation5] }
  0xcd   :  { %s8862_s27 = scalar_lea.vmem %s270_s17, 65536  ;;  %p8867_p11 = scmp.lt.s32.totalorder %s270_s17, %s270_s17 }
  0xce   :  { %p8863_p10 = scmp.ne.s32.totalorder %s270_s17, %s8862_s27  ;;  %p8868_p12 = scmp.lt.s32.totalorder %s8862_s27, %s8862_s27 }
  0xd0   :  { %p8869_p13 = por %p8868_p12, %p8867_p11 }
  0xd2   :  { %p8870_p0 = pnand %p8869_p13, %p8863_p10 }
  0xd4   :  { %8873 = shalt.err (!%p8870_p0)  }
  0xd5   :  { %272 = dma.hbm_to_vmem [thread:$0]  %s10193_s19, 65536, %s270_s17, [#allocation5 + $0x1]  ;;  %v307_v0 = vld [vmem:[%s10194_s20] sm:$0xff]  ;;  %v309_v1 = vld [vmem:[%s10194_s20 + $0x8] sm:$0xff]  ;;  %v311_v2 = vld [vmem:[%s10194_s20 + $0x10] sm:$0xff] }
  0xd6   :  { %308 = vst [vmem:[#allocation4] sm:$0xff] %v307_v0  ;;  %310 = vst [vmem:[#allocation4 + $0x8] sm:$0xff] %v309_v1  ;;  %v313_v3 = vld [vmem:[%s10194_s20 + $0x18] sm:$0xff]  ;;  %v315_v4 = vld [vmem:[%s10194_s20 + $0x20] sm:$0xff] }
  0xd7   :  { %312 = vst [vmem:[#allocation4 + $0x10] sm:$0xff] %v311_v2  ;;  %v317_v5 = vld [vmem:[%s10194_s20 + $0x28] sm:$0xff]  ;;  %314 = vst [vmem:[#allocation4 + $0x18] sm:$0xff] %v313_v3  ;;  %v319_v6 = vld [vmem:[%s10194_s20 + $0x30] sm:$0xff] }
  0xd8   :  { %316 = vst [vmem:[#allocation4 + $0x20] sm:$0xff] %v315_v4  ;;  %318 = vst [vmem:[#allocation4 + $0x28] sm:$0xff] %v317_v5  ;;  %v321_v7 = vld [vmem:[%s10194_s20 + $0x38] sm:$0xff]  ;;  %v323_v8 = vld [vmem:[%s10194_s20 + $0x40] sm:$0xff] }
  0xd9   :  { %320 = vst [vmem:[#allocation4 + $0x30] sm:$0xff] %v319_v6  ;;  %322 = vst [vmem:[#allocation4 + $0x38] sm:$0xff] %v321_v7  ;;  %v325_v9 = vld [vmem:[%s10194_s20 + $0x48] sm:$0xff]  ;;  %v327_v10 = vld [vmem:[%s10194_s20 + $0x50] sm:$0xff] }
  0xda   :  { %324 = vst [vmem:[#allocation4 + $0x40] sm:$0xff] %v323_v8  ;;  %v329_v11 = vld [vmem:[%s10194_s20 + $0x58] sm:$0xff]  ;;  %326 = vst [vmem:[#allocation4 + $0x48] sm:$0xff] %v325_v9  ;;  %v331_v12 = vld [vmem:[%s10194_s20 + $0x60] sm:$0xff] }
  0xdb   :  { %328 = vst [vmem:[#allocation4 + $0x50] sm:$0xff] %v327_v10  ;;  %330 = vst [vmem:[#allocation4 + $0x58] sm:$0xff] %v329_v11  ;;  %v333_v13 = vld [vmem:[%s10194_s20 + $0x68] sm:$0xff]  ;;  %v335_v14 = vld [vmem:[%s10194_s20 + $0x70] sm:$0xff] }
  0xdc   :  { %332 = vst [vmem:[#allocation4 + $0x60] sm:$0xff] %v331_v12  ;;  %334 = vst [vmem:[#allocation4 + $0x68] sm:$0xff] %v333_v13  ;;  %v337_v15 = vld [vmem:[%s10194_s20 + $0x78] sm:$0xff]  ;;  %v339_v16 = vld [vmem:[%s10194_s20 + $0x80] sm:$0xff] }
  0xdd   :  { %336 = vst [vmem:[#allocation4 + $0x70] sm:$0xff] %v335_v14  ;;  %v341_v17 = vld [vmem:[%s10194_s20 + $0x88] sm:$0xff]  ;;  %338 = vst [vmem:[#allocation4 + $0x78] sm:$0xff] %v337_v15  ;;  %v343_v18 = vld [vmem:[%s10194_s20 + $0x90] sm:$0xff] }
  0xde   :  { %340 = vst [vmem:[#allocation4 + $0x80] sm:$0xff] %v339_v16  ;;  %342 = vst [vmem:[#allocation4 + $0x88] sm:$0xff] %v341_v17  ;;  %v345_v19 = vld [vmem:[%s10194_s20 + $0x98] sm:$0xff]  ;;  %v347_v20 = vld [vmem:[%s10194_s20 + $0xa0] sm:$0xff] }
  0xdf   :  { %344 = vst [vmem:[#allocation4 + $0x90] sm:$0xff] %v343_v18  ;;  %346 = vst [vmem:[#allocation4 + $0x98] sm:$0xff] %v345_v19  ;;  %v349_v21 = vld [vmem:[%s10194_s20 + $0xa8] sm:$0xff]  ;;  %v351_v22 = vld [vmem:[%s10194_s20 + $0xb0] sm:$0xff] }
  0xe0   :  { %348 = vst [vmem:[#allocation4 + $0xa0] sm:$0xff] %v347_v20  ;;  %v353_v23 = vld [vmem:[%s10194_s20 + $0xb8] sm:$0xff]  ;;  %350 = vst [vmem:[#allocation4 + $0xa8] sm:$0xff] %v349_v21  ;;  %v355_v24 = vld [vmem:[%s10194_s20 + $0xc0] sm:$0xff] }
  0xe1   :  { %352 = vst [vmem:[#allocation4 + $0xb0] sm:$0xff] %v351_v22  ;;  %354 = vst [vmem:[#allocation4 + $0xb8] sm:$0xff] %v353_v23  ;;  %v357_v25 = vld [vmem:[%s10194_s20 + $0xc8] sm:$0xff]  ;;  %v359_v26 = vld [vmem:[%s10194_s20 + $0xd0] sm:$0xff] }
  0xe2   :  { %356 = vst [vmem:[#allocation4 + $0xc0] sm:$0xff] %v355_v24  ;;  %358 = vst [vmem:[#allocation4 + $0xc8] sm:$0xff] %v357_v25  ;;  %v361_v27 = vld [vmem:[%s10194_s20 + $0xd8] sm:$0xff]  ;;  %v363_v28 = vld [vmem:[%s10194_s20 + $0xe0] sm:$0xff] }
  0xe3   :  { %360 = vst [vmem:[#allocation4 + $0xd0] sm:$0xff] %v359_v26  ;;  %v365_v29 = vld [vmem:[%s10194_s20 + $0xe8] sm:$0xff]  ;;  %362 = vst [vmem:[#allocation4 + $0xd8] sm:$0xff] %v361_v27  ;;  %v367_v30 = vld [vmem:[%s10194_s20 + $0xf0] sm:$0xff] }
  0xe4   :  { %364 = vst [vmem:[#allocation4 + $0xe0] sm:$0xff] %v363_v28  ;;  %366 = vst [vmem:[#allocation4 + $0xe8] sm:$0xff] %v365_v29  ;;  %v369_v31 = vld [vmem:[%s10194_s20 + $0xf8] sm:$0xff]  ;;  %v371_v32 = vld [vmem:[%s10194_s20 + $0x100] sm:$0xff] }
  0xe5   :  { %368 = vst [vmem:[#allocation4 + $0xf0] sm:$0xff] %v367_v30  ;;  %370 = vst [vmem:[#allocation4 + $0xf8] sm:$0xff] %v369_v31  ;;  %v373_v33 = vld [vmem:[%s10194_s20 + $0x108] sm:$0xff]  ;;  %v375_v34 = vld [vmem:[%s10194_s20 + $0x110] sm:$0xff] }
  0xe6   :  { %372 = vst [vmem:[#allocation4 + $0x100] sm:$0xff] %v371_v32  ;;  %v377_v35 = vld [vmem:[%s10194_s20 + $0x118] sm:$0xff]  ;;  %374 = vst [vmem:[#allocation4 + $0x108] sm:$0xff] %v373_v33  ;;  %v379_v36 = vld [vmem:[%s10194_s20 + $0x120] sm:$0xff] }
  0xe7   :  { %376 = vst [vmem:[#allocation4 + $0x110] sm:$0xff] %v375_v34  ;;  %378 = vst [vmem:[#allocation4 + $0x118] sm:$0xff] %v377_v35  ;;  %v381_v37 = vld [vmem:[%s10194_s20 + $0x128] sm:$0xff]  ;;  %v383_v38 = vld [vmem:[%s10194_s20 + $0x130] sm:$0xff] }
  0xe8   :  { %380 = vst [vmem:[#allocation4 + $0x120] sm:$0xff] %v379_v36  ;;  %382 = vst [vmem:[#allocation4 + $0x128] sm:$0xff] %v381_v37  ;;  %v385_v39 = vld [vmem:[%s10194_s20 + $0x138] sm:$0xff]  ;;  %v387_v40 = vld [vmem:[%s10194_s20 + $0x140] sm:$0xff] }
  0xe9   :  { %384 = vst [vmem:[#allocation4 + $0x130] sm:$0xff] %v383_v38  ;;  %v389_v41 = vld [vmem:[%s10194_s20 + $0x148] sm:$0xff]  ;;  %386 = vst [vmem:[#allocation4 + $0x138] sm:$0xff] %v385_v39  ;;  %v391_v42 = vld [vmem:[%s10194_s20 + $0x150] sm:$0xff] }
  0xea   :  { %388 = vst [vmem:[#allocation4 + $0x140] sm:$0xff] %v387_v40  ;;  %390 = vst [vmem:[#allocation4 + $0x148] sm:$0xff] %v389_v41  ;;  %v393_v43 = vld [vmem:[%s10194_s20 + $0x158] sm:$0xff]  ;;  %v395_v44 = vld [vmem:[%s10194_s20 + $0x160] sm:$0xff] }
  0xeb   :  { %392 = vst [vmem:[#allocation4 + $0x150] sm:$0xff] %v391_v42  ;;  %394 = vst [vmem:[#allocation4 + $0x158] sm:$0xff] %v393_v43  ;;  %v397_v45 = vld [vmem:[%s10194_s20 + $0x168] sm:$0xff]  ;;  %v399_v46 = vld [vmem:[%s10194_s20 + $0x170] sm:$0xff] }
  0xec   :  { %396 = vst [vmem:[#allocation4 + $0x160] sm:$0xff] %v395_v44  ;;  %v401_v47 = vld [vmem:[%s10194_s20 + $0x178] sm:$0xff]  ;;  %398 = vst [vmem:[#allocation4 + $0x168] sm:$0xff] %v397_v45  ;;  %v403_v48 = vld [vmem:[%s10194_s20 + $0x180] sm:$0xff] }
  0xed   :  { %400 = vst [vmem:[#allocation4 + $0x170] sm:$0xff] %v399_v46  ;;  %402 = vst [vmem:[#allocation4 + $0x178] sm:$0xff] %v401_v47  ;;  %v405_v49 = vld [vmem:[%s10194_s20 + $0x188] sm:$0xff]  ;;  %v407_v50 = vld [vmem:[%s10194_s20 + $0x190] sm:$0xff] }
  0xee   :  { %404 = vst [vmem:[#allocation4 + $0x180] sm:$0xff] %v403_v48  ;;  %406 = vst [vmem:[#allocation4 + $0x188] sm:$0xff] %v405_v49  ;;  %v409_v51 = vld [vmem:[%s10194_s20 + $0x198] sm:$0xff]  ;;  %v411_v52 = vld [vmem:[%s10194_s20 + $0x1a0] sm:$0xff] }
  0xef   :  { %408 = vst [vmem:[#allocation4 + $0x190] sm:$0xff] %v407_v50  ;;  %v413_v53 = vld [vmem:[%s10194_s20 + $0x1a8] sm:$0xff]  ;;  %410 = vst [vmem:[#allocation4 + $0x198] sm:$0xff] %v409_v51  ;;  %v415_v54 = vld [vmem:[%s10194_s20 + $0x1b0] sm:$0xff] }
  0xf0   :  { %412 = vst [vmem:[#allocation4 + $0x1a0] sm:$0xff] %v411_v52  ;;  %414 = vst [vmem:[#allocation4 + $0x1a8] sm:$0xff] %v413_v53  ;;  %v417_v55 = vld [vmem:[%s10194_s20 + $0x1b8] sm:$0xff]  ;;  %v419_v56 = vld [vmem:[%s10194_s20 + $0x1c0] sm:$0xff] }
  0xf1   :  { %416 = vst [vmem:[#allocation4 + $0x1b0] sm:$0xff] %v415_v54  ;;  %418 = vst [vmem:[#allocation4 + $0x1b8] sm:$0xff] %v417_v55  ;;  %v421_v57 = vld [vmem:[%s10194_s20 + $0x1c8] sm:$0xff]  ;;  %v423_v58 = vld [vmem:[%s10194_s20 + $0x1d0] sm:$0xff] }
  0xf2   :  { %420 = vst [vmem:[#allocation4 + $0x1c0] sm:$0xff] %v419_v56  ;;  %v425_v59 = vld [vmem:[%s10194_s20 + $0x1d8] sm:$0xff]  ;;  %422 = vst [vmem:[#allocation4 + $0x1c8] sm:$0xff] %v421_v57  ;;  %v427_v60 = vld [vmem:[%s10194_s20 + $0x1e0] sm:$0xff] }
  0xf3   :  { %424 = vst [vmem:[#allocation4 + $0x1d0] sm:$0xff] %v423_v58  ;;  %426 = vst [vmem:[#allocation4 + $0x1d8] sm:$0xff] %v425_v59  ;;  %v429_v61 = vld [vmem:[%s10194_s20 + $0x1e8] sm:$0xff]  ;;  %v431_v62 = vld [vmem:[%s10194_s20 + $0x1f0] sm:$0xff] }
  0xf4   :  { %428 = vst [vmem:[#allocation4 + $0x1e0] sm:$0xff] %v427_v60  ;;  %430 = vst [vmem:[#allocation4 + $0x1e8] sm:$0xff] %v429_v61  ;;  %v433_v63 = vld [vmem:[%s10194_s20 + $0x1f8] sm:$0xff] }
  0xf5   :  { %432 = vst [vmem:[#allocation4 + $0x1f0] sm:$0xff] %v431_v62  ;;  %434 = vst [vmem:[#allocation4 + $0x1f8] sm:$0xff] %v433_v63 }
  0xf6   :  { %442 = vsyncadd [#allocation5 + $0x2], 8192  ;;  %v8306_v0 = vld [vmem:[#allocation9 + $0x4c] ss:$12 sps:$4 sm:$0xff]   ;;  %v8308_v1 = vld [vmem:[#allocation9 + $0x48] ss:$12 sps:$4 sm:$0xff]   ;;  %v507_v53 = vlaneseq }
  0xf7   :  { %v10199_v2 = vmov 0   ;;  %v8309_v3 = vld [vmem:[#allocation9 + $0x34] ss:$12 sps:$4 sm:$0xff]   ;;  %607 = vmatprep.subr.bf16.mxu0 %v8306_v0  ;;  %v8311_v4 = vld [vmem:[#allocation9 + $0x30] ss:$12 sps:$4 sm:$0xff]   ;;  %s10221_s20 = sld [smem:[#allocation64_spill]] }
  0xf8   :  { %631 = vmatprep.mubr.bf16.mxu0 %v10199_v2  ;;  %8304 = vset.pattern.permute.xlu0 %v10199_v2  ;;  %v8312_v5 = vld [vmem:[#allocation9 + $0x1c] ss:$12 sps:$4 sm:$0xff]   ;;  %v8314_v9 = vld [vmem:[#allocation9 + $0x18] ss:$12 sps:$4 sm:$0xff]   ;;  %vm586_vm0 = vcmask 523264   ;;  %v10201_v32 = vmov 0.0  }
  0xf9   :  { %8305 = vset.pattern.permute.xlu1 %v10199_v2  ;;  %608 = vmatpush1.bf16.msra.mxu0 %v8308_v1  ;;  %v8315_v10 = vld [vmem:[#allocation9 + $0x4] ss:$12 sps:$4 sm:$0xff]   ;;  %v8317_v11 = vld [vmem:[#allocation9] ss:$12 sps:$4 sm:$0xff]   ;;  %v9354_v15 = vld [vmem:[#allocation11 + $0xa8] ss:$12 sps:$4 sm:$0xff]  }
  0xfa   :  { %609 = vmatprep.subr.bf16.mxu0 %v8309_v3  ;;  %v8329_v12 = vld [vmem:[#allocation9 + $0x50] ss:$12 sps:$4 sm:$0xff]   ;;  %v9352_v13 = vld [vmem:[#allocation11 + $0xac] ss:$12 sps:$4 sm:$0xff]   ;;  %v9357_v16 = vld [vmem:[#allocation11 + $0x94] ss:$12 sps:$4 sm:$0xff]  }
  0xfb   :  { %8035 = vmatprep.subr.bf16.mxu1 %v8329_v12  ;;  %v8333_v14 = vld [vmem:[#allocation9 + $0x38] ss:$12 sps:$4 sm:$0xff]   ;;  %v9359_v17 = vld [vmem:[#allocation11 + $0x90] ss:$12 sps:$4 sm:$0xff]   ;;  %v8337_v18 = vld [vmem:[#allocation9 + $0x20] ss:$12 sps:$4 sm:$0xff]  }
  0xfc   :  { %8036 = vmatpush3.bf16.msra.mxu1 %v8329_v12  ;;  %v9371_v21 = vld [vmem:[#allocation11 + $0x7c] ss:$12 sps:$4 sm:$0xff]   ;;  %v9373_v24 = vld [vmem:[#allocation11 + $0x78] ss:$12 sps:$4 sm:$0xff]   ;;  %v9389_v29 = vld [vmem:[#allocation11 + $0x60] ss:$12 sps:$4 sm:$0xff]  }
  0xfd   :  { %v443_v6 = vld [vmem:[%s10221_s20] sm:$0xff]  ;;  %v444_v7 = vld [vmem:[%s10221_s20 + $0x8] sm:$0xff]  ;;  %610 = vmatpush1.bf16.msra.mxu0 %v8311_v4  ;;  %8037 = vmatprep.subr.bf16.mxu1 %v8333_v14  ;;  %v445_v19 = vld [vmem:[%s10221_s20 + $0x10] sm:$0xff]  ;;  %s10222_s5 = sld [smem:[#allocation65_spill]]  ;;  %vm8963_vm2 = vmmov 0   ;;  %v9511_v54 = vshrl.u32 %v507_v53, 7 }
  0xfe   :  { %v501_v8 = vpack.c.bf16 %v444_v7, %v443_v6  ;;  %611 = vmatprep.subr.bf16.mxu0 %v8312_v5  ;;  %v446_v20 = vld [vmem:[%s10221_s20 + $0x18] sm:$0xff]  ;;  %v9376_v25 = vld [vmem:[#allocation11 + $0x64] ss:$12 sps:$4 sm:$0xff]   ;;  %v9423_v40 = vld [vmem:[#allocation11 + $0x80] ss:$12 sps:$4 sm:$0xff]   ;;  %s8964_s30 = smov 48  }
  0xff   :  { %v8341_v22 = vld [vmem:[#allocation9 + $0x8] ss:$12 sps:$4 sm:$0xff]   ;;  %v502_v23 = vpack.c.bf16 %v446_v20, %v445_v19  ;;  %v447_v26 = vld [vmem:[%s10221_s20 + $0x20] sm:$0xff]  ;;  %v9393_v31 = vld [vmem:[#allocation11 + $0x4c] ss:$12 sps:$4 sm:$0xff]   ;;  %10223 = vst [vmem:[#allocation53_spill] sm:$0xff] %v9511_v54 }
 0x100   :  { %8043 = vmatprep.mubr.msk.bf16.mxu1 %vm586_vm0, %v501_v8  ;;  %8038 = vmatpush3.bf16.msra.mxu1 %v8333_v14  ;;  %v448_v27 = vld [vmem:[%s10221_s20 + $0x28] sm:$0xff]  ;;  %v9386_v28 = vld [vmem:[#allocation11 + $0xb0] ss:$12 sps:$4 sm:$0xff]   ;;  %v9412_v36 = vld [vmem:[#allocation11 + $0x34] ss:$12 sps:$4 sm:$0xff]   ;;  %v9514_v55 = vsub.s32 0, %v9511_v54 }
 0x101   :  { %612 = vmatpush1.bf16.msra.mxu0 %v8314_v9  ;;  %8039 = vmatprep.subr.bf16.mxu1 %v8337_v18  ;;  %v503_v30 = vpack.c.bf16 %v448_v27, %v447_v26  ;;  %v9398_v33 = vld [vmem:[#allocation11 + $0x98] ss:$12 sps:$4 sm:$0xff]   ;;  %v9407_v35 = vld [vmem:[#allocation11 + $0x48] ss:$12 sps:$4 sm:$0xff]   ;;  %v9426_v41 = vld [vmem:[#allocation11 + $0x30] ss:$12 sps:$4 sm:$0xff]  }
 0x102   :  { %613 = vmatprep.subr.bf16.mxu0 %v8315_v10  ;;  %v449_v37 = vld [vmem:[%s10221_s20 + $0x30] sm:$0xff]  ;;  %v450_v38 = vld [vmem:[%s10221_s20 + $0x38] sm:$0xff]  ;;  %10224 = vst [vmem:[#allocation54_spill] sm:$0xff] %v9514_v55  ;;  %v505_v56 = vld [vmem:[#allocation12] sm:$0x7]  ;;  %v9517_v58 = vsub.s32 1, %v9511_v54 }
 0x103   :  { %v9404_v34 = vld [vmem:[%s10222_s5] sm:$0xff]  ;;  %v504_v42 = vpack.c.bf16 %v450_v38, %v449_v37  ;;  %v9435_v44 = vld [vmem:[#allocation11 + $0x68] ss:$12 sps:$4 sm:$0xff]   ;;  %v510_v60 = vrot.slane %v505_v56, %v9514_v55  ;;  %v9521_v62 = vsub.s32 2, %v9511_v54  ;;  %vm1770_vm10 = vcmask 130048  }
 0x104   :  { %8040 = vmatpush3.bf16.msra.mxu1 %v8337_v18  ;;  %vm983_vm1 = vcmp.eq.s32.totalorder %v9404_v34, 0  ;;  %v9430_v43 = vld [vmem:[#allocation11 + $0x1c] ss:$12 sps:$4 sm:$0xff]   ;;  %v9440_v45 = vld [vmem:[#allocation11 + $0x18] ss:$12 sps:$4 sm:$0xff]   ;;  %vm1093_vm3 = vcmp.eq.s32.totalorder %v9404_v34, 1  ;;  %v514_v63 = vrot.slane %v505_v56, %v9517_v58 }
 0x105   :  { %614 = vmatpush1.bf16.msra.mxu0 %v8317_v11  ;;  %8041 = vmatprep.subr.bf16.mxu1 %v8341_v22  ;;  %v984_v39 = vsel %vm983_vm1, 1, %v10199_v2  ;;  %v9444_v46 = vld [vmem:[#allocation11 + $0x4] ss:$12 sps:$4 sm:$0xff]   ;;  %v9451_v48 = vld [vmem:[#allocation11] ss:$12 sps:$4 sm:$0xff]   ;;  %v1094_v52 = vsel %vm1093_vm3, 1, %v10199_v2  ;;  %v9529_v5 = vrot.slane %v505_v56, %v9521_v62 }
 0x106   :  { %881 = vmatprep.subr.bf16.mxu0 %v9352_v13  ;;  %986 = vperm.xlu0 %8304, %v984_v39   ;;  %v9448_v47 = vld [vmem:[#allocation11 + $0x50] ss:$12 sps:$4 sm:$0xff]   ;;  %v9457_v49 = vld [vmem:[#allocation11 + $0x38] ss:$12 sps:$4 sm:$0xff]   ;;  %v9464_v50 = vld [vmem:[#allocation11 + $0x20] ss:$12 sps:$4 sm:$0xff]  }
 0x107   :  { %v9471_v51 = vld [vmem:[#allocation11 + $0x8] ss:$12 sps:$4 sm:$0xff]   ;;  %10225 = vst [vmem:[#allocation55_spill] sm:$0xff] %v9517_v58  ;;  %vm1203_vm4 = vcmp.eq.s32.totalorder %v9404_v34, 2  ;;  %vm1313_vm5 = vcmp.eq.s32.totalorder %v9404_v34, 3  ;;  %vm1423_vm6 = vcmp.eq.s32.totalorder %v9404_v34, 4 }
 0x108   :  { %7153 = vmatmul.mubr.msk.bf16.vlgmr.msra.gmra.mxu0 %vm586_vm0, %v501_v8  ;;  %8042 = vmatpush3.bf16.msra.mxu1 %v8341_v22  ;;  %vm1533_vm7 = vcmp.eq.s32.totalorder %v9404_v34, 5 }
 0x109   :  { %882 = vmatpush1.bf16.msra.mxu0 %v9354_v15  ;;  %641 = vmatprep.mubr.bf16.mxu0 %v10199_v2 }
 0x10a   :  { %883 = vmatprep.subr.bf16.mxu0 %v9357_v16  ;;  %8051 = vmatprep.subr.bf16.mxu1 %v10201_v32 }
 0x10b   :  { %8044 = vmatmul.mubr.msk.bf16.vlgmr.msra.gmra.mxu1 %vm586_vm0, %v502_v23  ;;  %1096 = vperm.xlu0 %8304, %v1094_v52  }
 0x10c   :  { %8052 = vmatpush3.bf16.msra.mxu1 %v9386_v28  ;;  %8047 = vmatprep.mubr.msk.bf16.mxu1 %vm586_vm0, %v503_v30 }
 0x10d   :  { %884 = vmatpush1.bf16.msra.mxu0 %v9359_v17  ;;  %8053 = vmatprep.subr.bf16.mxu1 %v10201_v32 }
 0x10e   :  { %885 = vmatprep.subr.bf16.mxu0 %v9371_v21 }
 0x110   :  { %7154 = vmatmul.mubr.msk.bf16.gmra.mxu0 %vm586_vm0, %v502_v23  ;;  %8054 = vmatpush3.bf16.msra.mxu1 %v9398_v33 }
 0x111   :  { %886 = vmatpush1.bf16.msra.mxu0 %v9373_v24  ;;  %651 = vmatprep.mubr.bf16.mxu0 %v10199_v2 }
 0x112   :  { %887 = vmatprep.subr.bf16.mxu0 %v9376_v25  ;;  %8055 = vmatprep.subr.bf16.mxu1 %v10201_v32 }
 0x113   :  { %8048 = vmatmul.mubr.msk.bf16.gmra.mxu1 %vm586_vm0, %v504_v42 }
 0x114   :  { %8056 = vmatpush3.bf16.msra.mxu1 %v9423_v40  ;;  %8067 = vmatprep.mubr.msk.bf16.mxu1 %vm8963_vm2, %v10201_v32 }
 0x115   :  { %888 = vmatpush1.bf16.msra.mxu0 %v9389_v29  ;;  %8057 = vmatprep.subr.bf16.mxu1 %v10201_v32 }
 0x116   :  { %889 = vmatprep.subr.bf16.mxu0 %v9393_v31 }
 0x118   :  { %7155 = vmatmul.mubr.msk.bf16.gmra.mxu0 %vm586_vm0, %v503_v30  ;;  %8058 = vmatpush3.bf16.msra.mxu1 %v9435_v44 }
 0x119   :  { %890 = vmatpush1.bf16.msra.mxu0 %v9407_v35  ;;  %661 = vmatprep.mubr.bf16.mxu0 %v10199_v2 }
 0x11a   :  { %891 = vmatprep.subr.bf16.mxu0 %v9412_v36  ;;  %8059 = vmatprep.subr.bf16.mxu1 %v10201_v32 }
 0x11c   :  { %8060 = vmatpush3.bf16.msra.mxu1 %v9448_v47 }
 0x11d   :  { %892 = vmatpush1.bf16.msra.mxu0 %v9426_v41  ;;  %8061 = vmatprep.subr.bf16.mxu1 %v10201_v32 }
 0x11e   :  { %893 = vmatprep.subr.bf16.mxu0 %v9430_v43 }
 0x120   :  { %7156 = vmatmul.mubr.msk.bf16.gmra.mxu0 %vm586_vm0, %v504_v42  ;;  %8062 = vmatpush3.bf16.msra.mxu1 %v9457_v49 }
 0x121   :  { %894 = vmatpush1.bf16.msra.mxu0 %v9440_v45  ;;  %913 = vmatprep.mubr.bf16.mxu0 %v10199_v2 }
 0x122   :  { %895 = vmatprep.subr.bf16.mxu0 %v9444_v46  ;;  %8063 = vmatprep.subr.bf16.mxu1 %v10201_v32 }
 0x124   :  { %8064 = vmatpush3.bf16.msra.mxu1 %v9464_v50 }
 0x125   :  { %896 = vmatpush1.bf16.msra.mxu0 %v9451_v48  ;;  %8065 = vmatprep.subr.bf16.mxu1 %v10201_v32 }
 0x126   :  { %991 = vmatprep.subr.bf16.mxu0 %v9352_v13 }
 0x128   :  { %914 = vmatmul.mubr.bf16.vlgmr.msra.gmra.mxu0 %v10199_v2  ;;  %8066 = vmatpush3.bf16.msra.mxu1 %v9471_v51 }
 0x129   :  { %992 = vmatpush1.bf16.msra.mxu0 %v9354_v15  ;;  %1023 = vmatprep.mubr.bf16.mxu0 %v10199_v2 }
 0x12a   :  { %993 = vmatprep.subr.bf16.mxu0 %v9357_v16  ;;  %8071 = vmatprep.subr.bf16.mxu1 %v10201_v32 }
 0x12b   :  { %8068 = vmatmul.mubr.bf16.vlgmr.msra.gmra.mxu1 %v10199_v2 }
 0x12c   :  { %8072 = vmatpush3.bf16.msra.mxu1 %v9386_v28  ;;  %8087 = vmatprep.mubr.msk.bf16.mxu1 %vm8963_vm2, %v10201_v32 }
 0x12d   :  { %994 = vmatpush1.bf16.msra.mxu0 %v9359_v17  ;;  %8073 = vmatprep.subr.bf16.mxu1 %v10201_v32 }
 0x12e   :  { %995 = vmatprep.subr.bf16.mxu0 %v9371_v21 }
 0x130   :  { %8074 = vmatpush3.bf16.msra.mxu1 %v9398_v33 }
 0x131   :  { %996 = vmatpush1.bf16.msra.mxu0 %v9373_v24  ;;  %8075 = vmatprep.subr.bf16.mxu1 %v10201_v32 }
 0x132   :  { %997 = vmatprep.subr.bf16.mxu0 %v9376_v25 }
 0x134   :  { %8076 = vmatpush3.bf16.msra.mxu1 %v9423_v40 }
 0x135   :  { %998 = vmatpush1.bf16.msra.mxu0 %v9389_v29  ;;  %8077 = vmatprep.subr.bf16.mxu1 %v10201_v32 }
 0x136   :  { %999 = vmatprep.subr.bf16.mxu0 %v9393_v31 }
 0x138   :  { %8078 = vmatpush3.bf16.msra.mxu1 %v9435_v44 }
 0x139   :  { %1000 = vmatpush1.bf16.msra.mxu0 %v9407_v35  ;;  %8079 = vmatprep.subr.bf16.mxu1 %v10201_v32 }
 0x13a   :  { %1001 = vmatprep.subr.bf16.mxu0 %v9412_v36 }
 0x13c   :  { %8080 = vmatpush3.bf16.msra.mxu1 %v9448_v47 }
 0x13d   :  { %1002 = vmatpush1.bf16.msra.mxu0 %v9426_v41  ;;  %8081 = vmatprep.subr.bf16.mxu1 %v10201_v32 }
 0x13e   :  { %1003 = vmatprep.subr.bf16.mxu0 %v9430_v43 }
 0x140   :  { %8082 = vmatpush3.bf16.msra.mxu1 %v9457_v49 }
 0x141   :  { %1004 = vmatpush1.bf16.msra.mxu0 %v9440_v45  ;;  %8083 = vmatprep.subr.bf16.mxu1 %v10201_v32 }
 0x142   :  { %1005 = vmatprep.subr.bf16.mxu0 %v9444_v46 }
 0x144   :  { %8084 = vmatpush3.bf16.msra.mxu1 %v9464_v50 }
 0x145   :  { %1006 = vmatpush1.bf16.msra.mxu0 %v9451_v48  ;;  %8085 = vmatprep.subr.bf16.mxu1 %v10201_v32 }
 0x146   :  { %1101 = vmatprep.subr.bf16.mxu0 %v9352_v13 }
 0x148   :  { %8086 = vmatpush3.bf16.msra.mxu1 %v9471_v51 }
 0x149   :  { %8091 = vmatprep.subr.bf16.mxu1 %v10201_v32 }
 0x1c8   :  { %v633_v57 = vpop.f32.mrf.mxu0 }
 0x1ca   :  { %v635_v59 = vpop.f32.mrf.mxu0 }
 0x1cb   :  { %v8045_v9 = vpop.f32.mrf.mxu1 }
 0x1cc   :  { %v637_v61 = vpop.f32.mrf.mxu0  ;;  %v9536_v11 = vadd.f32 %v8045_v9, %v9529_v5 }
 0x1cd   :  { %v9524_v0 = vadd.f32 %v637_v61, %v510_v60  ;;  %v706_v14 = vpop.f32.mrf.mxu1 }
 0x1ce   :  { %v639_v1 = vpop.f32.mrf.mxu0 }
 0x1cf   :  { %v9526_v3 = vadd.f32 %v639_v1, %v514_v63  ;;  %v8046_v20 = vpop.f32.mrf.mxu1 }
 0x1d0   :  { %v643_v4 = vpop.f32.mrf.mxu0  ;;  %v9543_v23 = vadd.f32 %v8046_v20, %v9529_v5 }
 0x1d1   :  { %v9531_v6 = vadd.f32 %v643_v4, %v510_v60  ;;  %v709_v27 = vpop.f32.mrf.mxu1 }
 0x1d2   :  { %v645_v7 = vpop.f32.mrf.mxu0  ;;  %v9548_v37 = vadd.f32 %v709_v27, %v9529_v5  ;;  %v500_v27 = vld [vmem:[#allocation14] sm:$0x7] }
 0x1d3   :  { %v9533_v8 = vadd.f32 %v645_v7, %v514_v63  ;;  %v8049_v39 = vpop.f32.mrf.mxu1 }
 0x1d4   :  { %v647_v10 = vpop.f32.mrf.mxu0  ;;  %v9553_v52 = vadd.f32 %v8049_v39, %v9529_v5 }
 0x1d5   :  { %v9538_v12 = vadd.f32 %v647_v10, %v510_v60  ;;  %v722_v56 = vpop.f32.mrf.mxu1 }
 0x1d6   :  { %v649_v18 = vpop.f32.mrf.mxu0  ;;  %10226 = vst [vmem:[#allocation56_spill] sm:$0xff] %v9553_v52  ;;  %v9558_v1 = vadd.f32 %v722_v56, %v9529_v5 }
 0x1d7   :  { %v9540_v19 = vadd.f32 %v649_v18, %v514_v63  ;;  %v8050_v7 = vpop.f32.mrf.mxu1 }
 0x1d8   :  { %v653_v22 = vpop.f32.mrf.mxu0  ;;  %v9563_v10 = vadd.f32 %v8050_v7, %v9529_v5 }
 0x1d9   :  { %v9545_v26 = vadd.f32 %v653_v22, %v510_v60  ;;  %v725_v20 = vpop.f32.mrf.mxu1 }
 0x1da   :  { %v655_v30 = vpop.f32.mrf.mxu0  ;;  %10228 = vst [vmem:[#allocation58_spill] sm:$0xff] %v9563_v10  ;;  %v9581_v10 = vrot.slane %v500_v27, %v9517_v58  ;;  %v9585_v58 = vrot.slane %v500_v27, %v9521_v62 }
 0x1db   :  { %v9550_v38 = vadd.f32 %v655_v30, %v514_v63  ;;  %v9568_v30 = vadd.f32 %v725_v20, %v9529_v5 }
 0x1dc   :  { %v657_v42 = vpop.f32.mrf.mxu0 }
 0x1dd   :  { %v9555_v53 = vadd.f32 %v657_v42, %v510_v60  ;;  %10230 = vst [vmem:[#allocation60_spill] sm:$0xff] %v9568_v30 }
 0x1de   :  { %v659_v61 = vpop.f32.mrf.mxu0 }
 0x1df   :  { %v9560_v4 = vadd.f32 %v659_v61, %v514_v63  ;;  %v9575_v61 = vrot.slane %v500_v27, %v9514_v55 }
 0x1e0   :  { %v663_v9 = vpop.f32.mrf.mxu0 }
 0x1e1   :  { %10227 = vst [vmem:[#allocation57_spill] sm:$0xff] %v9560_v4  ;;  %v9565_v18 = vadd.f32 %v663_v9, %v510_v60  ;;  %v634_v9 = vadd.f32 %v633_v57, %v510_v60 }
 0x1e2   :  { %v665_v22 = vpop.f32.mrf.mxu0 }
 0x1e3   :  { %10229 = vst [vmem:[#allocation59_spill] sm:$0xff] %v9565_v18  ;;  %v9570_v39 = vadd.f32 %v665_v22, %v514_v63  ;;  %v636_v18 = vadd.f32 %v635_v59, %v514_v63  ;;  %v707_v59 = vadd.f32 %v706_v14, %v9529_v5  ;;  %v10234_v5 = vmov 0.0  }
 0x1e4   :  { %v667_v42 = vpop.f32.mrf.mxu0  ;;  %v10235_v14 = vmov 0  }
 0x1e5   :  { %10231 = vst [vmem:[#allocation61_spill] sm:$0xff] %v9570_v39  ;;  %v9572_v56 = vadd.f32 %v667_v42, %v510_v60 }
 0x1e6   :  { %v669_v2 = vpop.f32.mrf.mxu0 }
 0x1e7   :  { %10232 = vst [vmem:[#allocation62_spill] sm:$0xff] %v9572_v56  ;;  %v9577_v32 = vadd.f32 %v669_v2, %v514_v63 }
 0x1e8   :  { %v915_v7 = vpop.f32.mrf.mxu0 }
 0x1e9   :  { %10233 = vst [vmem:[#allocation63_spill] sm:$0xff] %v9577_v32  ;;  %v916_v54 = vadd.f32 %v915_v7, %v9575_v61 }
 0x1ea   :  { %v917_v20 = vpop.f32.mrf.mxu0 }
 0x1eb   :  { %v962_v52 = vadd.f32 %v916_v54, %v634_v9  ;;  %v918_v42 = vadd.f32 %v917_v20, %v9581_v10  ;;  %v956_v30 = vpop.f32.mrf.mxu1 }
 0x1ec   :  { %v919_v22 = vpop.f32.mrf.mxu0  ;;  %v957_v9 = vadd.f32 %v956_v30, %v9585_v58  ;;  %v1204_v30 = vsel %vm1203_vm4, 1, %v10235_v14 }
 0x1ed   :  { %v7185_v39 = vmul.f32 -1.442695, %v962_v52  ;;  %v969_v55 = vadd.f32 %v918_v42, %v636_v18  ;;  %v8069_v32 = vpop.f32.mrf.mxu1  ;;  %1206 = vperm.xlu1 %8305, %v1204_v30  }
 0x1ee   :  { %v920_v56 = vpop.f32.mrf.mxu0 }
 0x1ef   :  { %8354 = vpow2.f32 %v7185_v39  ;;  %v7186_v2 = vmul.f32 -1.442695, %v969_v55  ;;  %v959_v4 = vpop.f32.mrf.mxu1 }
 0x1f1   :  { %8356 = vpow2.f32 %v7186_v2  ;;  %v8070_v57 = vpop.f32.mrf.mxu1 }
 0x1fc   :  { %v8355_v60 = vpop.eup %8354 }
 0x1fd   :  { %v966_v7 = vadd.f32 1.0, %v8355_v60 }
 0x1fe   :  { %v8357_v54 = vpop.eup %8356 }
 0x1ff   :  { %8358 = vrcp.f32 %v966_v7  ;;  %v973_v52 = vadd.f32 1.0, %v8357_v54 }
 0x201   :  { %8360 = vrcp.f32 %v973_v52 }
 0x20c   :  { %v8359_v56 = vpop.eup %8358 }
 0x20d   :  { %v976_v63 = vmul.f32 %v8359_v56, %v957_v9 }
 0x20e   :  { %v8361_v32 = vpop.eup %8360 }
 0x20f   :  { %v977_v55 = vadd.f32 %v976_v63, %v707_v59  ;;  %v979_v4 = vsub.f32 1.0, %v8361_v32  ;;  %v981_v20 = vmul.f32 0.0, %v8361_v32 }
 0x211   :  { %8362 = vtanh.f32 %v977_v55 }
 0x21e   :  { %v8363_v18 = vpop.eup %8362 }
 0x21f   :  { %v980_v39 = vmul.f32 %v8363_v18, %v979_v4 }
 0x221   :  { %v9589_v22 = vadd.f32 %v981_v20, %v980_v39 }
 0x223   :  { %v990_v27 = vpack.c.bf16 %v9589_v22, %v9589_v22 }
 0x225   :  { %1024 = vmatmul.mubr.bf16.vlgmr.msra.gmra.mxu0 %v990_v27  ;;  %8088 = vmatmul.mubr.bf16.vlgmr.msra.gmra.mxu1 %v990_v27 }
 0x226   :  { %1102 = vmatpush1.bf16.msra.mxu0 %v9354_v15  ;;  %8092 = vmatpush3.bf16.msra.mxu1 %v9386_v28 }
 0x227   :  { %1103 = vmatprep.subr.bf16.mxu0 %v9357_v16  ;;  %8093 = vmatprep.subr.bf16.mxu1 %v10234_v5 }
 0x228   :  { %1133 = vmatprep.mubr.bf16.mxu0 %v10235_v14  ;;  %8107 = vmatprep.mubr.msk.bf16.mxu1 %vm8963_vm2, %v10234_v5 }
 0x22a   :  { %1104 = vmatpush1.bf16.msra.mxu0 %v9359_v17  ;;  %8094 = vmatpush3.bf16.msra.mxu1 %v9398_v33 }
 0x22b   :  { %1105 = vmatprep.subr.bf16.mxu0 %v9371_v21  ;;  %8095 = vmatprep.subr.bf16.mxu1 %v10234_v5 }
 0x22e   :  { %1106 = vmatpush1.bf16.msra.mxu0 %v9373_v24  ;;  %8096 = vmatpush3.bf16.msra.mxu1 %v9423_v40 }
 0x22f   :  { %1107 = vmatprep.subr.bf16.mxu0 %v9376_v25  ;;  %8097 = vmatprep.subr.bf16.mxu1 %v10234_v5 }
 0x232   :  { %1108 = vmatpush1.bf16.msra.mxu0 %v9389_v29  ;;  %8098 = vmatpush3.bf16.msra.mxu1 %v9435_v44 }
 0x233   :  { %1109 = vmatprep.subr.bf16.mxu0 %v9393_v31  ;;  %8099 = vmatprep.subr.bf16.mxu1 %v10234_v5 }
 0x236   :  { %1110 = vmatpush1.bf16.msra.mxu0 %v9407_v35  ;;  %8100 = vmatpush3.bf16.msra.mxu1 %v9448_v47 }
 0x237   :  { %1111 = vmatprep.subr.bf16.mxu0 %v9412_v36  ;;  %8101 = vmatprep.subr.bf16.mxu1 %v10234_v5 }
 0x23a   :  { %1112 = vmatpush1.bf16.msra.mxu0 %v9426_v41  ;;  %8102 = vmatpush3.bf16.msra.mxu1 %v9457_v49 }
 0x23b   :  { %1113 = vmatprep.subr.bf16.mxu0 %v9430_v43  ;;  %8103 = vmatprep.subr.bf16.mxu1 %v10234_v5 }
 0x23e   :  { %1114 = vmatpush1.bf16.msra.mxu0 %v9440_v45  ;;  %8104 = vmatpush3.bf16.msra.mxu1 %v9464_v50 }
 0x23f   :  { %1115 = vmatprep.subr.bf16.mxu0 %v9444_v46  ;;  %8105 = vmatprep.subr.bf16.mxu1 %v10234_v5 }
 0x242   :  { %1116 = vmatpush1.bf16.msra.mxu0 %v9451_v48  ;;  %8106 = vmatpush3.bf16.msra.mxu1 %v9471_v51 }
 0x243   :  { %1211 = vmatprep.subr.bf16.mxu0 %v9352_v13  ;;  %8111 = vmatprep.subr.bf16.mxu1 %v10234_v5 }
 0x2e5   :  { %v1025_v42 = vpop.f32.mrf.mxu0  ;;  %v1066_v2 = vpop.f32.mrf.mxu1 }
 0x2e6   :  { %v1026_v57 = vadd.f32 %v1025_v42, %v9575_v61  ;;  %v1067_v30 = vadd.f32 %v1066_v2, %v9585_v58 }
 0x2e7   :  { %v1027_v60 = vpop.f32.mrf.mxu0  ;;  %v8089_v7 = vpop.f32.mrf.mxu1 }
 0x2e8   :  { %v1072_v54 = vadd.f32 %v1026_v57, %v9524_v0  ;;  %v1028_v59 = vadd.f32 %v1027_v60, %v9581_v10 }
 0x2e9   :  { %v1029_v52 = vpop.f32.mrf.mxu0  ;;  %v1069_v9 = vpop.f32.mrf.mxu1 }
 0x2ea   :  { %v7187_v56 = vmul.f32 -1.442695, %v1072_v54  ;;  %v1079_v32 = vadd.f32 %v1028_v59, %v9526_v3 }
 0x2eb   :  { %v1030_v63 = vpop.f32.mrf.mxu0  ;;  %v8090_v55 = vpop.f32.mrf.mxu1 }
 0x2ec   :  { %8364 = vpow2.f32 %v7187_v56  ;;  %v7188_v4 = vmul.f32 -1.442695, %v1079_v32 }
 0x2ee   :  { %8366 = vpow2.f32 %v7188_v4 }
 0x2f9   :  { %v8365_v18 = vpop.eup %8364 }
 0x2fa   :  { %v1076_v39 = vadd.f32 1.0, %v8365_v18 }
 0x2fb   :  { %v8367_v20 = vpop.eup %8366 }
 0x2fc   :  { %8368 = vrcp.f32 %v1076_v39  ;;  %v1083_v27 = vadd.f32 1.0, %v8367_v20 }
 0x2fe   :  { %8370 = vrcp.f32 %v1083_v27 }
 0x309   :  { %v8369_v0 = vpop.eup %8368 }
 0x30a   :  { %v1086_v42 = vmul.f32 %v8369_v0, %v1067_v30 }
 0x30b   :  { %v8371_v60 = vpop.eup %8370 }
 0x30c   :  { %v1087_v57 = vadd.f32 %v1086_v42, %v9548_v37  ;;  %v1089_v7 = vsub.f32 1.0, %v8371_v60  ;;  %v1091_v3 = vmul.f32 %v8371_v60, %v9589_v22  ;;  %v1314_v37 = vsel %vm1313_vm5, 1, %v10235_v14 }
 0x30d   :  { %1316 = vperm.xlu1 %8305, %v1314_v37  }
 0x30e   :  { %8372 = vtanh.f32 %v1087_v57 }
 0x31b   :  { %v8373_v54 = vpop.eup %8372 }
 0x31c   :  { %v1090_v52 = vmul.f32 %v8373_v54, %v1089_v7 }
 0x31e   :  { %v9637_v9 = vadd.f32 %v1091_v3, %v1090_v52 }
 0x320   :  { %v1100_v56 = vpack.c.bf16 %v9637_v9, %v9637_v9 }
 0x322   :  { %1134 = vmatmul.mubr.bf16.vlgmr.msra.gmra.mxu0 %v1100_v56  ;;  %8108 = vmatmul.mubr.bf16.vlgmr.msra.gmra.mxu1 %v1100_v56 }
 0x323   :  { %1212 = vmatpush1.bf16.msra.mxu0 %v9354_v15  ;;  %8112 = vmatpush3.bf16.msra.mxu1 %v9386_v28 }
 0x324   :  { %1213 = vmatprep.subr.bf16.mxu0 %v9357_v16  ;;  %8113 = vmatprep.subr.bf16.mxu1 %v10234_v5 }
 0x325   :  { %1243 = vmatprep.mubr.bf16.mxu0 %v10235_v14  ;;  %8127 = vmatprep.mubr.msk.bf16.mxu1 %vm8963_vm2, %v10234_v5 }
 0x327   :  { %1214 = vmatpush1.bf16.msra.mxu0 %v9359_v17  ;;  %8114 = vmatpush3.bf16.msra.mxu1 %v9398_v33 }
 0x328   :  { %1215 = vmatprep.subr.bf16.mxu0 %v9371_v21  ;;  %8115 = vmatprep.subr.bf16.mxu1 %v10234_v5 }
 0x32b   :  { %1216 = vmatpush1.bf16.msra.mxu0 %v9373_v24  ;;  %8116 = vmatpush3.bf16.msra.mxu1 %v9423_v40 }
 0x32c   :  { %1217 = vmatprep.subr.bf16.mxu0 %v9376_v25  ;;  %8117 = vmatprep.subr.bf16.mxu1 %v10234_v5 }
 0x32f   :  { %1218 = vmatpush1.bf16.msra.mxu0 %v9389_v29  ;;  %8118 = vmatpush3.bf16.msra.mxu1 %v9435_v44 }
 0x330   :  { %1219 = vmatprep.subr.bf16.mxu0 %v9393_v31  ;;  %8119 = vmatprep.subr.bf16.mxu1 %v10234_v5 }
 0x333   :  { %1220 = vmatpush1.bf16.msra.mxu0 %v9407_v35  ;;  %8120 = vmatpush3.bf16.msra.mxu1 %v9448_v47 }
 0x334   :  { %1221 = vmatprep.subr.bf16.mxu0 %v9412_v36  ;;  %8121 = vmatprep.subr.bf16.mxu1 %v10234_v5 }
 0x337   :  { %1222 = vmatpush1.bf16.msra.mxu0 %v9426_v41  ;;  %8122 = vmatpush3.bf16.msra.mxu1 %v9457_v49 }
 0x338   :  { %1223 = vmatprep.subr.bf16.mxu0 %v9430_v43  ;;  %8123 = vmatprep.subr.bf16.mxu1 %v10234_v5 }
 0x33b   :  { %1224 = vmatpush1.bf16.msra.mxu0 %v9440_v45  ;;  %8124 = vmatpush3.bf16.msra.mxu1 %v9464_v50 }
 0x33c   :  { %1225 = vmatprep.subr.bf16.mxu0 %v9444_v46  ;;  %8125 = vmatprep.subr.bf16.mxu1 %v10234_v5 }
 0x33f   :  { %1226 = vmatpush1.bf16.msra.mxu0 %v9451_v48  ;;  %8126 = vmatpush3.bf16.msra.mxu1 %v9471_v51 }
 0x340   :  { %1321 = vmatprep.subr.bf16.mxu0 %v9352_v13  ;;  %8131 = vmatprep.subr.bf16.mxu1 %v10234_v5 }
 0x3e2   :  { %v1135_v2 = vpop.f32.mrf.mxu0  ;;  %v1176_v59 = vpop.f32.mrf.mxu1 }
 0x3e3   :  { %v1136_v63 = vadd.f32 %v1135_v2, %v9575_v61  ;;  %v1177_v3 = vadd.f32 %v1176_v59, %v9585_v58 }
 0x3e4   :  { %v1137_v55 = vpop.f32.mrf.mxu0  ;;  %v8109_v32 = vpop.f32.mrf.mxu1 }
 0x3e5   :  { %v1182_v4 = vadd.f32 %v1136_v63, %v9531_v6  ;;  %v1138_v27 = vadd.f32 %v1137_v55, %v9581_v10 }
 0x3e6   :  { %v1139_v18 = vpop.f32.mrf.mxu0  ;;  %v1179_v39 = vpop.f32.mrf.mxu1 }
 0x3e7   :  { %v7189_v20 = vmul.f32 -1.442695, %v1182_v4  ;;  %v1189_v42 = vadd.f32 %v1138_v27, %v9533_v8 }
 0x3e8   :  { %v1140_v30 = vpop.f32.mrf.mxu0  ;;  %v8110_v0 = vpop.f32.mrf.mxu1 }
 0x3e9   :  { %8374 = vpow2.f32 %v7189_v20  ;;  %v7190_v57 = vmul.f32 -1.442695, %v1189_v42 }
 0x3eb   :  { %8376 = vpow2.f32 %v7190_v57 }
 0x3f6   :  { %v8375_v60 = vpop.eup %8374 }
 0x3f7   :  { %v1186_v7 = vadd.f32 1.0, %v8375_v60 }
 0x3f8   :  { %v8377_v54 = vpop.eup %8376 }
 0x3f9   :  { %8378 = vrcp.f32 %v1186_v7  ;;  %v1193_v52 = vadd.f32 1.0, %v8377_v54 }
 0x3fb   :  { %8380 = vrcp.f32 %v1193_v52 }
 0x406   :  { %v8379_v6 = vpop.eup %8378 }
 0x407   :  { %v1196_v56 = vmul.f32 %v8379_v6, %v1177_v3 }
 0x408   :  { %v8381_v2 = vpop.eup %8380 }
 0x409   :  { %v1197_v37 = vadd.f32 %v1196_v56, %v9536_v11  ;;  %v1199_v63 = vsub.f32 1.0, %v8381_v2  ;;  %v1201_v8 = vmul.f32 %v8381_v2, %v9637_v9  ;;  %v1424_v11 = vsel %vm1423_vm6, 1, %v10235_v14 }
 0x40a   :  { %1426 = vperm.xlu0 %8304, %v1424_v11  }
 0x40b   :  { %8382 = vtanh.f32 %v1197_v37 }
 0x418   :  { %v8383_v55 = vpop.eup %8382 }
 0x419   :  { %v1200_v32 = vmul.f32 %v8383_v55, %v1199_v63 }
 0x41b   :  { %v9685_v4 = vadd.f32 %v1201_v8, %v1200_v32 }
 0x41d   :  { %v1210_v18 = vpack.c.bf16 %v9685_v4, %v9685_v4 }
 0x41f   :  { %1244 = vmatmul.mubr.bf16.vlgmr.msra.gmra.mxu0 %v1210_v18  ;;  %8128 = vmatmul.mubr.bf16.vlgmr.msra.gmra.mxu1 %v1210_v18 }
 0x420   :  { %1322 = vmatpush1.bf16.msra.mxu0 %v9354_v15  ;;  %8132 = vmatpush3.bf16.msra.mxu1 %v9386_v28 }
 0x421   :  { %1323 = vmatprep.subr.bf16.mxu0 %v9357_v16  ;;  %8133 = vmatprep.subr.bf16.mxu1 %v10234_v5 }
 0x422   :  { %1353 = vmatprep.mubr.bf16.mxu0 %v10235_v14  ;;  %8147 = vmatprep.mubr.msk.bf16.mxu1 %vm8963_vm2, %v10234_v5 }
 0x424   :  { %1324 = vmatpush1.bf16.msra.mxu0 %v9359_v17  ;;  %8134 = vmatpush3.bf16.msra.mxu1 %v9398_v33 }
 0x425   :  { %1325 = vmatprep.subr.bf16.mxu0 %v9371_v21  ;;  %8135 = vmatprep.subr.bf16.mxu1 %v10234_v5 }
 0x428   :  { %1326 = vmatpush1.bf16.msra.mxu0 %v9373_v24  ;;  %8136 = vmatpush3.bf16.msra.mxu1 %v9423_v40 }
 0x429   :  { %1327 = vmatprep.subr.bf16.mxu0 %v9376_v25  ;;  %8137 = vmatprep.subr.bf16.mxu1 %v10234_v5 }
 0x42c   :  { %1328 = vmatpush1.bf16.msra.mxu0 %v9389_v29  ;;  %8138 = vmatpush3.bf16.msra.mxu1 %v9435_v44 }
 0x42d   :  { %1329 = vmatprep.subr.bf16.mxu0 %v9393_v31  ;;  %8139 = vmatprep.subr.bf16.mxu1 %v10234_v5 }
 0x430   :  { %1330 = vmatpush1.bf16.msra.mxu0 %v9407_v35  ;;  %8140 = vmatpush3.bf16.msra.mxu1 %v9448_v47 }
 0x431   :  { %1331 = vmatprep.subr.bf16.mxu0 %v9412_v36  ;;  %8141 = vmatprep.subr.bf16.mxu1 %v10234_v5 }
 0x434   :  { %1332 = vmatpush1.bf16.msra.mxu0 %v9426_v41  ;;  %8142 = vmatpush3.bf16.msra.mxu1 %v9457_v49 }
 0x435   :  { %1333 = vmatprep.subr.bf16.mxu0 %v9430_v43  ;;  %8143 = vmatprep.subr.bf16.mxu1 %v10234_v5 }
 0x438   :  { %1334 = vmatpush1.bf16.msra.mxu0 %v9440_v45  ;;  %8144 = vmatpush3.bf16.msra.mxu1 %v9464_v50 }
 0x439   :  { %1335 = vmatprep.subr.bf16.mxu0 %v9444_v46  ;;  %8145 = vmatprep.subr.bf16.mxu1 %v10234_v5 }
 0x43c   :  { %1336 = vmatpush1.bf16.msra.mxu0 %v9451_v48  ;;  %8146 = vmatpush3.bf16.msra.mxu1 %v9471_v51 }
 0x43d   :  { %1431 = vmatprep.subr.bf16.mxu0 %v9352_v13  ;;  %8151 = vmatprep.subr.bf16.mxu1 %v10234_v5 }
 0x4df   :  { %v1245_v59 = vpop.f32.mrf.mxu0  ;;  %v1286_v39 = vpop.f32.mrf.mxu1 }
 0x4e0   :  { %v1246_v20 = vadd.f32 %v1245_v59, %v9575_v61  ;;  %v1287_v63 = vadd.f32 %v1286_v39, %v9585_v58 }
 0x4e1   :  { %v1247_v27 = vpop.f32.mrf.mxu0  ;;  %v8129_v30 = vpop.f32.mrf.mxu1 }
 0x4e2   :  { %v1292_v0 = vadd.f32 %v1246_v20, %v9538_v12  ;;  %v1248_v13 = vadd.f32 %v1247_v27, %v9581_v10 }
 0x4e3   :  { %v1249_v42 = vpop.f32.mrf.mxu0  ;;  %v1289_v57 = vpop.f32.mrf.mxu1 }
 0x4e4   :  { %v7191_v60 = vmul.f32 -1.442695, %v1292_v0  ;;  %v1299_v52 = vadd.f32 %v1248_v13, %v9540_v19 }
 0x4e5   :  { %v1250_v7 = vpop.f32.mrf.mxu0  ;;  %v8130_v54 = vpop.f32.mrf.mxu1 }
 0x4e6   :  { %8384 = vpow2.f32 %v7191_v60  ;;  %v7192_v3 = vmul.f32 -1.442695, %v1299_v52 }
 0x4e8   :  { %8386 = vpow2.f32 %v7192_v3 }
 0x4f3   :  { %v8385_v6 = vpop.eup %8384 }
 0x4f4   :  { %v1296_v56 = vadd.f32 1.0, %v8385_v6 }
 0x4f5   :  { %v8387_v37 = vpop.eup %8386 }
 0x4f6   :  { %8388 = vrcp.f32 %v1296_v56  ;;  %v1303_v2 = vadd.f32 1.0, %v8387_v37 }
 0x4f8   :  { %8390 = vrcp.f32 %v1303_v2 }
 0x503   :  { %v8389_v12 = vpop.eup %8388 }
 0x504   :  { %v1306_v55 = vmul.f32 %v8389_v12, %v1287_v63 }
 0x505   :  { %v8391_v8 = vpop.eup %8390 }
 0x506   :  { %v1307_v32 = vadd.f32 %v1306_v55, %v9543_v23  ;;  %v1309_v18 = vsub.f32 1.0, %v8391_v8  ;;  %v1311_v19 = vmul.f32 %v8391_v8, %v9685_v4 }
 0x508   :  { %8392 = vtanh.f32 %v1307_v32 }
 0x515   :  { %v8393_v11 = vpop.eup %8392 }
 0x516   :  { %v1310_v59 = vmul.f32 %v8393_v11, %v1309_v18  ;;  %v9787_v11 = vld [vmem:[#allocation11 + $0xa8] ss:$12 sps:$4 sm:$0xff]  }
 0x518   :  { %v9733_v20 = vadd.f32 %v1311_v19, %v1310_v59  ;;  %v9798_v59 = vld [vmem:[#allocation11 + $0x90] ss:$12 sps:$4 sm:$0xff]  }
 0x519   :  { %v9802_v19 = vld [vmem:[#allocation11 + $0x7c] ss:$12 sps:$4 sm:$0xff]  }
 0x51a   :  { %v1320_v27 = vpack.c.bf16 %v9733_v20, %v9733_v20 }
 0x51c   :  { %1354 = vmatmul.mubr.bf16.vlgmr.msra.gmra.mxu0 %v1320_v27  ;;  %8148 = vmatmul.mubr.bf16.vlgmr.msra.gmra.mxu1 %v1320_v27  ;;  %v9810_v27 = vld [vmem:[#allocation11 + $0x64] ss:$12 sps:$4 sm:$0xff]  }
 0x51d   :  { %1432 = vmatpush1.bf16.msra.mxu0 %v9354_v15  ;;  %8152 = vmatpush3.bf16.msra.mxu1 %v9386_v28  ;;  %v9770_v15 = vld [vmem:[#allocation11 + $0xac] ss:$12 sps:$4 sm:$0xff]  }
 0x51e   :  { %1433 = vmatprep.subr.bf16.mxu0 %v9357_v16  ;;  %8153 = vmatprep.subr.bf16.mxu1 %v10234_v5  ;;  %v1534_v16 = vsel %vm1533_vm7, 1, %v10235_v14 }
 0x51f   :  { %1463 = vmatprep.mubr.bf16.mxu0 %v10235_v14  ;;  %8167 = vmatprep.mubr.msk.bf16.mxu1 %vm8963_vm2, %v10234_v5 }
 0x520   :  { %1536 = vperm.xlu1 %8305, %v1534_v16  }
 0x521   :  { %1434 = vmatpush1.bf16.msra.mxu0 %v9359_v17  ;;  %8154 = vmatpush3.bf16.msra.mxu1 %v9398_v33 }
 0x522   :  { %1435 = vmatprep.subr.bf16.mxu0 %v9371_v21  ;;  %8155 = vmatprep.subr.bf16.mxu1 %v10234_v5 }
 0x525   :  { %1436 = vmatpush1.bf16.msra.mxu0 %v9373_v24  ;;  %8156 = vmatpush3.bf16.msra.mxu1 %v9423_v40 }
 0x526   :  { %1437 = vmatprep.subr.bf16.mxu0 %v9376_v25  ;;  %8157 = vmatprep.subr.bf16.mxu1 %v10234_v5 }
 0x529   :  { %1438 = vmatpush1.bf16.msra.mxu0 %v9389_v29  ;;  %8158 = vmatpush3.bf16.msra.mxu1 %v9435_v44 }
 0x52a   :  { %1439 = vmatprep.subr.bf16.mxu0 %v9393_v31  ;;  %8159 = vmatprep.subr.bf16.mxu1 %v10234_v5 }
 0x52d   :  { %1440 = vmatpush1.bf16.msra.mxu0 %v9407_v35  ;;  %8160 = vmatpush3.bf16.msra.mxu1 %v9448_v47 }
 0x52e   :  { %1441 = vmatprep.subr.bf16.mxu0 %v9412_v36  ;;  %8161 = vmatprep.subr.bf16.mxu1 %v10234_v5 }
 0x531   :  { %1442 = vmatpush1.bf16.msra.mxu0 %v9426_v41  ;;  %8162 = vmatpush3.bf16.msra.mxu1 %v9457_v49 }
 0x532   :  { %1443 = vmatprep.subr.bf16.mxu0 %v9430_v43  ;;  %8163 = vmatprep.subr.bf16.mxu1 %v10234_v5 }
 0x535   :  { %1444 = vmatpush1.bf16.msra.mxu0 %v9440_v45  ;;  %8164 = vmatpush3.bf16.msra.mxu1 %v9464_v50 }
 0x536   :  { %1445 = vmatprep.subr.bf16.mxu0 %v9444_v46  ;;  %8165 = vmatprep.subr.bf16.mxu1 %v10234_v5 }
 0x539   :  { %1446 = vmatpush1.bf16.msra.mxu0 %v9451_v48  ;;  %8166 = vmatpush3.bf16.msra.mxu1 %v9471_v51 }
 0x53a   :  { %1541 = vmatprep.subr.bf16.mxu0 %v9770_v15  ;;  %8171 = vmatprep.subr.bf16.mxu1 %v10234_v5 }
 0x5dc   :  { %v1355_v17 = vpop.f32.mrf.mxu0  ;;  %v1396_v21 = vpop.f32.mrf.mxu1 }
 0x5dd   :  { %v1356_v24 = vadd.f32 %v1355_v17, %v9575_v61  ;;  %v1397_v56 = vadd.f32 %v1396_v21, %v9585_v58 }
 0x5de   :  { %v1357_v25 = vpop.f32.mrf.mxu0  ;;  %v8149_v23 = vpop.f32.mrf.mxu1 }
 0x5df   :  { %v1402_v39 = vadd.f32 %v1356_v24, %v9545_v26  ;;  %v1358_v57 = vadd.f32 %v1357_v25, %v9581_v10 }
 0x5e0   :  { %v1359_v30 = vpop.f32.mrf.mxu0  ;;  %v1399_v0 = vpop.f32.mrf.mxu1 }
 0x5e1   :  { %v7193_v42 = vmul.f32 -1.442695, %v1402_v39  ;;  %v1409_v34 = vadd.f32 %v1358_v57, %v9550_v38  ;;  %v10237_v39 = vld [vmem:[#allocation60_spill] sm:$0xff] }
 0x5e2   :  { %v1360_v60 = vpop.f32.mrf.mxu0  ;;  %v8150_v13 = vpop.f32.mrf.mxu1 }
 0x5e3   :  { %8394 = vpow2.f32 %v7193_v42  ;;  %v7194_v7 = vmul.f32 -1.442695, %v1409_v34 }
 0x5e5   :  { %8396 = vpow2.f32 %v7194_v7 }
 0x5f0   :  { %v8395_v54 = vpop.eup %8394 }
 0x5f1   :  { %v1406_v52 = vadd.f32 1.0, %v8395_v54  ;;  %v8442_v54 = vld [vmem:[#allocation11 + $0xb0] ss:$12 sps:$4 sm:$0xff]  }
 0x5f2   :  { %v8397_v3 = vpop.eup %8396 }
 0x5f3   :  { %8398 = vrcp.f32 %v1406_v52  ;;  %v1413_v6 = vadd.f32 1.0, %v8397_v3  ;;  %v8443_v52 = vld [vmem:[#allocation11 + $0x98] ss:$12 sps:$4 sm:$0xff]   ;;  %v8444_v3 = vld [vmem:[#allocation11 + $0x80] ss:$12 sps:$4 sm:$0xff]  }
 0x5f5   :  { %8400 = vrcp.f32 %v1413_v6  ;;  %v8445_v6 = vld [vmem:[#allocation11 + $0x60] ss:$12 sps:$4 sm:$0xff]  }
 0x600   :  { %v8399_v26 = vpop.eup %8398 }
 0x601   :  { %v1416_v37 = vmul.f32 %v8399_v26, %v1397_v56  ;;  %v8446_v56 = vld [vmem:[#allocation11 + $0x68] ss:$12 sps:$4 sm:$0xff]   ;;  %v8447_v26 = vld [vmem:[#allocation11 + $0x4c] ss:$12 sps:$4 sm:$0xff]  }
 0x602   :  { %v8401_v63 = vpop.eup %8400 }
 0x603   :  { %v1417_v2 = vadd.f32 %v1416_v37, %v9558_v1  ;;  %v1419_v12 = vsub.f32 1.0, %v8401_v63  ;;  %v1421_v38 = vmul.f32 %v8401_v63, %v9733_v20  ;;  %v9791_v1 = vld [vmem:[#allocation11 + $0x94] ss:$12 sps:$4 sm:$0xff]  }
 0x604   :  { %v8448_v37 = vld [vmem:[#allocation11 + $0x48] ss:$12 sps:$4 sm:$0xff]  }
 0x605   :  { %8402 = vtanh.f32 %v1417_v2  ;;  %v8449_v2 = vld [vmem:[#allocation11 + $0x50] ss:$12 sps:$4 sm:$0xff]   ;;  %v8450_v63 = vld [vmem:[#allocation11 + $0x34] ss:$12 sps:$4 sm:$0xff]  }
 0x612   :  { %v8403_v55 = vpop.eup %8402 }
 0x613   :  { %v1420_v32 = vmul.f32 %v8403_v55, %v1419_v12  ;;  %v8451_v12 = vld [vmem:[#allocation11 + $0x30] ss:$12 sps:$4 sm:$0xff]   ;;  %v8452_v55 = vld [vmem:[#allocation11 + $0x38] ss:$12 sps:$4 sm:$0xff]  }
 0x615   :  { %v9783_v8 = vadd.f32 %v1421_v38, %v1420_v32  ;;  %v8453_v32 = vld [vmem:[#allocation11 + $0x1c] ss:$12 sps:$4 sm:$0xff]   ;;  %v8454_v38 = vld [vmem:[#allocation11 + $0x18] ss:$12 sps:$4 sm:$0xff]  }
 0x617   :  { %v1430_v18 = vpack.c.bf16 %v9783_v8, %v9783_v8 }
 0x619   :  { %1464 = vmatmul.mubr.bf16.vlgmr.msra.gmra.mxu0 %v1430_v18  ;;  %8168 = vmatmul.mubr.bf16.vlgmr.msra.gmra.mxu1 %v1430_v18  ;;  %v8455_v18 = vld [vmem:[#allocation11 + $0x20] ss:$12 sps:$4 sm:$0xff]  }
 0x61a   :  { %1542 = vmatpush1.bf16.msra.mxu0 %v9787_v11  ;;  %8172 = vmatpush3.bf16.msra.mxu1 %v9386_v28  ;;  %v9806_v28 = vld [vmem:[#allocation11 + $0x78] ss:$12 sps:$4 sm:$0xff]  }
 0x61b   :  { %1543 = vmatprep.subr.bf16.mxu0 %v9791_v1  ;;  %8173 = vmatprep.subr.bf16.mxu1 %v10234_v5 }
 0x61c   :  { %1573 = vmatprep.mubr.bf16.mxu0 %v10235_v14  ;;  %8187 = vmatprep.mubr.msk.bf16.mxu1 %vm8963_vm2, %v10234_v5 }
 0x61e   :  { %1544 = vmatpush1.bf16.msra.mxu0 %v9798_v59  ;;  %8174 = vmatpush3.bf16.msra.mxu1 %v9398_v33 }
 0x61f   :  { %1545 = vmatprep.subr.bf16.mxu0 %v9802_v19  ;;  %8175 = vmatprep.subr.bf16.mxu1 %v10234_v5 }
 0x622   :  { %1546 = vmatpush1.bf16.msra.mxu0 %v9806_v28  ;;  %8176 = vmatpush3.bf16.msra.mxu1 %v9423_v40 }
 0x623   :  { %1547 = vmatprep.subr.bf16.mxu0 %v9810_v27  ;;  %8177 = vmatprep.subr.bf16.mxu1 %v10234_v5 }
 0x626   :  { %1548 = vmatpush1.bf16.msra.mxu0 %v9389_v29  ;;  %8178 = vmatpush3.bf16.msra.mxu1 %v9435_v44  ;;  %v9837_v29 = vld [vmem:[%s10222_s5] sm:$0xff] }
 0x627   :  { %1549 = vmatprep.subr.bf16.mxu0 %v9393_v31  ;;  %8179 = vmatprep.subr.bf16.mxu1 %v10234_v5  ;;  %vm1643_vm8 = vcmp.eq.s32.totalorder %v9837_v29, 6  ;;  %vm1753_vm9 = vcmp.eq.s32.totalorder %v9837_v29, 7 }
 0x628   :  { %v1644_v31 = vsel %vm1643_vm8, 1, %v10235_v14 }
 0x629   :  { %1646 = vperm.xlu0 %8304, %v1644_v31  }
 0x62a   :  { %1550 = vmatpush1.bf16.msra.mxu0 %v9407_v35  ;;  %8180 = vmatpush3.bf16.msra.mxu1 %v9448_v47 }
 0x62b   :  { %1551 = vmatprep.subr.bf16.mxu0 %v9412_v36  ;;  %8181 = vmatprep.subr.bf16.mxu1 %v10234_v5 }
 0x62e   :  { %1552 = vmatpush1.bf16.msra.mxu0 %v9426_v41  ;;  %8182 = vmatpush3.bf16.msra.mxu1 %v9457_v49 }
 0x62f   :  { %1553 = vmatprep.subr.bf16.mxu0 %v9430_v43  ;;  %8183 = vmatprep.subr.bf16.mxu1 %v10234_v5 }
 0x632   :  { %1554 = vmatpush1.bf16.msra.mxu0 %v9440_v45  ;;  %8184 = vmatpush3.bf16.msra.mxu1 %v9464_v50  ;;  %v10236_v50 = vld [vmem:[#allocation57_spill] sm:$0xff] }
 0x633   :  { %1555 = vmatprep.subr.bf16.mxu0 %v9444_v46  ;;  %8185 = vmatprep.subr.bf16.mxu1 %v10234_v5 }
 0x636   :  { %1556 = vmatpush1.bf16.msra.mxu0 %v9451_v48  ;;  %8186 = vmatpush3.bf16.msra.mxu1 %v9471_v51 }
 0x637   :  { %1651 = vmatprep.subr.bf16.mxu0 %v9770_v15  ;;  %8191 = vmatprep.subr.bf16.mxu1 %v10234_v5 }
 0x6d9   :  { %v1465_v33 = vpop.f32.mrf.mxu0  ;;  %v1506_v35 = vpop.f32.mrf.mxu1 }
 0x6da   :  { %v1466_v36 = vadd.f32 %v1465_v33, %v9575_v61  ;;  %v1507_v25 = vadd.f32 %v1506_v35, %v9585_v58 }
 0x6db   :  { %v1467_v40 = vpop.f32.mrf.mxu0  ;;  %v8169_v41 = vpop.f32.mrf.mxu1 }
 0x6dc   :  { %v1512_v43 = vadd.f32 %v1466_v36, %v9555_v53  ;;  %v1468_v47 = vadd.f32 %v1467_v40, %v9581_v10  ;;  %v10238_v40 = vld [vmem:[#allocation59_spill] sm:$0xff] }
 0x6dd   :  { %v1469_v44 = vpop.f32.mrf.mxu0  ;;  %v1509_v45 = vpop.f32.mrf.mxu1 }
 0x6de   :  { %v7195_v46 = vmul.f32 -1.442695, %v1512_v43  ;;  %v1519_v51 = vadd.f32 %v1468_v47, %v10236_v50 }
 0x6df   :  { %v1470_v48 = vpop.f32.mrf.mxu0  ;;  %v8170_v49 = vpop.f32.mrf.mxu1 }
 0x6e0   :  { %8404 = vpow2.f32 %v7195_v46  ;;  %v7196_v15 = vmul.f32 -1.442695, %v1519_v51  ;;  %v10239_v48 = vld [vmem:[#allocation61_spill] sm:$0xff] }
 0x6e2   :  { %8406 = vpow2.f32 %v7196_v15 }
 0x6ed   :  { %v8405_v16 = vpop.eup %8404 }
 0x6ee   :  { %v1516_v17 = vadd.f32 1.0, %v8405_v16 }
 0x6ef   :  { %v8407_v21 = vpop.eup %8406 }
 0x6f0   :  { %8408 = vrcp.f32 %v1516_v17  ;;  %v1523_v24 = vadd.f32 1.0, %v8407_v21 }
 0x6f2   :  { %8410 = vrcp.f32 %v1523_v24 }
 0x6fd   :  { %v8409_v53 = vpop.eup %8408 }
 0x6fe   :  { %v1526_v23 = vmul.f32 %v8409_v53, %v1507_v25  ;;  %v10240_v53 = vld [vmem:[#allocation56_spill] sm:$0xff] }
 0x6ff   :  { %v8411_v0 = vpop.eup %8410 }
 0x700   :  { %v1527_v30 = vadd.f32 %v1526_v23, %v10237_v39  ;;  %v1529_v42 = vsub.f32 1.0, %v8411_v0  ;;  %v1531_v13 = vmul.f32 %v8411_v0, %v9783_v8 }
 0x702   :  { %8412 = vtanh.f32 %v1527_v30 }
 0x70f   :  { %v8413_v57 = vpop.eup %8412 }
 0x710   :  { %v1530_v60 = vmul.f32 %v8413_v57, %v1529_v42 }
 0x712   :  { %v9848_v34 = vadd.f32 %v1531_v13, %v1530_v60 }
 0x714   :  { %v1540_v7 = vpack.c.bf16 %v9848_v34, %v9848_v34 }
 0x716   :  { %1574 = vmatmul.mubr.bf16.vlgmr.msra.gmra.mxu0 %v1540_v7  ;;  %8188 = vmatmul.mubr.bf16.vlgmr.msra.gmra.mxu1 %v1540_v7  ;;  %v1762_v7 = vld [vmem:[#allocation15 + $0x8] sm:$0xff] }
 0x717   :  { %1652 = vmatpush1.bf16.msra.mxu0 %v9787_v11  ;;  %8192 = vmatpush3.bf16.msra.mxu1 %v8442_v54  ;;  %v8456_v11 = vld [vmem:[#allocation11 + $0x4] ss:$12 sps:$4 sm:$0xff]   ;;  %v1761_v54 = vld [vmem:[#allocation15] sm:$0xff] }
 0x718   :  { %1653 = vmatprep.subr.bf16.mxu0 %v9791_v1  ;;  %8193 = vmatprep.subr.bf16.mxu1 %v10234_v5  ;;  %v8457_v1 = vld [vmem:[#allocation11] ss:$12 sps:$4 sm:$0xff]  }
 0x719   :  { %1683 = vmatprep.mubr.bf16.mxu0 %v10235_v14  ;;  %8207 = vmatprep.mubr.msk.bf16.mxu1 %vm8963_vm2, %v10234_v5 }
 0x71b   :  { %1654 = vmatpush1.bf16.msra.mxu0 %v9798_v59  ;;  %8194 = vmatpush3.bf16.msra.mxu1 %v8443_v52  ;;  %v8458_v59 = vld [vmem:[#allocation11 + $0x8] ss:$12 sps:$4 sm:$0xff]  }
 0x71c   :  { %1655 = vmatprep.subr.bf16.mxu0 %v9802_v19  ;;  %8195 = vmatprep.subr.bf16.mxu1 %v10234_v5  ;;  %v1760_v19 = vld [vmem:[#allocation6] sm:$0x3] }
 0x71d   :  { %1845 = vrot.lane.b32.xlu0 %v1760_v19, %s8964_s30 }
 0x71f   :  { %1656 = vmatpush1.bf16.msra.mxu0 %v9806_v28  ;;  %8196 = vmatpush3.bf16.msra.mxu1 %v8444_v3  ;;  %v1754_v28 = vsel %vm1753_vm9, 1, %v10235_v14 }
 0x720   :  { %1657 = vmatprep.subr.bf16.mxu0 %v9810_v27  ;;  %8197 = vmatprep.subr.bf16.mxu1 %v10234_v5 }
 0x721   :  { %1756 = vperm.xlu1 %8305, %v1754_v28  }
 0x723   :  { %1658 = vmatpush1.bf16.msra.mxu0 %v8445_v6  ;;  %8198 = vmatpush3.bf16.msra.mxu1 %v8446_v56 }
 0x724   :  { %1659 = vmatprep.subr.bf16.mxu0 %v8447_v26  ;;  %8199 = vmatprep.subr.bf16.mxu1 %v10234_v5 }
 0x727   :  { %1660 = vmatpush1.bf16.msra.mxu0 %v8448_v37  ;;  %8200 = vmatpush3.bf16.msra.mxu1 %v8449_v2  ;;  %v10241_v37 = vld [vmem:[#allocation62_spill] sm:$0xff] }
 0x728   :  { %1661 = vmatprep.subr.bf16.mxu0 %v8450_v63  ;;  %8201 = vmatprep.subr.bf16.mxu1 %v10234_v5 }
 0x72b   :  { %1662 = vmatpush1.bf16.msra.mxu0 %v8451_v12  ;;  %8202 = vmatpush3.bf16.msra.mxu1 %v8452_v55 }
 0x72c   :  { %1663 = vmatprep.subr.bf16.mxu0 %v8453_v32  ;;  %8203 = vmatprep.subr.bf16.mxu1 %v10234_v5 }
 0x72f   :  { %1664 = vmatpush1.bf16.msra.mxu0 %v8454_v38  ;;  %8204 = vmatpush3.bf16.msra.mxu1 %v8455_v18 }
 0x730   :  { %1665 = vmatprep.subr.bf16.mxu0 %v8456_v11  ;;  %8205 = vmatprep.subr.bf16.mxu1 %v10234_v5 }
 0x733   :  { %1666 = vmatpush1.bf16.msra.mxu0 %v8457_v1  ;;  %8206 = vmatpush3.bf16.msra.mxu1 %v8458_v59  ;;  %v10242_v1 = vld [vmem:[#allocation63_spill] sm:$0xff] }
 0x734   :  { %8211 = vmatprep.subr.mxu0 %v10234_v5 }
 0x7d6   :  { %v1575_v27 = vpop.f32.mrf.mxu0  ;;  %v1616_v31 = vpop.f32.mrf.mxu1 }
 0x7d7   :  { %v1576_v33 = vadd.f32 %v1575_v27, %v9575_v61  ;;  %v1617_v21 = vadd.f32 %v1616_v31, %v9585_v58 }
 0x7d8   :  { %v1577_v35 = vpop.f32.mrf.mxu0  ;;  %v8189_v36 = vpop.f32.mrf.mxu1 }
 0x7d9   :  { %v1622_v41 = vadd.f32 %v1576_v33, %v10238_v40  ;;  %v1578_v46 = vadd.f32 %v1577_v35, %v9581_v10 }
 0x7da   :  { %v1579_v43 = vpop.f32.mrf.mxu0  ;;  %v1619_v44 = vpop.f32.mrf.mxu1 }
 0x7db   :  { %v7197_v45 = vmul.f32 -1.442695, %v1622_v41  ;;  %v1629_v49 = vadd.f32 %v1578_v46, %v10239_v48  ;;  %v987_v43 = vpop.permute.xlu0 %986  ;;  %v1207_v44 = vpop.permute.xlu1 %1206 }
 0x7dc   :  { %v1580_v47 = vpop.f32.mrf.mxu0  ;;  %v8190_v29 = vpop.f32.mrf.mxu1  ;;  %vm988_vm11 = vcmp.eq.s32.totalorder %v987_v43, 1  ;;  %vm1208_vm13 = vcmp.eq.s32.totalorder %v1207_v44, 1 }
 0x7dd   :  { %8414 = vpow2.f32 %v7197_v45  ;;  %v7198_v50 = vmul.f32 -1.442695, %v1629_v49  ;;  %v989_v49 = vsel %vm988_vm11, %v9589_v22, 0.0 }
 0x7df   :  { %8416 = vpow2.f32 %v7198_v50  ;;  %v1097_v45 = vpop.permute.xlu0 %1096  ;;  %v1317_v46 = vpop.permute.xlu1 %1316 }
 0x7e0   :  { %vm1098_vm12 = vcmp.eq.s32.totalorder %v1097_v45, 1  ;;  %vm1318_vm14 = vcmp.eq.s32.totalorder %v1317_v46, 1 }
 0x7e1   :  { %v1099_v50 = vsel %vm1098_vm12, %v9637_v9, %v989_v49 }
 0x7e3   :  { %v1427_v47 = vpop.permute.xlu0 %1426  ;;  %v1537_v48 = vpop.permute.xlu1 %1536 }
 0x7e4   :  { %vm1428_vm15 = vcmp.eq.s32.totalorder %v1427_v47, 1  ;;  %vm1538_vm1 = vcmp.eq.s32.totalorder %v1537_v48, 1 }
 0x7ea   :  { %v8415_v51 = vpop.eup %8414 }
 0x7eb   :  { %v1626_v15 = vadd.f32 1.0, %v8415_v51 }
 0x7ec   :  { %v8417_v16 = vpop.eup %8416 }
 0x7ed   :  { %8418 = vrcp.f32 %v1626_v15  ;;  %v1633_v17 = vadd.f32 1.0, %v8417_v16  ;;  %v7201_v15 = vld [vmem:[#allocation17] ss:$0 sm:$0xff] }
 0x7ef   :  { %8420 = vrcp.f32 %v1633_v17  ;;  %v1209_v17 = vsel %vm1208_vm13, %v9685_v4, %v1099_v50 }
 0x7fa   :  { %v8419_v24 = vpop.eup %8418 }
 0x7fb   :  { %v1636_v25 = vmul.f32 %v8419_v24, %v1617_v21  ;;  %v1319_v21 = vsel %vm1318_vm14, %v9733_v20, %v1209_v17  ;;  %v1757_v24 = vpop.permute.xlu1 %1756 }
 0x7fc   :  { %v8421_v39 = vpop.eup %8420  ;;  %v1429_v22 = vsel %vm1428_vm15, %v9783_v8, %v1319_v21  ;;  %vm1758_vm4 = vcmp.eq.s32.totalorder %v1757_v24, 1 }
 0x7fd   :  { %v1637_v23 = vadd.f32 %v1636_v25, %v10240_v53  ;;  %v1639_v30 = vsub.f32 1.0, %v8421_v39  ;;  %v1641_v57 = vmul.f32 %v8421_v39, %v9848_v34  ;;  %v1539_v9 = vsel %vm1538_vm1, %v9848_v34, %v1429_v22 }
 0x7ff   :  { %8422 = vtanh.f32 %v1637_v23 }
 0x80c   :  { %v8423_v0 = vpop.eup %8422 }
 0x80d   :  { %v1640_v42 = vmul.f32 %v8423_v0, %v1639_v30 }
 0x80f   :  { %v9878_v60 = vadd.f32 %v1641_v57, %v1640_v42 }
 0x811   :  { %v1650_v13 = vpack.c.bf16 %v9878_v60, %v9878_v60 }
 0x813   :  { %1684 = vmatmul.mubr.bf16.vlgmr.msra.gmra.mxu0 %v1650_v13  ;;  %8208 = vmatmul.mubr.bf16.vlgmr.msra.gmra.mxu1 %v1650_v13 }
 0x814   :  { %8212 = vmatpush3.msra.mxu0 %v1762_v7  ;;  %8215 = vmatprep.mubr.msk.f32.mxu0 %vm8963_vm2, %v10234_v5 }
 0x815   :  { %8213 = vmatprep.subr.mxu0 %v10234_v5 }
 0x816   :  { %8214 = vmatpush3.msra.mxu0 %v1761_v54 }
 0x81b   :  { %8216 = vmatmul.mubr.msk.f32.vlgmr.msra.gmra.mxu0 %vm1770_vm10, %v1760_v19 }
 0x8d3   :  { %v1685_v52 = vpop.f32.mrf.mxu0  ;;  %v1726_v3 = vpop.f32.mrf.mxu1 }
 0x8d4   :  { %v1686_v6 = vadd.f32 %v1685_v52, %v9575_v61  ;;  %v1727_v35 = vadd.f32 %v1726_v3, %v9585_v58  ;;  %v1647_v58 = vpop.permute.xlu0 %1646 }
 0x8d5   :  { %v1687_v56 = vpop.f32.mrf.mxu0  ;;  %v8209_v26 = vpop.f32.mrf.mxu1  ;;  %vm1648_vm3 = vcmp.eq.s32.totalorder %v1647_v58, 1 }
 0x8d6   :  { %v1732_v2 = vadd.f32 %v1686_v6, %v10241_v37  ;;  %v1688_v32 = vadd.f32 %v1687_v56, %v9581_v10  ;;  %v10243_v10 = vld [vmem:[#allocation58_spill] sm:$0xff]  ;;  %v1649_v30 = vsel %vm1648_vm3, %v9878_v60, %v1539_v9 }
 0x8d7   :  { %v1689_v63 = vpop.f32.mrf.mxu0  ;;  %v1729_v12 = vpop.f32.mrf.mxu1 }
 0x8d8   :  { %v7199_v55 = vmul.f32 -1.442695, %v1732_v2  ;;  %v1739_v59 = vadd.f32 %v1688_v32, %v10242_v1  ;;  %v1846_v4 = vpop.permute.xlu0 %1845 }
 0x8d9   :  { %v1690_v38 = vpop.f32.mrf.mxu0  ;;  %v8210_v18 = vpop.f32.mrf.mxu1 }
 0x8da   :  { %8424 = vpow2.f32 %v7199_v55  ;;  %v7200_v28 = vmul.f32 -1.442695, %v1739_v59 }
 0x8db   :  { %v1840_v11 = vpop.f32.mrf.mxu0 }
 0x8dc   :  { %8426 = vpow2.f32 %v7200_v28  ;;  %v9897_v23 = vadd.f32 %v7201_v15, %v1840_v11 }
 0x8dd   :  { %v8217_v19 = vpop.f32.mrf.mxu0 }
 0x8e7   :  { %v8425_v27 = vpop.eup %8424 }
 0x8e8   :  { %v1736_v61 = vadd.f32 1.0, %v8425_v27 }
 0x8e9   :  { %v8427_v31 = vpop.eup %8426 }
 0x8ea   :  { %8428 = vrcp.f32 %v1736_v61  ;;  %v1743_v33 = vadd.f32 1.0, %v8427_v31 }
 0x8ec   :  { %8430 = vrcp.f32 %v1743_v33 }
 0x8f7   :  { %v8429_v36 = vpop.eup %8428 }
 0x8f8   :  { %v1746_v40 = vmul.f32 %v8429_v36, %v1727_v35 }
 0x8f9   :  { %v8431_v29 = vpop.eup %8430 }
 0x8fa   :  { %v1747_v41 = vadd.f32 %v1746_v40, %v10243_v10  ;;  %v1749_v51 = vsub.f32 1.0, %v8431_v29  ;;  %v1751_v53 = vmul.f32 %v8431_v29, %v9878_v60 }
 0x8fc   :  { %8432 = vtanh.f32 %v1747_v41 }
 0x909   :  { %v8433_v16 = vpop.eup %8432 }
 0x90a   :  { %v1750_v25 = vmul.f32 %v8433_v16, %v1749_v51 }
 0x90c   :  { %v1752_v39 = vadd.f32 %v1751_v53, %v1750_v25 }
 0x90e   :  { %v9901_v0 = vsel %vm1758_vm4, %v1752_v39, %v1649_v30 }
 0x90f   :  { %v1844_v20 = vadd.f32 %v9897_v23, %v9901_v0 }
 0x911   :  { %v9906_v42 = vsel %vm586_vm0, %v1844_v20, %v1846_v4 }
 0x912   :  { %8930 = dma.done.wait [#allocation5], 4608 }
 0x913   :  { %8931 = vsyncadd [#allocation5], 4294962688  ;;  %2173 = vmatprep.mubr.bf16.mxu1 %v10235_v14  ;;  %2214 = vmatprep.mubr.bf16.mxu0 %v10235_v14  ;;  %v1886_v8 = vld [vmem:[#allocation2 + $0x100] sm:$0x33]  ;;  %vm2116_vm5 = vcmask 1041408   ;;  %v1879_v3 = vld [vmem:[#allocation2 + $0xc8] sm:$0xff]  ;;  %v1853_v25 = vpack.c.bf16 %v9906_v42, %v9906_v42 }
 0x914   :  { %v1887_v34 = vld [vmem:[#allocation2 + $0x108] sm:$0x33]  ;;  %v1878_v57 = vld [vmem:[#allocation2 + $0xc0] sm:$0xff]  ;;  %v7236_v60 = vcombine.high %v1886_v8, %v1886_v8  ;;  %v7235_v7 = vcombine.low %v1886_v8, %v1886_v8  ;;  %v1888_v47 = vld [vmem:[#allocation2 + $0x110] sm:$0x33]  ;;  %vm2112_vm6 = vcmask 556032  }
 0x915   :  { %v7238_v13 = vcombine.high %v1887_v34, %v1887_v34  ;;  %v7237_v54 = vcombine.low %v1887_v34, %v1887_v34  ;;  %v1882_v52 = vld [vmem:[#allocation2 + $0xe0] sm:$0xff]  ;;  %v1883_v6 = vld [vmem:[#allocation2 + $0xe8] sm:$0xff]  ;;  %v1889_v29 = vld [vmem:[#allocation2 + $0x118] sm:$0x33]  ;;  %v7240_v58 = vcombine.high %v1888_v47, %v1888_v47  ;;  %v7239_v51 = vcombine.low %v1888_v47, %v1888_v47 }
 0x916   :  { %v7228_v56 = vcombine.high %v1878_v57, %v1882_v52  ;;  %v7230_v26 = vcombine.high %v1879_v3, %v1883_v6  ;;  %v1870_v37 = vld [vmem:[#allocation2 + $0x80] sm:$0xff]  ;;  %v1871_v63 = vld [vmem:[#allocation2 + $0x88] sm:$0xff]  ;;  %7243 = vmatprep.subr.msk.bf16.mxu1 %vm2116_vm5, %v7236_v60  ;;  %v2118_v12 = vsel %vm2116_vm5, %v7235_v7, 0  ;;  %v7227_v38 = vcombine.low %v1878_v57, %v1882_v52  ;;  %v1880_v16 = vld [vmem:[#allocation2 + $0xd0] sm:$0xff] }
 0x917   :  { %v1874_v2 = vld [vmem:[#allocation2 + $0xa0] sm:$0xff]  ;;  %7245 = vmatprep.subr.msk.bf16.mxu0 %vm2116_vm5, %v7238_v13  ;;  %v2124_v55 = vsel %vm2116_vm5, %v7237_v54, 0  ;;  %v1875_v32 = vld [vmem:[#allocation2 + $0xa8] sm:$0xff]  ;;  %2148 = vmatpush1.bf16.msra.mxu1 %v2118_v12  ;;  %v7229_v18 = vcombine.low %v1879_v3, %v1883_v6  ;;  %v7242_v50 = vcombine.high %v1889_v29, %v1889_v29  ;;  %v7241_v15 = vcombine.low %v1889_v29, %v1889_v29  ;;  %v1884_v17 = vld [vmem:[#allocation2 + $0xf0] sm:$0xff] }
 0x918   :  { %2189 = vmatpush1.bf16.msra.mxu0 %v2124_v55  ;;  %2149 = vmatprep.subr.bf16.mxu1 %v7228_v56  ;;  %v7220_v11 = vcombine.high %v1870_v37, %v1874_v2  ;;  %v7222_v1 = vcombine.high %v1871_v63, %v1875_v32  ;;  %v1862_v59 = vld [vmem:[#allocation2 + $0x40] sm:$0xff]  ;;  %v1863_v28 = vld [vmem:[#allocation2 + $0x48] sm:$0xff]  ;;  %v7219_v61 = vcombine.low %v1870_v37, %v1874_v2  ;;  %v1881_v21 = vld [vmem:[#allocation2 + $0xd8] sm:$0xff]  ;;  %v2130_v53 = vsel %vm2116_vm5, %v7239_v51, 0 }
 0x919   :  { %2190 = vmatprep.subr.bf16.mxu0 %v7230_v26  ;;  %v1866_v19 = vld [vmem:[#allocation2 + $0x60] sm:$0xff]  ;;  %v1867_v27 = vld [vmem:[#allocation2 + $0x68] sm:$0xff]  ;;  %v7221_v31 = vcombine.low %v1871_v63, %v1875_v32  ;;  %v1885_v24 = vld [vmem:[#allocation2 + $0xf8] sm:$0xff]  ;;  %v2136_v22 = vsel %vm2116_vm5, %v7241_v15, 0  ;;  %v7232_v9 = vcombine.high %v1880_v16, %v1884_v17  ;;  %v7231_v42 = vcombine.low %v1880_v16, %v1884_v17 }
 0x91a   :  { %v7212_v33 = vcombine.high %v1862_v59, %v1866_v19  ;;  %v7214_v35 = vcombine.high %v1863_v28, %v1867_v27  ;;  %v1854_v36 = vld [vmem:[#allocation2] sm:$0xff]  ;;  %v1855_v10 = vld [vmem:[#allocation2 + $0x8] sm:$0xff]  ;;  %v7211_v43 = vcombine.low %v1862_v59, %v1866_v19  ;;  %v7213_v44 = vcombine.low %v1863_v28, %v1867_v27  ;;  %v1872_v30 = vld [vmem:[#allocation2 + $0x90] sm:$0xff] }
 0x91b   :  { %2150 = vmatpush1.bf16.msra.mxu1 %v7227_v38  ;;  %v1858_v40 = vld [vmem:[#allocation2 + $0x20] sm:$0xff]  ;;  %v1859_v41 = vld [vmem:[#allocation2 + $0x28] sm:$0xff]  ;;  %v7234_v39 = vcombine.high %v1881_v21, %v1885_v24  ;;  %v1876_v4 = vld [vmem:[#allocation2 + $0xb0] sm:$0xff]  ;;  %v7233_v34 = vcombine.low %v1881_v21, %v1885_v24 }
 0x91c   :  { %2191 = vmatpush1.bf16.msra.mxu0 %v7229_v18  ;;  %2151 = vmatprep.subr.bf16.mxu1 %v7220_v11  ;;  %v7204_v45 = vcombine.high %v1854_v36, %v1858_v40  ;;  %v7206_v46 = vcombine.high %v1855_v10, %v1859_v41  ;;  %v7203_v48 = vcombine.low %v1854_v36, %v1858_v40  ;;  %v1873_v20 = vld [vmem:[#allocation2 + $0x98] sm:$0xff]  ;;  %v1864_v13 = vld [vmem:[#allocation2 + $0x50] sm:$0xff]  ;;  %v10245_v28 = vld [vmem:[#allocation54_spill] sm:$0xff] }
 0x91d   :  { %2192 = vmatprep.subr.bf16.mxu0 %v7222_v1  ;;  %v7205_v49 = vcombine.low %v1855_v10, %v1859_v41  ;;  %v1877_v8 = vld [vmem:[#allocation2 + $0xb8] sm:$0xff]  ;;  %v7224_v57 = vcombine.high %v1872_v30, %v1876_v4  ;;  %v1868_v7 = vld [vmem:[#allocation2 + $0x70] sm:$0xff]  ;;  %v7223_v3 = vcombine.low %v1872_v30, %v1876_v4 }
 0x91e   :  { %v7226_v60 = vcombine.high %v1873_v20, %v1877_v8  ;;  %v1865_v54 = vld [vmem:[#allocation2 + $0x58] sm:$0xff]  ;;  %v7225_v6 = vcombine.low %v1873_v20, %v1877_v8  ;;  %v7216_v56 = vcombine.high %v1864_v13, %v1868_v7  ;;  %v1856_v37 = vld [vmem:[#allocation2 + $0x10] sm:$0xff]  ;;  %v7215_v55 = vcombine.low %v1864_v13, %v1868_v7 }
 0x91f   :  { %2152 = vmatpush1.bf16.msra.mxu1 %v7219_v61  ;;  %v1869_v52 = vld [vmem:[#allocation2 + $0x78] sm:$0xff]  ;;  %v1860_v2 = vld [vmem:[#allocation2 + $0x30] sm:$0xff] }
 0x920   :  { %2193 = vmatpush1.bf16.msra.mxu0 %v7221_v31  ;;  %2153 = vmatprep.subr.bf16.mxu1 %v7212_v33  ;;  %v7218_v26 = vcombine.high %v1865_v54, %v1869_v52  ;;  %v1857_v63 = vld [vmem:[#allocation2 + $0x18] sm:$0xff]  ;;  %v7217_v32 = vcombine.low %v1865_v54, %v1869_v52  ;;  %v7208_v38 = vcombine.high %v1856_v37, %v1860_v2  ;;  %v10246_v31 = vld [vmem:[#allocation55_spill] sm:$0xff] }
 0x921   :  { %2194 = vmatprep.subr.bf16.mxu0 %v7214_v35  ;;  %v1861_v12 = vld [vmem:[#allocation2 + $0x38] sm:$0xff]  ;;  %v7207_v18 = vcombine.low %v1856_v37, %v1860_v2 }
 0x922   :  { %v7209_v11 = vcombine.low %v1857_v63, %v1861_v12  ;;  %v1890_v1 = vld [vmem:[#allocation18] sm:$0xff] }
 0x923   :  { %2154 = vmatpush1.bf16.msra.mxu1 %v7211_v43  ;;  %v10244_v59 = vld [vmem:[#allocation53_spill] sm:$0xff]  ;;  %v1895_v27 = vrot.slane %v1890_v1, %v10245_v28  ;;  %v1903_v61 = vrot.slane %v1890_v1, %v9521_v62  ;;  %v1899_v33 = vrot.slane %v1890_v1, %v10246_v31 }
 0x924   :  { %2195 = vmatpush1.bf16.msra.mxu0 %v7213_v44  ;;  %2155 = vmatprep.subr.bf16.mxu1 %v7204_v45  ;;  %v1906_v19 = vsub.s32 3, %v10244_v59  ;;  %v1910_v16 = vsub.s32 4, %v10244_v59  ;;  %v1918_v17 = vsub.s32 6, %v10244_v59  ;;  %v1914_v21 = vsub.s32 5, %v10244_v59 }
 0x925   :  { %2196 = vmatprep.subr.bf16.mxu0 %v7206_v46  ;;  %v1922_v24 = vsub.s32 7, %v10244_v59 }
 0x926   :  { %v1907_v35 = vrot.slane %v1890_v1, %v1906_v19 }
 0x927   :  { %2156 = vmatpush1.bf16.msra.mxu1 %v7203_v48 }
 0x928   :  { %2197 = vmatpush1.bf16.msra.mxu0 %v7205_v49  ;;  %7247 = vmatprep.subr.msk.bf16.mxu1 %vm2116_vm5, %v7240_v58 }
 0x929   :  { %7249 = vmatprep.subr.msk.bf16.mxu0 %vm2116_vm5, %v7242_v50 }
 0x92a   :  { %7244 = vmatmul.mubr.msk.bf16.vlgmr.msra.gmra.mxu1 %vm2112_vm6, %v1853_v25 }
 0x92b   :  { %7246 = vmatmul.mubr.msk.bf16.vlgmr.msra.gmra.mxu0 %vm2112_vm6, %v1853_v25  ;;  %2230 = vmatpush1.bf16.msra.mxu1 %v2130_v53  ;;  %v1919_v53 = vrot.slane %v1890_v1, %v1918_v17 }
 0x92c   :  { %2271 = vmatpush1.bf16.msra.mxu0 %v2136_v22  ;;  %2231 = vmatprep.subr.bf16.mxu1 %v7232_v9  ;;  %v1915_v22 = vrot.slane %v1890_v1, %v1914_v21  ;;  %v1923_v9 = vrot.slane %v1890_v1, %v1922_v24 }
 0x92d   :  { %2272 = vmatprep.subr.bf16.mxu0 %v7234_v39  ;;  %2255 = vmatprep.mubr.bf16.mxu1 %v10235_v14 }
 0x92e   :  { %2296 = vmatprep.mubr.bf16.mxu0 %v10235_v14  ;;  %v7210_v14 = vcombine.high %v1857_v63, %v1861_v12 }
 0x92f   :  { %2232 = vmatpush1.bf16.msra.mxu1 %v7231_v42 }
 0x930   :  { %2273 = vmatpush1.bf16.msra.mxu0 %v7233_v34  ;;  %2233 = vmatprep.subr.bf16.mxu1 %v7224_v57 }
 0x931   :  { %2274 = vmatprep.subr.bf16.mxu0 %v7226_v60 }
 0x933   :  { %2234 = vmatpush1.bf16.msra.mxu1 %v7223_v3 }
 0x934   :  { %2275 = vmatpush1.bf16.msra.mxu0 %v7225_v6  ;;  %2235 = vmatprep.subr.bf16.mxu1 %v7216_v56 }
 0x935   :  { %2276 = vmatprep.subr.bf16.mxu0 %v7218_v26 }
 0x937   :  { %2236 = vmatpush1.bf16.msra.mxu1 %v7215_v55 }
 0x938   :  { %2277 = vmatpush1.bf16.msra.mxu0 %v7217_v32  ;;  %2237 = vmatprep.subr.bf16.mxu1 %v7208_v38 }
 0x939   :  { %2278 = vmatprep.subr.bf16.mxu0 %v7210_v14 }
 0x93b   :  { %2238 = vmatpush1.bf16.msra.mxu1 %v7207_v18 }
 0x93c   :  { %2279 = vmatpush1.bf16.msra.mxu0 %v7209_v11 }
 0x93e   :  { %7248 = vmatmul.mubr.msk.bf16.vlgmr.msra.gmra.mxu1 %vm2112_vm6, %v1853_v25 }
 0x93f   :  { %7250 = vmatmul.mubr.msk.bf16.vlgmr.msra.gmra.mxu0 %vm2112_vm6, %v1853_v25  ;;  %v1911_v25 = vrot.slane %v1890_v1, %v1910_v16 }
 0x9ea   :  { %v2175_v36 = vpop.f32.mrf.mxu1 }
 0x9eb   :  { %v2216_v40 = vpop.f32.mrf.mxu0  ;;  %v9932_v10 = vadd.f32 %v2175_v36, %v1895_v27 }
 0x9ec   :  { %v9934_v41 = vadd.f32 %v2216_v40, %v1903_v61  ;;  %v2177_v43 = vpop.f32.mrf.mxu1 }
 0x9ed   :  { %v2218_v44 = vpop.f32.mrf.mxu0  ;;  %v2305_v45 = vmax.f32 %v9932_v10, 0.0  ;;  %v2178_v47 = vadd.f32 %v2177_v43, %v1899_v33 }
 0x9ee   :  { %v2307_v46 = vmax.f32 %v9934_v41, 0.0  ;;  %v2219_v29 = vadd.f32 %v2218_v44, %v1907_v35  ;;  %v2179_v48 = vpop.f32.mrf.mxu1 }
 0x9ef   :  { %v2220_v49 = vpop.f32.mrf.mxu0  ;;  %v2306_v58 = vmax.f32 %v2178_v47, 0.0 }
 0x9f0   :  { %v2308_v50 = vmax.f32 %v2219_v29, 0.0  ;;  %v2180_v51 = vpop.f32.mrf.mxu1 }
 0x9f1   :  { %v2221_v15 = vpop.f32.mrf.mxu0 }
 0x9fe   :  { %v2257_v39 = vpop.f32.mrf.mxu1 }
 0x9ff   :  { %v2298_v30 = vpop.f32.mrf.mxu0  ;;  %v9950_v4 = vadd.f32 %v2257_v39, %v1911_v25 }
 0xa00   :  { %v9952_v20 = vadd.f32 %v2298_v30, %v1919_v53  ;;  %v2259_v8 = vpop.f32.mrf.mxu1 }
 0xa01   :  { %v2300_v42 = vpop.f32.mrf.mxu0  ;;  %v2309_v34 = vmax.f32 %v9950_v4, 0.0  ;;  %v9956_v60 = vadd.f32 %v2259_v8, %v1915_v22 }
 0xa02   :  { %v2311_v57 = vmax.f32 %v9952_v20, 0.0  ;;  %v9958_v13 = vadd.f32 %v2300_v42, %v1923_v9  ;;  %v2261_v7 = vpop.f32.mrf.mxu1 }
 0xa03   :  { %v2302_v54 = vpop.f32.mrf.mxu0  ;;  %v2310_v52 = vmax.f32 %v9956_v60, 0.0 }
 0xa04   :  { %v2312_v3 = vmax.f32 %v9958_v13, 0.0  ;;  %v2262_v6 = vpop.f32.mrf.mxu1 }
 0xa05   :  { %v2303_v56 = vpop.f32.mrf.mxu0 }
 0xa06   :  { %8932 = dma.done.wait [#allocation5 + $0x1], 65536 }
 0xa07   :  { %8933 = vsyncadd [#allocation5 + $0x1], 4294901760  ;;  %v9962_v26 = vpack.c.bf16 %v2306_v58, %v2306_v58  ;;  %v9964_v37 = vpack.c.bf16 %v2308_v50, %v2308_v50  ;;  %v2381_v2 = vld [vmem:[#allocation3 + $0x1c0] sm:$0xff]  ;;  %v2370_v4 = vld [vmem:[#allocation3 + $0x168] sm:$0xff] }
 0xa08   :  { %v2385_v63 = vld [vmem:[#allocation3 + $0x1e0] sm:$0xff] }
 0xa09   :  { %5471 = vmatprep.mubr.bf16.mxu1 %v9962_v26  ;;  %5512 = vmatprep.mubr.bf16.mxu0 %v9964_v37  ;;  %v2509_v12 = vld [vmem:[#allocation3 + $0x5c0] sm:$0xff]  ;;  %v7308_v55 = vcombine.high %v2381_v2, %v2385_v63  ;;  %v7307_v38 = vcombine.low %v2381_v2, %v2385_v63 }
 0xa0a   :  { %v2513_v32 = vld [vmem:[#allocation3 + $0x5e0] sm:$0xff] }
 0xa0b   :  { %v2373_v14 = vld [vmem:[#allocation3 + $0x180] sm:$0xff]  ;;  %v7436_v11 = vcombine.high %v2509_v12, %v2513_v32  ;;  %v7435_v1 = vcombine.low %v2509_v12, %v2513_v32  ;;  %5439 = vmatprep.subr.bf16.mxu1 %v7308_v55 }
 0xa0c   :  { %v2377_v18 = vld [vmem:[#allocation3 + $0x1a0] sm:$0xff]  ;;  %5440 = vmatpush1.bf16.msra.mxu1 %v7307_v38 }
 0xa0d   :  { %v7300_v27 = vcombine.high %v2373_v14, %v2377_v18  ;;  %v2501_v61 = vld [vmem:[#allocation3 + $0x580] sm:$0xff]  ;;  %5480 = vmatprep.subr.bf16.mxu0 %v7436_v11  ;;  %v7299_v47 = vcombine.low %v2373_v14, %v2377_v18 }
 0xa0e   :  { %v2505_v33 = vld [vmem:[#allocation3 + $0x5a0] sm:$0xff]  ;;  %5481 = vmatpush1.bf16.msra.mxu0 %v7435_v1 }
 0xa0f   :  { %v2365_v35 = vld [vmem:[#allocation3 + $0x140] sm:$0xff]  ;;  %v7428_v36 = vcombine.high %v2501_v61, %v2505_v33  ;;  %5441 = vmatprep.subr.bf16.mxu1 %v7300_v27  ;;  %v7427_v29 = vcombine.low %v2501_v61, %v2505_v33 }
 0xa10   :  { %v2369_v40 = vld [vmem:[#allocation3 + $0x160] sm:$0xff]  ;;  %5442 = vmatpush1.bf16.msra.mxu1 %v7299_v47 }
 0xa11   :  { %v2493_v43 = vld [vmem:[#allocation3 + $0x540] sm:$0xff]  ;;  %v7292_v48 = vcombine.high %v2365_v35, %v2369_v40  ;;  %5482 = vmatprep.subr.bf16.mxu0 %v7428_v36  ;;  %v7291_v25 = vcombine.low %v2365_v35, %v2369_v40 }
 0xa12   :  { %v2497_v44 = vld [vmem:[#allocation3 + $0x560] sm:$0xff]  ;;  %5483 = vmatpush1.bf16.msra.mxu0 %v7427_v29 }
 0xa13   :  { %v7420_v49 = vcombine.high %v2493_v43, %v2497_v44  ;;  %v2357_v58 = vld [vmem:[#allocation3 + $0x100] sm:$0xff]  ;;  %5443 = vmatprep.subr.bf16.mxu1 %v7292_v48  ;;  %v7419_v53 = vcombine.low %v2493_v43, %v2497_v44 }
 0xa14   :  { %v2361_v50 = vld [vmem:[#allocation3 + $0x120] sm:$0xff]  ;;  %5444 = vmatpush1.bf16.msra.mxu1 %v7291_v25 }
 0xa15   :  { %v2485_v51 = vld [vmem:[#allocation3 + $0x500] sm:$0xff]  ;;  %v7284_v22 = vcombine.high %v2357_v58, %v2361_v50  ;;  %5484 = vmatprep.subr.bf16.mxu0 %v7420_v49  ;;  %v7283_v7 = vcombine.low %v2357_v58, %v2361_v50 }
 0xa16   :  { %v2489_v15 = vld [vmem:[#allocation3 + $0x520] sm:$0xff]  ;;  %5485 = vmatpush1.bf16.msra.mxu0 %v7419_v53 }
 0xa17   :  { %v7412_v9 = vcombine.high %v2485_v51, %v2489_v15  ;;  %v2349_v39 = vld [vmem:[#allocation3 + $0xc0] sm:$0xff]  ;;  %5445 = vmatprep.subr.bf16.mxu1 %v7284_v22  ;;  %v7411_v54 = vcombine.low %v2485_v51, %v2489_v15 }
 0xa18   :  { %v2353_v30 = vld [vmem:[#allocation3 + $0xe0] sm:$0xff]  ;;  %5446 = vmatpush1.bf16.msra.mxu1 %v7283_v7 }
 0xa19   :  { %v2477_v8 = vld [vmem:[#allocation3 + $0x4c0] sm:$0xff]  ;;  %v7276_v6 = vcombine.high %v2349_v39, %v2353_v30  ;;  %5486 = vmatprep.subr.bf16.mxu0 %v7412_v9  ;;  %v7275_v32 = vcombine.low %v2349_v39, %v2353_v30 }
 0xa1a   :  { %v2481_v42 = vld [vmem:[#allocation3 + $0x4e0] sm:$0xff]  ;;  %5487 = vmatpush1.bf16.msra.mxu0 %v7411_v54 }
 0xa1b   :  { %v7404_v56 = vcombine.high %v2477_v8, %v2481_v42  ;;  %v2341_v2 = vld [vmem:[#allocation3 + $0x80] sm:$0xff]  ;;  %5447 = vmatprep.subr.bf16.mxu1 %v7276_v6  ;;  %v7403_v38 = vcombine.low %v2477_v8, %v2481_v42 }
 0xa1c   :  { %v2345_v63 = vld [vmem:[#allocation3 + $0xa0] sm:$0xff]  ;;  %5448 = vmatpush1.bf16.msra.mxu1 %v7275_v32 }
 0xa1d   :  { %v2469_v12 = vld [vmem:[#allocation3 + $0x480] sm:$0xff]  ;;  %v7268_v14 = vcombine.high %v2341_v2, %v2345_v63  ;;  %5488 = vmatprep.subr.bf16.mxu0 %v7404_v56  ;;  %v7267_v33 = vcombine.low %v2341_v2, %v2345_v63 }
 0xa1e   :  { %v2473_v55 = vld [vmem:[#allocation3 + $0x4a0] sm:$0xff]  ;;  %5489 = vmatpush1.bf16.msra.mxu0 %v7403_v38 }
 0xa1f   :  { %v7396_v18 = vcombine.high %v2469_v12, %v2473_v55  ;;  %v2333_v11 = vld [vmem:[#allocation3 + $0x40] sm:$0xff]  ;;  %5449 = vmatprep.subr.bf16.mxu1 %v7268_v14  ;;  %v7395_v35 = vcombine.low %v2469_v12, %v2473_v55 }
 0xa20   :  { %v2337_v1 = vld [vmem:[#allocation3 + $0x60] sm:$0xff]  ;;  %5450 = vmatpush1.bf16.msra.mxu1 %v7267_v33 }
 0xa21   :  { %v2461_v27 = vld [vmem:[#allocation3 + $0x440] sm:$0xff]  ;;  %v7260_v36 = vcombine.high %v2333_v11, %v2337_v1  ;;  %5490 = vmatprep.subr.bf16.mxu0 %v7396_v18  ;;  %v7259_v48 = vcombine.low %v2333_v11, %v2337_v1 }
 0xa22   :  { %v2465_v61 = vld [vmem:[#allocation3 + $0x460] sm:$0xff]  ;;  %5491 = vmatpush1.bf16.msra.mxu0 %v7395_v35 }
 0xa23   :  { %v7388_v40 = vcombine.high %v2461_v27, %v2465_v61  ;;  %v2325_v43 = vld [vmem:[#allocation3] sm:$0xff]  ;;  %5451 = vmatprep.subr.bf16.mxu1 %v7260_v36  ;;  %v7387_v49 = vcombine.low %v2461_v27, %v2465_v61 }
 0xa24   :  { %v2329_v44 = vld [vmem:[#allocation3 + $0x20] sm:$0xff]  ;;  %5452 = vmatpush1.bf16.msra.mxu1 %v7259_v48 }
 0xa25   :  { %v2453_v47 = vld [vmem:[#allocation3 + $0x400] sm:$0xff]  ;;  %v7252_v58 = vcombine.high %v2325_v43, %v2329_v44  ;;  %5492 = vmatprep.subr.bf16.mxu0 %v7388_v40  ;;  %v7251_v22 = vcombine.low %v2325_v43, %v2329_v44 }
 0xa26   :  { %v2457_v29 = vld [vmem:[#allocation3 + $0x420] sm:$0xff]  ;;  %5493 = vmatpush1.bf16.msra.mxu0 %v7387_v49 }
 0xa27   :  { %v7380_v50 = vcombine.high %v2453_v47, %v2457_v29  ;;  %v2445_v51 = vld [vmem:[#allocation3 + $0x3c0] sm:$0xff]  ;;  %5453 = vmatprep.subr.bf16.mxu1 %v7252_v58  ;;  %v7379_v9 = vcombine.low %v2453_v47, %v2457_v29 }
 0xa28   :  { %v2449_v15 = vld [vmem:[#allocation3 + $0x3e0] sm:$0xff]  ;;  %5454 = vmatpush1.bf16.msra.mxu1 %v7251_v22 }
 0xa29   :  { %v2573_v25 = vld [vmem:[#allocation3 + $0x7c0] sm:$0xff]  ;;  %v7372_v39 = vcombine.high %v2445_v51, %v2449_v15  ;;  %5494 = vmatprep.subr.bf16.mxu0 %v7380_v50  ;;  %v7371_v6 = vcombine.low %v2445_v51, %v2449_v15 }
 0xa2a   :  { %v2577_v53 = vld [vmem:[#allocation3 + $0x7e0] sm:$0xff]  ;;  %5495 = vmatpush1.bf16.msra.mxu0 %v7379_v9 }
 0xa2b   :  { %v7500_v30 = vcombine.high %v2573_v25, %v2577_v53  ;;  %v2437_v8 = vld [vmem:[#allocation3 + $0x380] sm:$0xff]  ;;  %5455 = vmatprep.subr.bf16.mxu1 %v7372_v39  ;;  %v7499_v56 = vcombine.low %v2573_v25, %v2577_v53 }
 0xa2c   :  { %v2441_v42 = vld [vmem:[#allocation3 + $0x3a0] sm:$0xff]  ;;  %5456 = vmatpush2.bf16.msra.mxu1 %v7371_v6 }
 0xa2d   :  { %v2565_v7 = vld [vmem:[#allocation3 + $0x780] sm:$0xff]  ;;  %v7364_v2 = vcombine.high %v2437_v8, %v2441_v42  ;;  %5496 = vmatprep.subr.bf16.mxu0 %v7500_v30  ;;  %v7363_v14 = vcombine.low %v2437_v8, %v2441_v42 }
 0xa2e   :  { %v2569_v54 = vld [vmem:[#allocation3 + $0x7a0] sm:$0xff]  ;;  %5497 = vmatpush2.bf16.msra.mxu0 %v7499_v56 }
 0xa2f   :  { %v7492_v63 = vcombine.high %v2565_v7, %v2569_v54  ;;  %v2429_v12 = vld [vmem:[#allocation3 + $0x340] sm:$0xff]  ;;  %5457 = vmatprep.subr.bf16.mxu1 %v7364_v2  ;;  %v7491_v18 = vcombine.low %v2565_v7, %v2569_v54 }
 0xa30   :  { %v2433_v55 = vld [vmem:[#allocation3 + $0x360] sm:$0xff]  ;;  %5458 = vmatpush2.bf16.msra.mxu1 %v7363_v14 }
 0xa31   :  { %v2557_v32 = vld [vmem:[#allocation3 + $0x740] sm:$0xff]  ;;  %v7356_v11 = vcombine.high %v2429_v12, %v2433_v55  ;;  %5498 = vmatprep.subr.bf16.mxu0 %v7492_v63  ;;  %v7355_v36 = vcombine.low %v2429_v12, %v2433_v55 }
 0xa32   :  { %v2561_v38 = vld [vmem:[#allocation3 + $0x760] sm:$0xff]  ;;  %5499 = vmatpush2.bf16.msra.mxu0 %v7491_v18 }
 0xa33   :  { %v7484_v1 = vcombine.high %v2557_v32, %v2561_v38  ;;  %v2421_v27 = vld [vmem:[#allocation3 + $0x300] sm:$0xff]  ;;  %5459 = vmatprep.subr.bf16.mxu1 %v7356_v11  ;;  %v7483_v40 = vcombine.low %v2557_v32, %v2561_v38 }
 0xa34   :  { %v2425_v61 = vld [vmem:[#allocation3 + $0x320] sm:$0xff]  ;;  %5460 = vmatpush2.bf16.msra.mxu1 %v7355_v36 }
 0xa35   :  { %v2549_v33 = vld [vmem:[#allocation3 + $0x700] sm:$0xff]  ;;  %v7348_v43 = vcombine.high %v2421_v27, %v2425_v61  ;;  %5500 = vmatprep.subr.bf16.mxu0 %v7484_v1  ;;  %v7347_v58 = vcombine.low %v2421_v27, %v2425_v61 }
 0xa36   :  { %v2553_v35 = vld [vmem:[#allocation3 + $0x720] sm:$0xff]  ;;  %5501 = vmatpush2.bf16.msra.mxu0 %v7483_v40 }
 0xa37   :  { %v7476_v44 = vcombine.high %v2549_v33, %v2553_v35  ;;  %v2413_v47 = vld [vmem:[#allocation3 + $0x2c0] sm:$0xff]  ;;  %5461 = vmatprep.subr.bf16.mxu1 %v7348_v43  ;;  %v7475_v50 = vcombine.low %v2549_v33, %v2553_v35 }
 0xa38   :  { %v2417_v29 = vld [vmem:[#allocation3 + $0x2e0] sm:$0xff]  ;;  %5462 = vmatpush2.bf16.msra.mxu1 %v7347_v58  ;;  %v9971_v58 = vpack.c.bf16 %v2305_v45, %v2305_v45  ;;  %v9981_v45 = vpack.c.bf16 %v2310_v52, %v2310_v52 }
 0xa39   :  { %v2541_v48 = vld [vmem:[#allocation3 + $0x6c0] sm:$0xff]  ;;  %v7340_v51 = vcombine.high %v2413_v47, %v2417_v29  ;;  %5502 = vmatprep.subr.bf16.mxu0 %v7476_v44  ;;  %v7339_v39 = vcombine.low %v2413_v47, %v2417_v29 }
 0xa3a   :  { %v2545_v49 = vld [vmem:[#allocation3 + $0x6e0] sm:$0xff]  ;;  %5503 = vmatpush2.bf16.msra.mxu0 %v7475_v50 }
 0xa3b   :  { %v7468_v15 = vcombine.high %v2541_v48, %v2545_v49  ;;  %v2405_v25 = vld [vmem:[#allocation3 + $0x280] sm:$0xff]  ;;  %5463 = vmatprep.subr.bf16.mxu1 %v7340_v51  ;;  %v7467_v30 = vcombine.low %v2541_v48, %v2545_v49 }
 0xa3c   :  { %v2409_v53 = vld [vmem:[#allocation3 + $0x2a0] sm:$0xff]  ;;  %5464 = vmatpush2.bf16.msra.mxu1 %v7339_v39 }
 0xa3d   :  { %v2533_v22 = vld [vmem:[#allocation3 + $0x680] sm:$0xff]  ;;  %v7332_v8 = vcombine.high %v2405_v25, %v2409_v53  ;;  %5504 = vmatprep.subr.bf16.mxu0 %v7468_v15  ;;  %v7331_v2 = vcombine.low %v2405_v25, %v2409_v53  ;;  %v9976_v15 = vpack.c.bf16 %v2307_v46, %v2307_v46  ;;  %v9987_v46 = vpack.c.bf16 %v2312_v3, %v2312_v3 }
 0xa3e   :  { %v2537_v9 = vld [vmem:[#allocation3 + $0x6a0] sm:$0xff]  ;;  %5505 = vmatpush2.bf16.msra.mxu0 %v7467_v30 }
 0xa3f   :  { %v7460_v42 = vcombine.high %v2533_v22, %v2537_v9  ;;  %v2397_v7 = vld [vmem:[#allocation3 + $0x240] sm:$0xff]  ;;  %5465 = vmatprep.subr.bf16.mxu1 %v7332_v8  ;;  %v7459_v63 = vcombine.low %v2533_v22, %v2537_v9 }
 0xa40   :  { %v2401_v54 = vld [vmem:[#allocation3 + $0x260] sm:$0xff]  ;;  %5466 = vmatpush2.bf16.msra.mxu1 %v7331_v2 }
 0xa41   :  { %v2525_v6 = vld [vmem:[#allocation3 + $0x640] sm:$0xff]  ;;  %v7324_v12 = vcombine.high %v2397_v7, %v2401_v54  ;;  %5506 = vmatprep.subr.bf16.mxu0 %v7460_v42  ;;  %v7323_v11 = vcombine.low %v2397_v7, %v2401_v54 }
 0xa42   :  { %v2529_v56 = vld [vmem:[#allocation3 + $0x660] sm:$0xff]  ;;  %5507 = vmatpush2.bf16.msra.mxu0 %v7459_v63 }
 0xa43   :  { %v7452_v55 = vcombine.high %v2525_v6, %v2529_v56  ;;  %v2389_v32 = vld [vmem:[#allocation3 + $0x200] sm:$0xff]  ;;  %5467 = vmatprep.subr.bf16.mxu1 %v7324_v12  ;;  %v7451_v1 = vcombine.low %v2525_v6, %v2529_v56 }
 0xa44   :  { %v2393_v38 = vld [vmem:[#allocation3 + $0x220] sm:$0xff]  ;;  %5468 = vmatpush2.bf16.msra.mxu1 %v7323_v11 }
 0xa45   :  { %v2517_v14 = vld [vmem:[#allocation3 + $0x600] sm:$0xff]  ;;  %v7316_v27 = vcombine.high %v2389_v32, %v2393_v38  ;;  %5508 = vmatprep.subr.bf16.mxu0 %v7452_v55  ;;  %v7315_v43 = vcombine.low %v2389_v32, %v2393_v38 }
 0xa46   :  { %v2521_v18 = vld [vmem:[#allocation3 + $0x620] sm:$0xff]  ;;  %5509 = vmatpush2.bf16.msra.mxu0 %v7451_v1 }
 0xa47   :  { %v7444_v61 = vcombine.high %v2517_v14, %v2521_v18  ;;  %v2637_v33 = vld [vmem:[#allocation3 + $0x9c0] sm:$0xff]  ;;  %5469 = vmatprep.subr.bf16.mxu1 %v7316_v27  ;;  %v7443_v44 = vcombine.low %v2517_v14, %v2521_v18 }
 0xa48   :  { %v2641_v35 = vld [vmem:[#allocation3 + $0x9e0] sm:$0xff]  ;;  %5470 = vmatpush2.bf16.msra.mxu1 %v7315_v43 }
 0xa49   :  { %v2765_v36 = vld [vmem:[#allocation3 + $0xdc0] sm:$0xff]  ;;  %v7564_v47 = vcombine.high %v2637_v33, %v2641_v35  ;;  %5510 = vmatprep.subr.bf16.mxu0 %v7444_v61  ;;  %v7563_v25 = vcombine.low %v2637_v33, %v2641_v35 }
 0xa4a   :  { %v2769_v40 = vld [vmem:[#allocation3 + $0xde0] sm:$0xff]  ;;  %5511 = vmatpush2.bf16.msra.mxu0 %v7443_v44 }
 0xa4b   :  { %v7692_v29 = vcombine.high %v2765_v36, %v2769_v40  ;;  %v2629_v48 = vld [vmem:[#allocation3 + $0x980] sm:$0xff]  ;;  %5521 = vmatprep.subr.bf16.mxu1 %v7564_v47  ;;  %v7691_v53 = vcombine.low %v2765_v36, %v2769_v40  ;;  %5472 = vmatmul.mubr.bf16.vlgmr.msra.gmra.mxu1 %v9971_v58 }
 0xa4c   :  { %v2633_v49 = vld [vmem:[#allocation3 + $0x9a0] sm:$0xff]  ;;  %5522 = vmatpush1.bf16.msra.mxu1 %v7563_v25  ;;  %5553 = vmatprep.mubr.bf16.mxu1 %v9981_v45 }
 0xa4d   :  { %v2757_v50 = vld [vmem:[#allocation3 + $0xd80] sm:$0xff]  ;;  %v7556_v22 = vcombine.high %v2629_v48, %v2633_v49  ;;  %5562 = vmatprep.subr.bf16.mxu0 %v7692_v29  ;;  %5513 = vmatmul.mubr.bf16.vlgmr.msra.gmra.mxu0 %v9976_v15  ;;  %v7555_v8 = vcombine.low %v2629_v48, %v2633_v49 }
 0xa4e   :  { %v2761_v51 = vld [vmem:[#allocation3 + $0xda0] sm:$0xff]  ;;  %5563 = vmatpush1.bf16.msra.mxu0 %v7691_v53  ;;  %5594 = vmatprep.mubr.bf16.mxu0 %v9987_v46 }
 0xa4f   :  { %v7684_v9 = vcombine.high %v2757_v50, %v2761_v51  ;;  %v2621_v39 = vld [vmem:[#allocation3 + $0x940] sm:$0xff]  ;;  %5523 = vmatprep.subr.bf16.mxu1 %v7556_v22  ;;  %v7683_v42 = vcombine.low %v2757_v50, %v2761_v51 }
 0xa50   :  { %v2625_v10 = vld [vmem:[#allocation3 + $0x960] sm:$0xff]  ;;  %5524 = vmatpush1.bf16.msra.mxu1 %v7555_v8 }
 0xa51   :  { %v2749_v41 = vld [vmem:[#allocation3 + $0xd40] sm:$0xff]  ;;  %v7548_v60 = vcombine.high %v2621_v39, %v2625_v10  ;;  %5564 = vmatprep.subr.bf16.mxu0 %v7684_v9  ;;  %v7547_v13 = vcombine.low %v2621_v39, %v2625_v10 }
 0xa52   :  { %v2753_v30 = vld [vmem:[#allocation3 + $0xd60] sm:$0xff]  ;;  %5565 = vmatpush1.bf16.msra.mxu0 %v7683_v42 }
 0xa53   :  { %v7676_v52 = vcombine.high %v2749_v41, %v2753_v30  ;;  %v2613_v7 = vld [vmem:[#allocation3 + $0x900] sm:$0xff]  ;;  %5525 = vmatprep.subr.bf16.mxu1 %v7548_v60  ;;  %v7675_v3 = vcombine.low %v2749_v41, %v2753_v30 }
 0xa54   :  { %v2617_v54 = vld [vmem:[#allocation3 + $0x920] sm:$0xff]  ;;  %5526 = vmatpush1.bf16.msra.mxu1 %v7547_v13 }
 0xa55   :  { %v2741_v6 = vld [vmem:[#allocation3 + $0xd00] sm:$0xff]  ;;  %v7540_v2 = vcombine.high %v2613_v7, %v2617_v54  ;;  %5566 = vmatprep.subr.bf16.mxu0 %v7676_v52  ;;  %v7539_v14 = vcombine.low %v2613_v7, %v2617_v54 }
 0xa56   :  { %v2745_v56 = vld [vmem:[#allocation3 + $0xd20] sm:$0xff]  ;;  %5567 = vmatpush1.bf16.msra.mxu0 %v7675_v3 }
 0xa57   :  { %v7668_v63 = vcombine.high %v2741_v6, %v2745_v56  ;;  %v2605_v12 = vld [vmem:[#allocation3 + $0x8c0] sm:$0xff]  ;;  %5527 = vmatprep.subr.bf16.mxu1 %v7540_v2  ;;  %v7667_v18 = vcombine.low %v2741_v6, %v2745_v56 }
 0xa58   :  { %v2609_v55 = vld [vmem:[#allocation3 + $0x8e0] sm:$0xff]  ;;  %5528 = vmatpush1.bf16.msra.mxu1 %v7539_v14 }
 0xa59   :  { %v2733_v32 = vld [vmem:[#allocation3 + $0xcc0] sm:$0xff]  ;;  %v7532_v11 = vcombine.high %v2605_v12, %v2609_v55  ;;  %5568 = vmatprep.subr.bf16.mxu0 %v7668_v63  ;;  %v7531_v36 = vcombine.low %v2605_v12, %v2609_v55 }
 0xa5a   :  { %v2737_v38 = vld [vmem:[#allocation3 + $0xce0] sm:$0xff]  ;;  %5569 = vmatpush1.bf16.msra.mxu0 %v7667_v18 }
 0xa5b   :  { %v7660_v1 = vcombine.high %v2733_v32, %v2737_v38  ;;  %v2597_v27 = vld [vmem:[#allocation3 + $0x880] sm:$0xff]  ;;  %5529 = vmatprep.subr.bf16.mxu1 %v7532_v11  ;;  %v7659_v40 = vcombine.low %v2733_v32, %v2737_v38 }
 0xa5c   :  { %v2601_v61 = vld [vmem:[#allocation3 + $0x8a0] sm:$0xff]  ;;  %5530 = vmatpush1.bf16.msra.mxu1 %v7531_v36 }
 0xa5d   :  { %v2725_v33 = vld [vmem:[#allocation3 + $0xc80] sm:$0xff]  ;;  %v7524_v43 = vcombine.high %v2597_v27, %v2601_v61  ;;  %5570 = vmatprep.subr.bf16.mxu0 %v7660_v1  ;;  %v7523_v50 = vcombine.low %v2597_v27, %v2601_v61 }
 0xa5e   :  { %v2729_v35 = vld [vmem:[#allocation3 + $0xca0] sm:$0xff]  ;;  %5571 = vmatpush1.bf16.msra.mxu0 %v7659_v40 }
 0xa5f   :  { %v7652_v44 = vcombine.high %v2725_v33, %v2729_v35  ;;  %v2589_v47 = vld [vmem:[#allocation3 + $0x840] sm:$0xff]  ;;  %5531 = vmatprep.subr.bf16.mxu1 %v7524_v43  ;;  %v7651_v51 = vcombine.low %v2725_v33, %v2729_v35 }
 0xa60   :  { %v2593_v29 = vld [vmem:[#allocation3 + $0x860] sm:$0xff]  ;;  %5532 = vmatpush1.bf16.msra.mxu1 %v7523_v50 }
 0xa61   :  { %v2717_v48 = vld [vmem:[#allocation3 + $0xc40] sm:$0xff]  ;;  %v7516_v25 = vcombine.high %v2589_v47, %v2593_v29  ;;  %5572 = vmatprep.subr.bf16.mxu0 %v7652_v44  ;;  %v7515_v41 = vcombine.low %v2589_v47, %v2593_v29 }
 0xa62   :  { %v2721_v49 = vld [vmem:[#allocation3 + $0xc60] sm:$0xff]  ;;  %5573 = vmatpush1.bf16.msra.mxu0 %v7651_v51 }
 0xa63   :  { %v7644_v53 = vcombine.high %v2717_v48, %v2721_v49  ;;  %v2581_v22 = vld [vmem:[#allocation3 + $0x800] sm:$0xff]  ;;  %5533 = vmatprep.subr.bf16.mxu1 %v7516_v25  ;;  %v7643_v30 = vcombine.low %v2717_v48, %v2721_v49 }
 0xa64   :  { %v2585_v9 = vld [vmem:[#allocation3 + $0x820] sm:$0xff]  ;;  %5534 = vmatpush1.bf16.msra.mxu1 %v7515_v41 }
 0xa65   :  { %v2709_v39 = vld [vmem:[#allocation3 + $0xc00] sm:$0xff]  ;;  %v7508_v8 = vcombine.high %v2581_v22, %v2585_v9  ;;  %5574 = vmatprep.subr.bf16.mxu0 %v7644_v53  ;;  %v7507_v6 = vcombine.low %v2581_v22, %v2585_v9 }
 0xa66   :  { %v2713_v10 = vld [vmem:[#allocation3 + $0xc20] sm:$0xff]  ;;  %5575 = vmatpush1.bf16.msra.mxu0 %v7643_v30 }
 0xa67   :  { %v7636_v42 = vcombine.high %v2709_v39, %v2713_v10  ;;  %v2701_v60 = vld [vmem:[#allocation3 + $0xbc0] sm:$0xff]  ;;  %5535 = vmatprep.subr.bf16.mxu1 %v7508_v8  ;;  %v7635_v56 = vcombine.low %v2709_v39, %v2713_v10 }
 0xa68   :  { %v2705_v52 = vld [vmem:[#allocation3 + $0xbe0] sm:$0xff]  ;;  %5536 = vmatpush1.bf16.msra.mxu1 %v7507_v6 }
 0xa69   :  { %v2829_v7 = vld [vmem:[#allocation3 + $0xfc0] sm:$0xff]  ;;  %v7628_v13 = vcombine.high %v2701_v60, %v2705_v52  ;;  %5576 = vmatprep.subr.bf16.mxu0 %v7636_v42  ;;  %v7627_v32 = vcombine.low %v2701_v60, %v2705_v52 }
 0xa6a   :  { %v2833_v54 = vld [vmem:[#allocation3 + $0xfe0] sm:$0xff]  ;;  %5577 = vmatpush1.bf16.msra.mxu0 %v7635_v56 }
 0xa6b   :  { %v7756_v3 = vcombine.high %v2829_v7, %v2833_v54  ;;  %v2693_v2 = vld [vmem:[#allocation3 + $0xb80] sm:$0xff]  ;;  %5537 = vmatprep.subr.bf16.mxu1 %v7628_v13  ;;  %v7755_v38 = vcombine.low %v2829_v7, %v2833_v54 }
 0xa6c   :  { %v2697_v63 = vld [vmem:[#allocation3 + $0xba0] sm:$0xff]  ;;  %5538 = vmatpush2.bf16.msra.mxu1 %v7627_v32 }
 0xa6d   :  { %v2821_v12 = vld [vmem:[#allocation3 + $0xf80] sm:$0xff]  ;;  %v7620_v14 = vcombine.high %v2693_v2, %v2697_v63  ;;  %5578 = vmatprep.subr.bf16.mxu0 %v7756_v3  ;;  %v7619_v33 = vcombine.low %v2693_v2, %v2697_v63 }
 0xa6e   :  { %v2825_v55 = vld [vmem:[#allocation3 + $0xfa0] sm:$0xff]  ;;  %5579 = vmatpush2.bf16.msra.mxu0 %v7755_v38 }
 0xa6f   :  { %v7748_v18 = vcombine.high %v2821_v12, %v2825_v55  ;;  %v2685_v11 = vld [vmem:[#allocation3 + $0xb40] sm:$0xff]  ;;  %5539 = vmatprep.subr.bf16.mxu1 %v7620_v14  ;;  %v7747_v35 = vcombine.low %v2821_v12, %v2825_v55 }
 0xa70   :  { %v2689_v1 = vld [vmem:[#allocation3 + $0xb60] sm:$0xff]  ;;  %5540 = vmatpush2.bf16.msra.mxu1 %v7619_v33 }
 0xa71   :  { %v2813_v27 = vld [vmem:[#allocation3 + $0xf40] sm:$0xff]  ;;  %v7612_v36 = vcombine.high %v2685_v11, %v2689_v1  ;;  %5580 = vmatprep.subr.bf16.mxu0 %v7748_v18  ;;  %v7611_v48 = vcombine.low %v2685_v11, %v2689_v1 }
 0xa72   :  { %v2817_v61 = vld [vmem:[#allocation3 + $0xf60] sm:$0xff]  ;;  %5581 = vmatpush2.bf16.msra.mxu0 %v7747_v35 }
 0xa73   :  { %v7740_v40 = vcombine.high %v2813_v27, %v2817_v61  ;;  %v2677_v43 = vld [vmem:[#allocation3 + $0xb00] sm:$0xff]  ;;  %5541 = vmatprep.subr.bf16.mxu1 %v7612_v36  ;;  %v7739_v49 = vcombine.low %v2813_v27, %v2817_v61  ;;  %v2382_v36 = vld [vmem:[#allocation3 + $0x1c8] sm:$0xff] }
 0xa74   :  { %v2681_v44 = vld [vmem:[#allocation3 + $0xb20] sm:$0xff]  ;;  %5542 = vmatpush2.bf16.msra.mxu1 %v7611_v48 }
 0xa75   :  { %v2805_v47 = vld [vmem:[#allocation3 + $0xf00] sm:$0xff]  ;;  %v7604_v50 = vcombine.high %v2677_v43, %v2681_v44  ;;  %5582 = vmatprep.subr.bf16.mxu0 %v7740_v40  ;;  %v7603_v39 = vcombine.low %v2677_v43, %v2681_v44  ;;  %v2386_v40 = vld [vmem:[#allocation3 + $0x1e8] sm:$0xff] }
 0xa76   :  { %v2809_v29 = vld [vmem:[#allocation3 + $0xf20] sm:$0xff]  ;;  %5583 = vmatpush2.bf16.msra.mxu0 %v7739_v49  ;;  %v2510_v43 = vld [vmem:[#allocation3 + $0x5c8] sm:$0xff]  ;;  %v7310_v48 = vcombine.high %v2382_v36, %v2386_v40 }
 0xa77   :  { %v7732_v51 = vcombine.high %v2805_v47, %v2809_v29  ;;  %v2669_v25 = vld [vmem:[#allocation3 + $0xac0] sm:$0xff]  ;;  %5543 = vmatprep.subr.bf16.mxu1 %v7604_v50  ;;  %v7731_v10 = vcombine.low %v2805_v47, %v2809_v29  ;;  %v2514_v44 = vld [vmem:[#allocation3 + $0x5e8] sm:$0xff] }
 0xa78   :  { %v2673_v53 = vld [vmem:[#allocation3 + $0xae0] sm:$0xff]  ;;  %5544 = vmatpush2.bf16.msra.mxu1 %v7603_v39  ;;  %v7438_v49 = vcombine.high %v2510_v43, %v2514_v44  ;;  %v2374_v50 = vld [vmem:[#allocation3 + $0x188] sm:$0xff]  ;;  %v7309_v39 = vcombine.low %v2382_v36, %v2386_v40 }
 0xa79   :  { %v2797_v22 = vld [vmem:[#allocation3 + $0xec0] sm:$0xff]  ;;  %v7596_v41 = vcombine.high %v2669_v25, %v2673_v53  ;;  %5584 = vmatprep.subr.bf16.mxu0 %v7732_v51  ;;  %v7595_v7 = vcombine.low %v2669_v25, %v2673_v53  ;;  %v2378_v51 = vld [vmem:[#allocation3 + $0x1a8] sm:$0xff]  ;;  %v9995_v25 = vpack.c.bf16 %v2309_v34, %v2309_v34 }
 0xa7a   :  { %v2801_v9 = vld [vmem:[#allocation3 + $0xee0] sm:$0xff]  ;;  %5585 = vmatpush2.bf16.msra.mxu0 %v7731_v10  ;;  %v2502_v53 = vld [vmem:[#allocation3 + $0x588] sm:$0xff]  ;;  %v7437_v10 = vcombine.low %v2510_v43, %v2514_v44  ;;  %v7301_v20 = vcombine.low %v2374_v50, %v2378_v51 }
 0xa7b   :  { %v7724_v30 = vcombine.high %v2797_v22, %v2801_v9  ;;  %v2661_v8 = vld [vmem:[#allocation3 + $0xa80] sm:$0xff]  ;;  %5545 = vmatprep.subr.bf16.mxu1 %v7596_v41  ;;  %v7723_v54 = vcombine.low %v2797_v22, %v2801_v9  ;;  %v2506_v22 = vld [vmem:[#allocation3 + $0x5a8] sm:$0xff]  ;;  %v10000_v9 = vpack.c.bf16 %v2311_v57, %v2311_v57  ;;  %v7302_v41 = vcombine.high %v2374_v50, %v2378_v51 }
 0xa7c   :  { %v2665_v42 = vld [vmem:[#allocation3 + $0xaa0] sm:$0xff]  ;;  %5546 = vmatpush2.bf16.msra.mxu1 %v7595_v7  ;;  %v2494_v34 = vld [vmem:[#allocation3 + $0x548] sm:$0xff]  ;;  %v7429_v57 = vcombine.low %v2502_v53, %v2506_v22 }
 0xa7d   :  { %v2789_v60 = vld [vmem:[#allocation3 + $0xe80] sm:$0xff]  ;;  %v7588_v6 = vcombine.high %v2661_v8, %v2665_v42  ;;  %5586 = vmatprep.subr.bf16.mxu0 %v7724_v30  ;;  %v7587_v12 = vcombine.low %v2661_v8, %v2665_v42  ;;  %v7430_v30 = vcombine.high %v2502_v53, %v2506_v22  ;;  %v2366_v8 = vld [vmem:[#allocation3 + $0x148] sm:$0xff] }
 0xa7e   :  { %v2793_v52 = vld [vmem:[#allocation3 + $0xea0] sm:$0xff]  ;;  %5587 = vmatpush2.bf16.msra.mxu0 %v7723_v54  ;;  %v2498_v42 = vld [vmem:[#allocation3 + $0x568] sm:$0xff] }
 0xa7f   :  { %v7716_v56 = vcombine.high %v2789_v60, %v2793_v52  ;;  %v2653_v13 = vld [vmem:[#allocation3 + $0xa40] sm:$0xff]  ;;  %5547 = vmatprep.subr.bf16.mxu1 %v7588_v6  ;;  %v7715_v55 = vcombine.low %v2789_v60, %v2793_v52  ;;  %v7294_v60 = vcombine.high %v2366_v8, %v2370_v4  ;;  %v7422_v52 = vcombine.high %v2494_v34, %v2498_v42  ;;  %v2358_v7 = vld [vmem:[#allocation3 + $0x108] sm:$0xff] }
 0xa80   :  { %v2657_v3 = vld [vmem:[#allocation3 + $0xa60] sm:$0xff]  ;;  %5548 = vmatpush2.bf16.msra.mxu1 %v7587_v12  ;;  %v2362_v54 = vld [vmem:[#allocation3 + $0x128] sm:$0xff] }
 0xa81   :  { %v2781_v2 = vld [vmem:[#allocation3 + $0xe40] sm:$0xff]  ;;  %v7580_v32 = vcombine.high %v2653_v13, %v2657_v3  ;;  %5588 = vmatprep.subr.bf16.mxu0 %v7716_v56  ;;  %v7579_v27 = vcombine.low %v2653_v13, %v2657_v3  ;;  %v2486_v6 = vld [vmem:[#allocation3 + $0x508] sm:$0xff]  ;;  %v7293_v13 = vcombine.low %v2366_v8, %v2370_v4  ;;  %v7421_v3 = vcombine.low %v2494_v34, %v2498_v42 }
 0xa82   :  { %v2785_v63 = vld [vmem:[#allocation3 + $0xe60] sm:$0xff]  ;;  %5589 = vmatpush2.bf16.msra.mxu0 %v7715_v55  ;;  %v2490_v56 = vld [vmem:[#allocation3 + $0x528] sm:$0xff] }
 0xa83   :  { %v7708_v38 = vcombine.high %v2781_v2, %v2785_v63  ;;  %v2645_v14 = vld [vmem:[#allocation3 + $0xa00] sm:$0xff]  ;;  %5549 = vmatprep.subr.bf16.mxu1 %v7580_v32  ;;  %v7707_v61 = vcombine.low %v2781_v2, %v2785_v63  ;;  %v7286_v2 = vcombine.high %v2358_v7, %v2362_v54  ;;  %v7414_v63 = vcombine.high %v2486_v6, %v2490_v56  ;;  %v2350_v12 = vld [vmem:[#allocation3 + $0xc8] sm:$0xff] }
 0xa84   :  { %v2649_v18 = vld [vmem:[#allocation3 + $0xa20] sm:$0xff]  ;;  %5550 = vmatpush2.bf16.msra.mxu1 %v7579_v27  ;;  %v2354_v55 = vld [vmem:[#allocation3 + $0xe8] sm:$0xff] }
 0xa85   :  { %v2773_v11 = vld [vmem:[#allocation3 + $0xe00] sm:$0xff]  ;;  %v7572_v33 = vcombine.high %v2645_v14, %v2649_v18  ;;  %5590 = vmatprep.subr.bf16.mxu0 %v7708_v38  ;;  %v7571_v47 = vcombine.low %v2645_v14, %v2649_v18  ;;  %v2478_v32 = vld [vmem:[#allocation3 + $0x4c8] sm:$0xff]  ;;  %v7285_v14 = vcombine.low %v2358_v7, %v2362_v54  ;;  %v7413_v18 = vcombine.low %v2486_v6, %v2490_v56 }
 0xa86   :  { %v2777_v1 = vld [vmem:[#allocation3 + $0xe20] sm:$0xff]  ;;  %5591 = vmatpush2.bf16.msra.mxu0 %v7707_v61  ;;  %v2482_v38 = vld [vmem:[#allocation3 + $0x4e8] sm:$0xff]  ;;  %v7277_v36 = vcombine.low %v2350_v12, %v2354_v55 }
 0xa87   :  { %v7700_v35 = vcombine.high %v2773_v11, %v2777_v1  ;;  %5551 = vmatprep.subr.bf16.mxu1 %v7572_v33  ;;  %v7699_v29 = vcombine.low %v2773_v11, %v2777_v1  ;;  %v7278_v11 = vcombine.high %v2350_v12, %v2354_v55  ;;  %v7406_v1 = vcombine.high %v2478_v32, %v2482_v38  ;;  %v2342_v27 = vld [vmem:[#allocation3 + $0x88] sm:$0xff] }
 0xa88   :  { %5552 = vmatpush2.bf16.msra.mxu1 %v7571_v47  ;;  %v2346_v61 = vld [vmem:[#allocation3 + $0xa8] sm:$0xff]  ;;  %v7405_v40 = vcombine.low %v2478_v32, %v2482_v38 }
 0xa89   :  { %5592 = vmatprep.subr.bf16.mxu0 %v7700_v35  ;;  %5603 = vmatprep.subr.bf16.mxu1 %v7310_v48  ;;  %v2470_v33 = vld [vmem:[#allocation3 + $0x488] sm:$0xff]  ;;  %v7270_v43 = vcombine.high %v2342_v27, %v2346_v61  ;;  %v7269_v50 = vcombine.low %v2342_v27, %v2346_v61 }
 0xa8a   :  { %5593 = vmatpush2.bf16.msra.mxu0 %v7699_v29  ;;  %v2474_v35 = vld [vmem:[#allocation3 + $0x4a8] sm:$0xff] }
 0xa8b   :  { %5644 = vmatprep.subr.bf16.mxu0 %v7438_v49  ;;  %5554 = vmatmul.mubr.bf16.vlgmr.msra.gmra.mxu1 %v9995_v25  ;;  %v7398_v44 = vcombine.high %v2470_v33, %v2474_v35  ;;  %v2334_v47 = vld [vmem:[#allocation3 + $0x48] sm:$0xff]  ;;  %v7397_v51 = vcombine.low %v2470_v33, %v2474_v35 }
 0xa8c   :  { %5604 = vmatpush1.bf16.msra.mxu1 %v7309_v39  ;;  %5635 = vmatprep.mubr.bf16.mxu1 %v9962_v26  ;;  %v2338_v29 = vld [vmem:[#allocation3 + $0x68] sm:$0xff] }
 0xa8d   :  { %5595 = vmatmul.mubr.bf16.vlgmr.msra.gmra.mxu0 %v10000_v9  ;;  %5605 = vmatprep.subr.bf16.mxu1 %v7302_v41  ;;  %v2462_v48 = vld [vmem:[#allocation3 + $0x448] sm:$0xff]  ;;  %v7262_v53 = vcombine.high %v2334_v47, %v2338_v29  ;;  %v7261_v8 = vcombine.low %v2334_v47, %v2338_v29 }
 0xa8e   :  { %5645 = vmatpush1.bf16.msra.mxu0 %v7437_v10  ;;  %5676 = vmatprep.mubr.bf16.mxu0 %v9964_v37  ;;  %v2466_v49 = vld [vmem:[#allocation3 + $0x468] sm:$0xff] }
 0xa8f   :  { %5646 = vmatprep.subr.bf16.mxu0 %v7430_v30  ;;  %v7390_v22 = vcombine.high %v2462_v48, %v2466_v49  ;;  %v2326_v39 = vld [vmem:[#allocation3 + $0x8] sm:$0xff]  ;;  %v7389_v4 = vcombine.low %v2462_v48, %v2466_v49 }
 0xa90   :  { %5606 = vmatpush1.bf16.msra.mxu1 %v7301_v20  ;;  %v2330_v10 = vld [vmem:[#allocation3 + $0x28] sm:$0xff] }
 0xa91   :  { %5607 = vmatprep.subr.bf16.mxu1 %v7294_v60  ;;  %v2454_v41 = vld [vmem:[#allocation3 + $0x408] sm:$0xff]  ;;  %v7254_v34 = vcombine.high %v2326_v39, %v2330_v10  ;;  %v7253_v7 = vcombine.low %v2326_v39, %v2330_v10 }
 0xa92   :  { %5647 = vmatpush1.bf16.msra.mxu0 %v7429_v57  ;;  %v2458_v30 = vld [vmem:[#allocation3 + $0x428] sm:$0xff] }
 0xa93   :  { %5648 = vmatprep.subr.bf16.mxu0 %v7422_v52  ;;  %v7382_v42 = vcombine.high %v2454_v41, %v2458_v30  ;;  %v2446_v20 = vld [vmem:[#allocation3 + $0x3c8] sm:$0xff]  ;;  %v7381_v54 = vcombine.low %v2454_v41, %v2458_v30 }
 0xa94   :  { %5608 = vmatpush1.bf16.msra.mxu1 %v7293_v13  ;;  %v2450_v57 = vld [vmem:[#allocation3 + $0x3e8] sm:$0xff] }
 0xa95   :  { %5609 = vmatprep.subr.bf16.mxu1 %v7286_v2  ;;  %v2574_v60 = vld [vmem:[#allocation3 + $0x7c8] sm:$0xff]  ;;  %v7374_v6 = vcombine.high %v2446_v20, %v2450_v57  ;;  %v7373_v12 = vcombine.low %v2446_v20, %v2450_v57 }
 0xa96   :  { %5649 = vmatpush1.bf16.msra.mxu0 %v7421_v3  ;;  %v2578_v52 = vld [vmem:[#allocation3 + $0x7e8] sm:$0xff] }
 0xa97   :  { %5650 = vmatprep.subr.bf16.mxu0 %v7414_v63  ;;  %v7502_v56 = vcombine.high %v2574_v60, %v2578_v52  ;;  %v2438_v13 = vld [vmem:[#allocation3 + $0x388] sm:$0xff]  ;;  %v7501_v55 = vcombine.low %v2574_v60, %v2578_v52 }
 0xa98   :  { %5610 = vmatpush1.bf16.msra.mxu1 %v7285_v14  ;;  %v2442_v3 = vld [vmem:[#allocation3 + $0x3a8] sm:$0xff] }
 0xa99   :  { %5611 = vmatprep.subr.bf16.mxu1 %v7278_v11  ;;  %v2566_v2 = vld [vmem:[#allocation3 + $0x788] sm:$0xff]  ;;  %v7366_v32 = vcombine.high %v2438_v13, %v2442_v3  ;;  %v7365_v27 = vcombine.low %v2438_v13, %v2442_v3 }
 0xa9a   :  { %5651 = vmatpush1.bf16.msra.mxu0 %v7413_v18  ;;  %v2570_v63 = vld [vmem:[#allocation3 + $0x7a8] sm:$0xff] }
 0xa9b   :  { %5652 = vmatprep.subr.bf16.mxu0 %v7406_v1  ;;  %v7494_v38 = vcombine.high %v2566_v2, %v2570_v63  ;;  %v2430_v14 = vld [vmem:[#allocation3 + $0x348] sm:$0xff]  ;;  %v7493_v61 = vcombine.low %v2566_v2, %v2570_v63 }
 0xa9c   :  { %5612 = vmatpush1.bf16.msra.mxu1 %v7277_v36  ;;  %v2434_v18 = vld [vmem:[#allocation3 + $0x368] sm:$0xff] }
 0xa9d   :  { %5613 = vmatprep.subr.bf16.mxu1 %v7270_v43  ;;  %v2558_v11 = vld [vmem:[#allocation3 + $0x748] sm:$0xff]  ;;  %v7358_v33 = vcombine.high %v2430_v14, %v2434_v18  ;;  %v7357_v47 = vcombine.low %v2430_v14, %v2434_v18 }
 0xa9e   :  { %5653 = vmatpush1.bf16.msra.mxu0 %v7405_v40  ;;  %v2562_v1 = vld [vmem:[#allocation3 + $0x768] sm:$0xff] }
 0xa9f   :  { %5654 = vmatprep.subr.bf16.mxu0 %v7398_v44  ;;  %v7486_v35 = vcombine.high %v2558_v11, %v2562_v1  ;;  %v2422_v36 = vld [vmem:[#allocation3 + $0x308] sm:$0xff]  ;;  %v7485_v29 = vcombine.low %v2558_v11, %v2562_v1 }
 0xaa0   :  { %5614 = vmatpush1.bf16.msra.mxu1 %v7269_v50  ;;  %v2426_v40 = vld [vmem:[#allocation3 + $0x328] sm:$0xff] }
 0xaa1   :  { %5615 = vmatprep.subr.bf16.mxu1 %v7262_v53  ;;  %v2550_v43 = vld [vmem:[#allocation3 + $0x708] sm:$0xff]  ;;  %v7350_v48 = vcombine.high %v2422_v36, %v2426_v40  ;;  %v7349_v39 = vcombine.low %v2422_v36, %v2426_v40 }
 0xaa2   :  { %5655 = vmatpush1.bf16.msra.mxu0 %v7397_v51  ;;  %v2554_v44 = vld [vmem:[#allocation3 + $0x728] sm:$0xff] }
 0xaa3   :  { %5656 = vmatprep.subr.bf16.mxu0 %v7390_v22  ;;  %v7478_v49 = vcombine.high %v2550_v43, %v2554_v44  ;;  %v2414_v50 = vld [vmem:[#allocation3 + $0x2c8] sm:$0xff]  ;;  %v7477_v10 = vcombine.low %v2550_v43, %v2554_v44 }
 0xaa4   :  { %5616 = vmatpush1.bf16.msra.mxu1 %v7261_v8  ;;  %v2418_v51 = vld [vmem:[#allocation3 + $0x2e8] sm:$0xff] }
 0xaa5   :  { %5617 = vmatprep.subr.bf16.mxu1 %v7254_v34  ;;  %v2542_v53 = vld [vmem:[#allocation3 + $0x6c8] sm:$0xff]  ;;  %v7342_v41 = vcombine.high %v2414_v50, %v2418_v51  ;;  %v7341_v20 = vcombine.low %v2414_v50, %v2418_v51 }
 0xaa6   :  { %5657 = vmatpush1.bf16.msra.mxu0 %v7389_v4  ;;  %v2546_v22 = vld [vmem:[#allocation3 + $0x6e8] sm:$0xff] }
 0xaa7   :  { %5658 = vmatprep.subr.bf16.mxu0 %v7382_v42  ;;  %v7470_v30 = vcombine.high %v2542_v53, %v2546_v22  ;;  %v2406_v8 = vld [vmem:[#allocation3 + $0x288] sm:$0xff]  ;;  %v7469_v57 = vcombine.low %v2542_v53, %v2546_v22 }
 0xaa8   :  { %5618 = vmatpush1.bf16.msra.mxu1 %v7253_v7  ;;  %v2410_v4 = vld [vmem:[#allocation3 + $0x2a8] sm:$0xff] }
 0xaa9   :  { %5619 = vmatprep.subr.bf16.mxu1 %v7374_v6  ;;  %v2534_v34 = vld [vmem:[#allocation3 + $0x688] sm:$0xff]  ;;  %v7334_v60 = vcombine.high %v2406_v8, %v2410_v4  ;;  %v7333_v13 = vcombine.low %v2406_v8, %v2410_v4 }
 0xaaa   :  { %5659 = vmatpush1.bf16.msra.mxu0 %v7381_v54  ;;  %v2538_v42 = vld [vmem:[#allocation3 + $0x6a8] sm:$0xff] }
 0xaab   :  { %5660 = vmatprep.subr.bf16.mxu0 %v7502_v56  ;;  %v7462_v52 = vcombine.high %v2534_v34, %v2538_v42  ;;  %v2398_v7 = vld [vmem:[#allocation3 + $0x248] sm:$0xff]  ;;  %v7461_v3 = vcombine.low %v2534_v34, %v2538_v42 }
 0xaac   :  { %5620 = vmatpush2.bf16.msra.mxu1 %v7373_v12  ;;  %v2402_v54 = vld [vmem:[#allocation3 + $0x268] sm:$0xff] }
 0xaad   :  { %5621 = vmatprep.subr.bf16.mxu1 %v7366_v32  ;;  %v2526_v6 = vld [vmem:[#allocation3 + $0x648] sm:$0xff]  ;;  %v7326_v2 = vcombine.high %v2398_v7, %v2402_v54  ;;  %v7325_v14 = vcombine.low %v2398_v7, %v2402_v54 }
 0xaae   :  { %5661 = vmatpush2.bf16.msra.mxu0 %v7501_v55  ;;  %v2530_v56 = vld [vmem:[#allocation3 + $0x668] sm:$0xff] }
 0xaaf   :  { %5662 = vmatprep.subr.bf16.mxu0 %v7494_v38  ;;  %v7454_v63 = vcombine.high %v2526_v6, %v2530_v56  ;;  %v2390_v12 = vld [vmem:[#allocation3 + $0x208] sm:$0xff]  ;;  %v7453_v18 = vcombine.low %v2526_v6, %v2530_v56 }
 0xab0   :  { %5622 = vmatpush2.bf16.msra.mxu1 %v7365_v27  ;;  %v2394_v55 = vld [vmem:[#allocation3 + $0x228] sm:$0xff] }
 0xab1   :  { %5623 = vmatprep.subr.bf16.mxu1 %v7358_v33  ;;  %v2518_v32 = vld [vmem:[#allocation3 + $0x608] sm:$0xff]  ;;  %v7318_v11 = vcombine.high %v2390_v12, %v2394_v55  ;;  %v7317_v36 = vcombine.low %v2390_v12, %v2394_v55 }
 0xab2   :  { %5663 = vmatpush2.bf16.msra.mxu0 %v7493_v61  ;;  %v2522_v38 = vld [vmem:[#allocation3 + $0x628] sm:$0xff] }
 0xab3   :  { %5664 = vmatprep.subr.bf16.mxu0 %v7486_v35  ;;  %v7446_v1 = vcombine.high %v2518_v32, %v2522_v38  ;;  %v2638_v27 = vld [vmem:[#allocation3 + $0x9c8] sm:$0xff]  ;;  %v7445_v40 = vcombine.low %v2518_v32, %v2522_v38 }
 0xab4   :  { %5624 = vmatpush2.bf16.msra.mxu1 %v7357_v47  ;;  %v2642_v61 = vld [vmem:[#allocation3 + $0x9e8] sm:$0xff] }
 0xab5   :  { %5625 = vmatprep.subr.bf16.mxu1 %v7350_v48  ;;  %v2766_v33 = vld [vmem:[#allocation3 + $0xdc8] sm:$0xff]  ;;  %v7566_v43 = vcombine.high %v2638_v27, %v2642_v61  ;;  %v7565_v50 = vcombine.low %v2638_v27, %v2642_v61 }
 0xab6   :  { %5665 = vmatpush2.bf16.msra.mxu0 %v7485_v29  ;;  %v2770_v35 = vld [vmem:[#allocation3 + $0xde8] sm:$0xff] }
 0xab7   :  { %5666 = vmatprep.subr.bf16.mxu0 %v7478_v49  ;;  %v7694_v44 = vcombine.high %v2766_v33, %v2770_v35  ;;  %v2630_v47 = vld [vmem:[#allocation3 + $0x988] sm:$0xff]  ;;  %v7693_v51 = vcombine.low %v2766_v33, %v2770_v35 }
 0xab8   :  { %5626 = vmatpush2.bf16.msra.mxu1 %v7349_v39  ;;  %v2634_v29 = vld [vmem:[#allocation3 + $0x9a8] sm:$0xff] }
 0xab9   :  { %5627 = vmatprep.subr.bf16.mxu1 %v7342_v41  ;;  %v2758_v48 = vld [vmem:[#allocation3 + $0xd88] sm:$0xff]  ;;  %v7558_v53 = vcombine.high %v2630_v47, %v2634_v29  ;;  %v7557_v8 = vcombine.low %v2630_v47, %v2634_v29 }
 0xaba   :  { %5667 = vmatpush2.bf16.msra.mxu0 %v7477_v10  ;;  %v2762_v49 = vld [vmem:[#allocation3 + $0xda8] sm:$0xff] }
 0xabb   :  { %5668 = vmatprep.subr.bf16.mxu0 %v7470_v30  ;;  %v7686_v22 = vcombine.high %v2758_v48, %v2762_v49  ;;  %v2622_v39 = vld [vmem:[#allocation3 + $0x948] sm:$0xff]  ;;  %v7685_v4 = vcombine.low %v2758_v48, %v2762_v49 }
 0xabc   :  { %5628 = vmatpush2.bf16.msra.mxu1 %v7341_v20  ;;  %v2626_v10 = vld [vmem:[#allocation3 + $0x968] sm:$0xff] }
 0xabd   :  { %5629 = vmatprep.subr.bf16.mxu1 %v7334_v60  ;;  %v2750_v41 = vld [vmem:[#allocation3 + $0xd48] sm:$0xff]  ;;  %v7550_v34 = vcombine.high %v2622_v39, %v2626_v10  ;;  %v7549_v7 = vcombine.low %v2622_v39, %v2626_v10 }
 0xabe   :  { %5669 = vmatpush2.bf16.msra.mxu0 %v7469_v57  ;;  %v2754_v30 = vld [vmem:[#allocation3 + $0xd68] sm:$0xff] }
 0xabf   :  { %5670 = vmatprep.subr.bf16.mxu0 %v7462_v52  ;;  %v7678_v42 = vcombine.high %v2750_v41, %v2754_v30  ;;  %v2614_v20 = vld [vmem:[#allocation3 + $0x908] sm:$0xff]  ;;  %v7677_v54 = vcombine.low %v2750_v41, %v2754_v30 }
 0xac0   :  { %5630 = vmatpush2.bf16.msra.mxu1 %v7333_v13  ;;  %v2618_v57 = vld [vmem:[#allocation3 + $0x928] sm:$0xff] }
 0xac1   :  { %5631 = vmatprep.subr.bf16.mxu1 %v7326_v2  ;;  %v2742_v60 = vld [vmem:[#allocation3 + $0xd08] sm:$0xff]  ;;  %v7542_v6 = vcombine.high %v2614_v20, %v2618_v57  ;;  %v7541_v12 = vcombine.low %v2614_v20, %v2618_v57 }
 0xac2   :  { %5671 = vmatpush2.bf16.msra.mxu0 %v7461_v3  ;;  %v2746_v52 = vld [vmem:[#allocation3 + $0xd28] sm:$0xff] }
 0xac3   :  { %5672 = vmatprep.subr.bf16.mxu0 %v7454_v63  ;;  %v7670_v56 = vcombine.high %v2742_v60, %v2746_v52  ;;  %v2606_v13 = vld [vmem:[#allocation3 + $0x8c8] sm:$0xff]  ;;  %v7669_v55 = vcombine.low %v2742_v60, %v2746_v52 }
 0xac4   :  { %5632 = vmatpush2.bf16.msra.mxu1 %v7325_v14  ;;  %v2610_v3 = vld [vmem:[#allocation3 + $0x8e8] sm:$0xff] }
 0xac5   :  { %5633 = vmatprep.subr.bf16.mxu1 %v7318_v11  ;;  %v2734_v2 = vld [vmem:[#allocation3 + $0xcc8] sm:$0xff]  ;;  %v7534_v32 = vcombine.high %v2606_v13, %v2610_v3  ;;  %v7533_v27 = vcombine.low %v2606_v13, %v2610_v3 }
 0xac6   :  { %5673 = vmatpush2.bf16.msra.mxu0 %v7453_v18  ;;  %v2738_v63 = vld [vmem:[#allocation3 + $0xce8] sm:$0xff] }
 0xac7   :  { %5674 = vmatprep.subr.bf16.mxu0 %v7446_v1  ;;  %v7662_v38 = vcombine.high %v2734_v2, %v2738_v63  ;;  %v2598_v14 = vld [vmem:[#allocation3 + $0x888] sm:$0xff]  ;;  %v7661_v61 = vcombine.low %v2734_v2, %v2738_v63 }
 0xac8   :  { %5634 = vmatpush2.bf16.msra.mxu1 %v7317_v36  ;;  %v2602_v18 = vld [vmem:[#allocation3 + $0x8a8] sm:$0xff] }
 0xac9   :  { %5685 = vmatprep.subr.bf16.mxu1 %v7566_v43  ;;  %v2726_v11 = vld [vmem:[#allocation3 + $0xc88] sm:$0xff]  ;;  %v7526_v33 = vcombine.high %v2598_v14, %v2602_v18  ;;  %v7525_v47 = vcombine.low %v2598_v14, %v2602_v18 }
 0xaca   :  { %5675 = vmatpush2.bf16.msra.mxu0 %v7445_v40  ;;  %v2730_v1 = vld [vmem:[#allocation3 + $0xca8] sm:$0xff] }
 0xacb   :  { %5726 = vmatprep.subr.bf16.mxu0 %v7694_v44  ;;  %5636 = vmatmul.mubr.bf16.vlgmr.msra.gmra.mxu1 %v9971_v58  ;;  %v7654_v35 = vcombine.high %v2726_v11, %v2730_v1  ;;  %v2590_v36 = vld [vmem:[#allocation3 + $0x848] sm:$0xff]  ;;  %v7653_v29 = vcombine.low %v2726_v11, %v2730_v1 }
 0xacc   :  { %5686 = vmatpush1.bf16.msra.mxu1 %v7565_v50  ;;  %5717 = vmatprep.mubr.bf16.mxu1 %v9981_v45  ;;  %v2594_v40 = vld [vmem:[#allocation3 + $0x868] sm:$0xff] }
 0xacd   :  { %5677 = vmatmul.mubr.bf16.vlgmr.msra.gmra.mxu0 %v9976_v15  ;;  %5687 = vmatprep.subr.bf16.mxu1 %v7558_v53  ;;  %v2718_v43 = vld [vmem:[#allocation3 + $0xc48] sm:$0xff]  ;;  %v7518_v48 = vcombine.high %v2590_v36, %v2594_v40  ;;  %v7517_v39 = vcombine.low %v2590_v36, %v2594_v40 }
 0xace   :  { %5727 = vmatpush1.bf16.msra.mxu0 %v7693_v51  ;;  %5758 = vmatprep.mubr.bf16.mxu0 %v9987_v46  ;;  %v2722_v44 = vld [vmem:[#allocation3 + $0xc68] sm:$0xff] }
 0xacf   :  { %5728 = vmatprep.subr.bf16.mxu0 %v7686_v22  ;;  %v7646_v49 = vcombine.high %v2718_v43, %v2722_v44  ;;  %v2582_v50 = vld [vmem:[#allocation3 + $0x808] sm:$0xff]  ;;  %v7645_v10 = vcombine.low %v2718_v43, %v2722_v44 }
 0xad0   :  { %5688 = vmatpush1.bf16.msra.mxu1 %v7557_v8  ;;  %v2586_v51 = vld [vmem:[#allocation3 + $0x828] sm:$0xff] }
 0xad1   :  { %5689 = vmatprep.subr.bf16.mxu1 %v7550_v34  ;;  %v2710_v53 = vld [vmem:[#allocation3 + $0xc08] sm:$0xff]  ;;  %v7510_v41 = vcombine.high %v2582_v50, %v2586_v51  ;;  %v7509_v20 = vcombine.low %v2582_v50, %v2586_v51 }
 0xad2   :  { %5729 = vmatpush1.bf16.msra.mxu0 %v7685_v4  ;;  %v2714_v22 = vld [vmem:[#allocation3 + $0xc28] sm:$0xff] }
 0xad3   :  { %5730 = vmatprep.subr.bf16.mxu0 %v7678_v42  ;;  %v7638_v30 = vcombine.high %v2710_v53, %v2714_v22  ;;  %v2702_v8 = vld [vmem:[#allocation3 + $0xbc8] sm:$0xff]  ;;  %v7637_v57 = vcombine.low %v2710_v53, %v2714_v22 }
 0xad4   :  { %5690 = vmatpush1.bf16.msra.mxu1 %v7549_v7  ;;  %v2706_v4 = vld [vmem:[#allocation3 + $0xbe8] sm:$0xff] }
 0xad5   :  { %5691 = vmatprep.subr.bf16.mxu1 %v7542_v6  ;;  %v2830_v34 = vld [vmem:[#allocation3 + $0xfc8] sm:$0xff]  ;;  %v7630_v60 = vcombine.high %v2702_v8, %v2706_v4  ;;  %v7629_v13 = vcombine.low %v2702_v8, %v2706_v4 }
 0xad6   :  { %5731 = vmatpush1.bf16.msra.mxu0 %v7677_v54  ;;  %v2834_v42 = vld [vmem:[#allocation3 + $0xfe8] sm:$0xff] }
 0xad7   :  { %5732 = vmatprep.subr.bf16.mxu0 %v7670_v56  ;;  %v7758_v52 = vcombine.high %v2830_v34, %v2834_v42  ;;  %v2694_v7 = vld [vmem:[#allocation3 + $0xb88] sm:$0xff]  ;;  %v7757_v3 = vcombine.low %v2830_v34, %v2834_v42 }
 0xad8   :  { %5692 = vmatpush1.bf16.msra.mxu1 %v7541_v12  ;;  %v2698_v54 = vld [vmem:[#allocation3 + $0xba8] sm:$0xff] }
 0xad9   :  { %5693 = vmatprep.subr.bf16.mxu1 %v7534_v32  ;;  %v2822_v6 = vld [vmem:[#allocation3 + $0xf88] sm:$0xff]  ;;  %v7622_v2 = vcombine.high %v2694_v7, %v2698_v54  ;;  %v7621_v14 = vcombine.low %v2694_v7, %v2698_v54 }
 0xada   :  { %5733 = vmatpush1.bf16.msra.mxu0 %v7669_v55  ;;  %v2826_v56 = vld [vmem:[#allocation3 + $0xfa8] sm:$0xff] }
 0xadb   :  { %5734 = vmatprep.subr.bf16.mxu0 %v7662_v38  ;;  %v7750_v63 = vcombine.high %v2822_v6, %v2826_v56  ;;  %v2686_v12 = vld [vmem:[#allocation3 + $0xb48] sm:$0xff]  ;;  %v7749_v18 = vcombine.low %v2822_v6, %v2826_v56 }
 0xadc   :  { %5694 = vmatpush1.bf16.msra.mxu1 %v7533_v27  ;;  %v2690_v55 = vld [vmem:[#allocation3 + $0xb68] sm:$0xff] }
 0xadd   :  { %5695 = vmatprep.subr.bf16.mxu1 %v7526_v33  ;;  %v2814_v32 = vld [vmem:[#allocation3 + $0xf48] sm:$0xff]  ;;  %v7614_v11 = vcombine.high %v2686_v12, %v2690_v55  ;;  %v7613_v36 = vcombine.low %v2686_v12, %v2690_v55 }
 0xade   :  { %5735 = vmatpush1.bf16.msra.mxu0 %v7661_v61  ;;  %v2818_v38 = vld [vmem:[#allocation3 + $0xf68] sm:$0xff] }
 0xadf   :  { %5736 = vmatprep.subr.bf16.mxu0 %v7654_v35  ;;  %v7742_v1 = vcombine.high %v2814_v32, %v2818_v38  ;;  %v2678_v27 = vld [vmem:[#allocation3 + $0xb08] sm:$0xff]  ;;  %v7741_v40 = vcombine.low %v2814_v32, %v2818_v38 }
 0xae0   :  { %5696 = vmatpush1.bf16.msra.mxu1 %v7525_v47  ;;  %v2682_v61 = vld [vmem:[#allocation3 + $0xb28] sm:$0xff] }
 0xae1   :  { %5697 = vmatprep.subr.bf16.mxu1 %v7518_v48  ;;  %v2806_v33 = vld [vmem:[#allocation3 + $0xf08] sm:$0xff]  ;;  %v7606_v43 = vcombine.high %v2678_v27, %v2682_v61  ;;  %v7605_v50 = vcombine.low %v2678_v27, %v2682_v61 }
 0xae2   :  { %5737 = vmatpush1.bf16.msra.mxu0 %v7653_v29  ;;  %v2810_v35 = vld [vmem:[#allocation3 + $0xf28] sm:$0xff] }
 0xae3   :  { %5738 = vmatprep.subr.bf16.mxu0 %v7646_v49  ;;  %v7734_v44 = vcombine.high %v2806_v33, %v2810_v35  ;;  %v2670_v47 = vld [vmem:[#allocation3 + $0xac8] sm:$0xff]  ;;  %v7733_v51 = vcombine.low %v2806_v33, %v2810_v35 }
 0xae4   :  { %5698 = vmatpush1.bf16.msra.mxu1 %v7517_v39  ;;  %v2674_v29 = vld [vmem:[#allocation3 + $0xae8] sm:$0xff] }
 0xae5   :  { %5699 = vmatprep.subr.bf16.mxu1 %v7510_v41  ;;  %v2798_v48 = vld [vmem:[#allocation3 + $0xec8] sm:$0xff]  ;;  %v7598_v53 = vcombine.high %v2670_v47, %v2674_v29  ;;  %v7597_v8 = vcombine.low %v2670_v47, %v2674_v29  ;;  %v2507_v47 = vld [vmem:[#allocation3 + $0x5b0] sm:$0xff] }
 0xae6   :  { %5739 = vmatpush1.bf16.msra.mxu0 %v7645_v10  ;;  %v2802_v49 = vld [vmem:[#allocation3 + $0xee8] sm:$0xff] }
 0xae7   :  { %5740 = vmatprep.subr.bf16.mxu0 %v7638_v30  ;;  %v7726_v22 = vcombine.high %v2798_v48, %v2802_v49  ;;  %v2662_v39 = vld [vmem:[#allocation3 + $0xa88] sm:$0xff]  ;;  %v7725_v4 = vcombine.low %v2798_v48, %v2802_v49 }
 0xae8   :  { %5700 = vmatpush1.bf16.msra.mxu1 %v7509_v20  ;;  %v2666_v10 = vld [vmem:[#allocation3 + $0xaa8] sm:$0xff] }
 0xae9   :  { %5701 = vmatprep.subr.bf16.mxu1 %v7630_v60  ;;  %v2790_v41 = vld [vmem:[#allocation3 + $0xe88] sm:$0xff]  ;;  %v7590_v34 = vcombine.high %v2662_v39, %v2666_v10  ;;  %v7589_v7 = vcombine.low %v2662_v39, %v2666_v10  ;;  %v2371_v39 = vld [vmem:[#allocation3 + $0x170] sm:$0xff] }
 0xaea   :  { %5741 = vmatpush1.bf16.msra.mxu0 %v7637_v57  ;;  %v2794_v30 = vld [vmem:[#allocation3 + $0xea8] sm:$0xff] }
 0xaeb   :  { %5742 = vmatprep.subr.bf16.mxu0 %v7758_v52  ;;  %v7718_v42 = vcombine.high %v2790_v41, %v2794_v30  ;;  %v2654_v20 = vld [vmem:[#allocation3 + $0xa48] sm:$0xff]  ;;  %v7717_v54 = vcombine.low %v2790_v41, %v2794_v30  ;;  %v2495_v41 = vld [vmem:[#allocation3 + $0x550] sm:$0xff] }
 0xaec   :  { %5702 = vmatpush2.bf16.msra.mxu1 %v7629_v13  ;;  %v2658_v57 = vld [vmem:[#allocation3 + $0xa68] sm:$0xff]  ;;  %v2499_v30 = vld [vmem:[#allocation3 + $0x570] sm:$0xff] }
 0xaed   :  { %5703 = vmatprep.subr.bf16.mxu1 %v7622_v2  ;;  %v2782_v60 = vld [vmem:[#allocation3 + $0xe48] sm:$0xff]  ;;  %v7582_v6 = vcombine.high %v2654_v20, %v2658_v57  ;;  %v7581_v12 = vcombine.low %v2654_v20, %v2658_v57 }
 0xaee   :  { %5743 = vmatpush2.bf16.msra.mxu0 %v7757_v3  ;;  %v2786_v52 = vld [vmem:[#allocation3 + $0xe68] sm:$0xff] }
 0xaef   :  { %5744 = vmatprep.subr.bf16.mxu0 %v7750_v63  ;;  %v7710_v56 = vcombine.high %v2782_v60, %v2786_v52  ;;  %v2646_v13 = vld [vmem:[#allocation3 + $0xa08] sm:$0xff]  ;;  %v7709_v55 = vcombine.low %v2782_v60, %v2786_v52  ;;  %v7424_v52 = vcombine.high %v2495_v41, %v2499_v30 }
 0xaf0   :  { %5704 = vmatpush2.bf16.msra.mxu1 %v7621_v14  ;;  %v2650_v3 = vld [vmem:[#allocation3 + $0xa28] sm:$0xff]  ;;  %v2383_v14 = vld [vmem:[#allocation3 + $0x1d0] sm:$0xff] }
 0xaf1   :  { %5705 = vmatprep.subr.bf16.mxu1 %v7614_v11  ;;  %v2774_v2 = vld [vmem:[#allocation3 + $0xe08] sm:$0xff]  ;;  %v7574_v32 = vcombine.high %v2646_v13, %v2650_v3  ;;  %v2511_v11 = vld [vmem:[#allocation3 + $0x5d0] sm:$0xff]  ;;  %v7573_v27 = vcombine.low %v2646_v13, %v2650_v3 }
 0xaf2   :  { %5745 = vmatpush2.bf16.msra.mxu0 %v7749_v18  ;;  %v2778_v63 = vld [vmem:[#allocation3 + $0xe28] sm:$0xff]  ;;  %v2387_v18 = vld [vmem:[#allocation3 + $0x1f0] sm:$0xff] }
 0xaf3   :  { %5746 = vmatprep.subr.bf16.mxu0 %v7742_v1  ;;  %v7702_v38 = vcombine.high %v2774_v2, %v2778_v63  ;;  %v2515_v1 = vld [vmem:[#allocation3 + $0x5f0] sm:$0xff]  ;;  %v7701_v61 = vcombine.low %v2774_v2, %v2778_v63  ;;  %v10010_v33 = vld [vmem:[#allocation20] sm:$0xff]  ;;  %v7312_v35 = vcombine.high %v2383_v14, %v2387_v18  ;;  %v7311_v48 = vcombine.low %v2383_v14, %v2387_v18 }
 0xaf4   :  { %5706 = vmatpush2.bf16.msra.mxu1 %v7613_v36  ;;  %v7440_v36 = vcombine.high %v2511_v11, %v2515_v1  ;;  %v2842_v29 = vrot.slane %v10010_v33, %v10245_v28  ;;  %v7439_v49 = vcombine.low %v2511_v11, %v2515_v1  ;;  %v2491_v13 = vld [vmem:[#allocation3 + $0x530] sm:$0xff] }
 0xaf5   :  { %5707 = vmatprep.subr.bf16.mxu1 %v7606_v43  ;;  %v2379_v43 = vld [vmem:[#allocation3 + $0x1b0] sm:$0xff] }
 0xaf6   :  { %5747 = vmatpush2.bf16.msra.mxu0 %v7741_v40  ;;  %v2375_v40 = vld [vmem:[#allocation3 + $0x190] sm:$0xff] }
 0xaf7   :  { %5748 = vmatprep.subr.bf16.mxu0 %v7734_v44  ;;  %v2503_v44 = vld [vmem:[#allocation3 + $0x590] sm:$0xff]  ;;  %v7303_v28 = vcombine.low %v2375_v40, %v2379_v43 }
 0xaf8   :  { %5708 = vmatpush2.bf16.msra.mxu1 %v7605_v50  ;;  %v7304_v50 = vcombine.high %v2375_v40, %v2379_v43  ;;  %v2351_v18 = vld [vmem:[#allocation3 + $0xd0] sm:$0xff] }
 0xaf9   :  { %5709 = vmatprep.subr.bf16.mxu1 %v7598_v53  ;;  %v7432_v53 = vcombine.high %v2503_v44, %v2507_v47  ;;  %v2355_v11 = vld [vmem:[#allocation3 + $0xf0] sm:$0xff] }
 0xafa   :  { %5749 = vmatpush2.bf16.msra.mxu0 %v7733_v51  ;;  %v2846_v51 = vrot.slane %v10010_v33, %v10246_v31  ;;  %v2479_v1 = vld [vmem:[#allocation3 + $0x4d0] sm:$0xff] }
 0xafb   :  { %5750 = vmatprep.subr.bf16.mxu0 %v7726_v22  ;;  %v2367_v22 = vld [vmem:[#allocation3 + $0x150] sm:$0xff] }
 0xafc   :  { %5710 = vmatpush2.bf16.msra.mxu1 %v7597_v8  ;;  %v7296_v20 = vcombine.high %v2367_v22, %v2371_v39  ;;  %v7295_v63 = vcombine.low %v2367_v22, %v2371_v39  ;;  %v2343_v43 = vld [vmem:[#allocation3 + $0x90] sm:$0xff] }
 0xafd   :  { %5711 = vmatprep.subr.bf16.mxu1 %v7590_v34  ;;  %v2339_v22 = vld [vmem:[#allocation3 + $0x70] sm:$0xff] }
 0xafe   :  { %5751 = vmatpush2.bf16.msra.mxu0 %v7725_v4  ;;  %v2463_v39 = vld [vmem:[#allocation3 + $0x450] sm:$0xff] }
 0xaff   :  { %5752 = vmatprep.subr.bf16.mxu0 %v7718_v42  ;;  %v7431_v42 = vcombine.low %v2503_v44, %v2507_v47  ;;  %v2347_v44 = vld [vmem:[#allocation3 + $0xb0] sm:$0xff] }
 0xb00   :  { %5712 = vmatpush2.bf16.msra.mxu1 %v7589_v7  ;;  %v2359_v7 = vld [vmem:[#allocation3 + $0x110] sm:$0xff] }
 0xb01   :  { %5713 = vmatprep.subr.bf16.mxu1 %v7582_v6  ;;  %v2471_v47 = vld [vmem:[#allocation3 + $0x490] sm:$0xff] }
 0xb02   :  { %5753 = vmatpush2.bf16.msra.mxu0 %v7717_v54  ;;  %v2363_v54 = vld [vmem:[#allocation3 + $0x130] sm:$0xff] }
 0xb03   :  { %5754 = vmatprep.subr.bf16.mxu0 %v7710_v56  ;;  %v2487_v56 = vld [vmem:[#allocation3 + $0x510] sm:$0xff] }
 0xb04   :  { %5714 = vmatpush2.bf16.msra.mxu1 %v7581_v12  ;;  %v7416_v14 = vcombine.high %v2487_v56, %v2491_v13 }
 0xb05   :  { %5715 = vmatprep.subr.bf16.mxu1 %v7574_v32  ;;  %v7288_v32 = vcombine.high %v2359_v7, %v2363_v54 }
 0xb06   :  { %5755 = vmatpush2.bf16.msra.mxu0 %v7709_v55  ;;  %v7423_v55 = vcombine.low %v2495_v41, %v2499_v30  ;;  %v7271_v41 = vcombine.low %v2343_v43, %v2347_v44 }
 0xb07   :  { %5756 = vmatprep.subr.bf16.mxu0 %v7702_v38 }
 0xb08   :  { %5716 = vmatpush2.bf16.msra.mxu1 %v7573_v27  ;;  %v2483_v27 = vld [vmem:[#allocation3 + $0x4f0] sm:$0xff] }
 0xb09   :  { %5767 = vmatprep.subr.bf16.mxu1 %v7312_v35  ;;  %v7415_v35 = vcombine.low %v2487_v56, %v2491_v13  ;;  %v7408_v40 = vcombine.high %v2479_v1, %v2483_v27  ;;  %v2575_v56 = vld [vmem:[#allocation3 + $0x7d0] sm:$0xff] }
 0xb0a   :  { %5757 = vmatpush2.bf16.msra.mxu0 %v7701_v61  ;;  %v7287_v61 = vcombine.low %v2359_v7, %v2363_v54  ;;  %v2447_v54 = vld [vmem:[#allocation3 + $0x3d0] sm:$0xff] }
 0xb0b   :  { %5808 = vmatprep.subr.bf16.mxu0 %v7440_v36  ;;  %v5473_v10 = vpop.f32.mrf.mxu1  ;;  %5718 = vmatmul.mubr.bf16.vlgmr.msra.gmra.mxu1 %v9995_v25  ;;  %v7280_v36 = vcombine.high %v2351_v18, %v2355_v11  ;;  %v2579_v13 = vld [vmem:[#allocation3 + $0x7f0] sm:$0xff] }
 0xb0c   :  { %v5474_v8 = vadd.f32 %v5473_v10, %v2842_v29  ;;  %5768 = vmatpush1.bf16.msra.mxu1 %v7311_v48  ;;  %5799 = vmatprep.mubr.bf16.mxu1 %v9962_v26  ;;  %v2475_v29 = vld [vmem:[#allocation3 + $0x4b0] sm:$0xff]  ;;  %v7279_v48 = vcombine.low %v2351_v18, %v2355_v11 }
 0xb0d   :  { %v5514_v4 = vpop.f32.mrf.mxu0  ;;  %5759 = vmatmul.mubr.bf16.vlgmr.msra.gmra.mxu0 %v10000_v9  ;;  %v5475_v34 = vpop.f32.mrf.mxu1  ;;  %5769 = vmatprep.subr.bf16.mxu1 %v7304_v50  ;;  %v7272_v50 = vcombine.high %v2343_v43, %v2347_v44  ;;  %v2467_v10 = vld [vmem:[#allocation3 + $0x470] sm:$0xff]  ;;  %v7399_v30 = vcombine.low %v2471_v47, %v2475_v29 }
 0xb0e   :  { %5809 = vmatpush1.bf16.msra.mxu0 %v7439_v49  ;;  %v10018_v31 = vadd.f32 %v5514_v4, %v5474_v8  ;;  %v5476_v57 = vadd.f32 %v5475_v34, %v2846_v51  ;;  %5840 = vmatprep.mubr.bf16.mxu0 %v9964_v37  ;;  %v7407_v49 = vcombine.low %v2479_v1, %v2483_v27  ;;  %v2331_v34 = vld [vmem:[#allocation3 + $0x30] sm:$0xff] }
 0xb0f   :  { %v5516_v60 = vpop.f32.mrf.mxu0  ;;  %5810 = vmatprep.subr.bf16.mxu0 %v7432_v53  ;;  %v5477_v6 = vpop.f32.mrf.mxu1  ;;  %v7400_v51 = vcombine.high %v2471_v47, %v2475_v29  ;;  %v2335_v53 = vld [vmem:[#allocation3 + $0x50] sm:$0xff]  ;;  %v7392_v4 = vcombine.high %v2463_v39, %v2467_v10  ;;  %v7503_v1 = vcombine.low %v2575_v56, %v2579_v13 }
 0xb10   :  { %v10022_v3 = vadd.f32 %v5516_v60, %v5476_v57  ;;  %5770 = vmatpush1.bf16.msra.mxu1 %v7303_v28  ;;  %v7264_v8 = vcombine.high %v2335_v53, %v2339_v22  ;;  %v2327_v28 = vld [vmem:[#allocation3 + $0x10] sm:$0xff]  ;;  %v7263_v57 = vcombine.low %v2335_v53, %v2339_v22  ;;  %v7391_v60 = vcombine.low %v2463_v39, %v2467_v10 }
 0xb11   :  { %v5518_v2 = vpop.f32.mrf.mxu0  ;;  %v5478_v12 = vpop.f32.mrf.mxu1  ;;  %5771 = vmatprep.subr.bf16.mxu1 %v7296_v20  ;;  %v2459_v20 = vld [vmem:[#allocation3 + $0x430] sm:$0xff] }
 0xb12   :  { %5811 = vmatpush1.bf16.msra.mxu0 %v7431_v42  ;;  %v2455_v42 = vld [vmem:[#allocation3 + $0x410] sm:$0xff]  ;;  %v7255_v2 = vcombine.low %v2327_v28, %v2331_v34 }
 0xb13   :  { %v5519_v38 = vpop.f32.mrf.mxu0  ;;  %5812 = vmatprep.subr.bf16.mxu0 %v7424_v52  ;;  %v7256_v52 = vcombine.high %v2327_v28, %v2331_v34  ;;  %v7384_v7 = vcombine.high %v2455_v42, %v2459_v20  ;;  %v2451_v6 = vld [vmem:[#allocation3 + $0x3f0] sm:$0xff] }
 0xb14   :  { %5772 = vmatpush1.bf16.msra.mxu1 %v7295_v63  ;;  %v7383_v63 = vcombine.low %v2455_v42, %v2459_v20  ;;  %v7376_v12 = vcombine.high %v2447_v54, %v2451_v6  ;;  %v2443_v38 = vld [vmem:[#allocation3 + $0x3b0] sm:$0xff]  ;;  %v7375_v11 = vcombine.low %v2447_v54, %v2451_v6 }
 0xb15   :  { %5773 = vmatprep.subr.bf16.mxu1 %v7288_v32  ;;  %v2439_v32 = vld [vmem:[#allocation3 + $0x390] sm:$0xff] }
 0xb16   :  { %5813 = vmatpush1.bf16.msra.mxu0 %v7423_v55  ;;  %v7504_v55 = vcombine.high %v2575_v56, %v2579_v13  ;;  %v2571_v18 = vld [vmem:[#allocation3 + $0x7b0] sm:$0xff]  ;;  %v7368_v27 = vcombine.high %v2439_v32, %v2443_v38  ;;  %v7367_v44 = vcombine.low %v2439_v32, %v2443_v38 }
 0xb17   :  { %5814 = vmatprep.subr.bf16.mxu0 %v7416_v14  ;;  %v2567_v14 = vld [vmem:[#allocation3 + $0x790] sm:$0xff] }
 0xb18   :  { %5774 = vmatpush1.bf16.msra.mxu1 %v7287_v61  ;;  %v7496_v61 = vcombine.high %v2567_v14, %v2571_v18  ;;  %v2563_v43 = vld [vmem:[#allocation3 + $0x770] sm:$0xff]  ;;  %v7495_v47 = vcombine.low %v2567_v14, %v2571_v18 }
 0xb19   :  { %5775 = vmatprep.subr.bf16.mxu1 %v7280_v36  ;;  %v2435_v36 = vld [vmem:[#allocation3 + $0x370] sm:$0xff] }
 0xb1a   :  { %5815 = vmatpush1.bf16.msra.mxu0 %v7415_v35  ;;  %v2431_v35 = vld [vmem:[#allocation3 + $0x350] sm:$0xff] }
 0xb1b   :  { %5816 = vmatprep.subr.bf16.mxu0 %v7408_v40  ;;  %v2559_v40 = vld [vmem:[#allocation3 + $0x750] sm:$0xff]  ;;  %v7360_v29 = vcombine.high %v2431_v35, %v2435_v36  ;;  %v7359_v22 = vcombine.low %v2431_v35, %v2435_v36 }
 0xb1c   :  { %5776 = vmatpush1.bf16.msra.mxu1 %v7279_v48  ;;  %v7488_v48 = vcombine.high %v2559_v40, %v2563_v43  ;;  %v2555_v53 = vld [vmem:[#allocation3 + $0x730] sm:$0xff]  ;;  %v7487_v39 = vcombine.low %v2559_v40, %v2563_v43 }
 0xb1d   :  { %5777 = vmatprep.subr.bf16.mxu1 %v7272_v50  ;;  %v2427_v50 = vld [vmem:[#allocation3 + $0x330] sm:$0xff] }
 0xb1e   :  { %5817 = vmatpush1.bf16.msra.mxu0 %v7407_v49  ;;  %v2423_v49 = vld [vmem:[#allocation3 + $0x310] sm:$0xff] }
 0xb1f   :  { %5818 = vmatprep.subr.bf16.mxu0 %v7400_v51  ;;  %v2551_v51 = vld [vmem:[#allocation3 + $0x710] sm:$0xff]  ;;  %v7352_v10 = vcombine.high %v2423_v49, %v2427_v50  ;;  %v7351_v34 = vcombine.low %v2423_v49, %v2427_v50 }
 0xb20   :  { %5778 = vmatpush1.bf16.msra.mxu1 %v7271_v41  ;;  %v7480_v41 = vcombine.high %v2551_v51, %v2555_v53  ;;  %v2547_v28 = vld [vmem:[#allocation3 + $0x6f0] sm:$0xff]  ;;  %v7479_v42 = vcombine.low %v2551_v51, %v2555_v53 }
 0xb21   :  { %5779 = vmatprep.subr.bf16.mxu1 %v7264_v8  ;;  %v2419_v8 = vld [vmem:[#allocation3 + $0x2f0] sm:$0xff] }
 0xb22   :  { %5819 = vmatpush1.bf16.msra.mxu0 %v7399_v30  ;;  %v2415_v30 = vld [vmem:[#allocation3 + $0x2d0] sm:$0xff] }
 0xb23   :  { %5820 = vmatprep.subr.bf16.mxu0 %v7392_v4  ;;  %v2543_v4 = vld [vmem:[#allocation3 + $0x6d0] sm:$0xff]  ;;  %v7344_v20 = vcombine.high %v2415_v30, %v2419_v8  ;;  %v7343_v6 = vcombine.low %v2415_v30, %v2419_v8 }
 0xb24   :  { %5780 = vmatpush1.bf16.msra.mxu1 %v7263_v57  ;;  %v7472_v57 = vcombine.high %v2543_v4, %v2547_v28  ;;  %v2539_v54 = vld [vmem:[#allocation3 + $0x6b0] sm:$0xff]  ;;  %v7471_v56 = vcombine.low %v2543_v4, %v2547_v28 }
 0xb25   :  { %5781 = vmatprep.subr.bf16.mxu1 %v7256_v52  ;;  %v2411_v52 = vld [vmem:[#allocation3 + $0x2b0] sm:$0xff] }
 0xb26   :  { %5821 = vmatpush1.bf16.msra.mxu0 %v7391_v60  ;;  %v2407_v60 = vld [vmem:[#allocation3 + $0x290] sm:$0xff] }
 0xb27   :  { %5822 = vmatprep.subr.bf16.mxu0 %v7384_v7  ;;  %v2535_v7 = vld [vmem:[#allocation3 + $0x690] sm:$0xff]  ;;  %v7336_v13 = vcombine.high %v2407_v60, %v2411_v52  ;;  %v7335_v38 = vcombine.low %v2407_v60, %v2411_v52 }
 0xb28   :  { %5782 = vmatpush1.bf16.msra.mxu1 %v7255_v2  ;;  %v7464_v2 = vcombine.high %v2535_v7, %v2539_v54  ;;  %v2531_v32 = vld [vmem:[#allocation3 + $0x670] sm:$0xff]  ;;  %v7463_v14 = vcombine.low %v2535_v7, %v2539_v54 }
 0xb29   :  { %5783 = vmatprep.subr.bf16.mxu1 %v7376_v12  ;;  %v2403_v12 = vld [vmem:[#allocation3 + $0x270] sm:$0xff] }
 0xb2a   :  { %5823 = vmatpush1.bf16.msra.mxu0 %v7383_v63  ;;  %v2399_v63 = vld [vmem:[#allocation3 + $0x250] sm:$0xff] }
 0xb2b   :  { %5824 = vmatprep.subr.bf16.mxu0 %v7504_v55  ;;  %v2527_v55 = vld [vmem:[#allocation3 + $0x650] sm:$0xff]  ;;  %v7328_v18 = vcombine.high %v2399_v63, %v2403_v12  ;;  %v7327_v36 = vcombine.low %v2399_v63, %v2403_v12 }
 0xb2c   :  { %5784 = vmatpush2.bf16.msra.mxu1 %v7375_v11  ;;  %v7456_v11 = vcombine.high %v2527_v55, %v2531_v32  ;;  %v2523_v35 = vld [vmem:[#allocation3 + $0x630] sm:$0xff]  ;;  %v7455_v40 = vcombine.low %v2527_v55, %v2531_v32 }
 0xb2d   :  { %5785 = vmatprep.subr.bf16.mxu1 %v7368_v27  ;;  %v2395_v27 = vld [vmem:[#allocation3 + $0x230] sm:$0xff] }
 0xb2e   :  { %5825 = vmatpush2.bf16.msra.mxu0 %v7503_v1  ;;  %v2391_v1 = vld [vmem:[#allocation3 + $0x210] sm:$0xff] }
 0xb2f   :  { %5826 = vmatprep.subr.bf16.mxu0 %v7496_v61  ;;  %v2519_v61 = vld [vmem:[#allocation3 + $0x610] sm:$0xff]  ;;  %v7320_v43 = vcombine.high %v2391_v1, %v2395_v27  ;;  %v7319_v50 = vcombine.low %v2391_v1, %v2395_v27 }
 0xb30   :  { %5786 = vmatpush2.bf16.msra.mxu1 %v7367_v44  ;;  %v7448_v44 = vcombine.high %v2519_v61, %v2523_v35  ;;  %v2771_v49 = vld [vmem:[#allocation3 + $0xdf0] sm:$0xff]  ;;  %v7447_v51 = vcombine.low %v2519_v61, %v2523_v35 }
 0xb31   :  { %5787 = vmatprep.subr.bf16.mxu1 %v7360_v29  ;;  %v2643_v29 = vld [vmem:[#allocation3 + $0x9f0] sm:$0xff] }
 0xb32   :  { %5827 = vmatpush2.bf16.msra.mxu0 %v7495_v47  ;;  %v2639_v47 = vld [vmem:[#allocation3 + $0x9d0] sm:$0xff] }
 0xb33   :  { %5828 = vmatprep.subr.bf16.mxu0 %v7488_v48  ;;  %v2767_v48 = vld [vmem:[#allocation3 + $0xdd0] sm:$0xff]  ;;  %v7568_v53 = vcombine.high %v2639_v47, %v2643_v29  ;;  %v7567_v8 = vcombine.low %v2639_v47, %v2643_v29 }
 0xb34   :  { %5788 = vmatpush2.bf16.msra.mxu1 %v7359_v22  ;;  %v7696_v22 = vcombine.high %v2767_v48, %v2771_v49  ;;  %v2763_v30 = vld [vmem:[#allocation3 + $0xdb0] sm:$0xff]  ;;  %v7695_v4 = vcombine.low %v2767_v48, %v2771_v49 }
 0xb35   :  { %5789 = vmatprep.subr.bf16.mxu1 %v7352_v10  ;;  %v2635_v10 = vld [vmem:[#allocation3 + $0x9b0] sm:$0xff] }
 0xb36   :  { %5829 = vmatpush2.bf16.msra.mxu0 %v7487_v39  ;;  %v2631_v39 = vld [vmem:[#allocation3 + $0x990] sm:$0xff] }
 0xb37   :  { %5830 = vmatprep.subr.bf16.mxu0 %v7480_v41  ;;  %v2759_v41 = vld [vmem:[#allocation3 + $0xd90] sm:$0xff]  ;;  %v7560_v28 = vcombine.high %v2631_v39, %v2635_v10 }
 0xb38   :  { %5790 = vmatpush2.bf16.msra.mxu1 %v7351_v34  ;;  %v7688_v34 = vcombine.high %v2759_v41, %v2763_v30  ;;  %v2751_v60 = vld [vmem:[#allocation3 + $0xd50] sm:$0xff] }
 0xb39   :  { %5791 = vmatprep.subr.bf16.mxu1 %v7344_v20  ;;  %v2627_v20 = vld [vmem:[#allocation3 + $0x970] sm:$0xff] }
 0xb3a   :  { %5831 = vmatpush2.bf16.msra.mxu0 %v7479_v42  ;;  %v2623_v42 = vld [vmem:[#allocation3 + $0x950] sm:$0xff] }
 0xb3b   :  { %5832 = vmatprep.subr.bf16.mxu0 %v7472_v57  ;;  %v2755_v52 = vld [vmem:[#allocation3 + $0xd70] sm:$0xff]  ;;  %v7551_v35 = vcombine.low %v2623_v42, %v2627_v20 }
 0xb3c   :  { %5792 = vmatpush2.bf16.msra.mxu1 %v7343_v6  ;;  %v7559_v6 = vcombine.low %v2631_v39, %v2635_v10  ;;  %v7680_v32 = vcombine.high %v2751_v60, %v2755_v52  ;;  %v2607_v29 = vld [vmem:[#allocation3 + $0x8d0] sm:$0xff] }
 0xb3d   :  { %5793 = vmatprep.subr.bf16.mxu1 %v7336_v13  ;;  %v7687_v13 = vcombine.low %v2759_v41, %v2763_v30  ;;  %v2611_v48 = vld [vmem:[#allocation3 + $0x8f0] sm:$0xff] }
 0xb3e   :  { %5833 = vmatpush2.bf16.msra.mxu0 %v7471_v56  ;;  %v2735_v49 = vld [vmem:[#allocation3 + $0xcd0] sm:$0xff] }
 0xb3f   :  { %5834 = vmatprep.subr.bf16.mxu0 %v7464_v2  ;;  %v7552_v2 = vcombine.high %v2623_v42, %v2627_v20  ;;  %v2599_v10 = vld [vmem:[#allocation3 + $0x890] sm:$0xff] }
 0xb40   :  { %5794 = vmatpush2.bf16.msra.mxu1 %v7335_v38  ;;  %v2615_v38 = vld [vmem:[#allocation3 + $0x910] sm:$0xff] }
 0xb41   :  { %5795 = vmatprep.subr.bf16.mxu1 %v7328_v18  ;;  %v2743_v18 = vld [vmem:[#allocation3 + $0xd10] sm:$0xff] }
 0xb42   :  { %5835 = vmatpush2.bf16.msra.mxu0 %v7463_v14  ;;  %v2619_v14 = vld [vmem:[#allocation3 + $0x930] sm:$0xff] }
 0xb43   :  { %5836 = vmatprep.subr.bf16.mxu0 %v7456_v11  ;;  %v2747_v11 = vld [vmem:[#allocation3 + $0xd30] sm:$0xff] }
 0xb44   :  { %5796 = vmatpush2.bf16.msra.mxu1 %v7327_v36  ;;  %v7679_v36 = vcombine.low %v2751_v60, %v2755_v52  ;;  %v7672_v47 = vcombine.high %v2743_v18, %v2747_v11  ;;  %v2603_v41 = vld [vmem:[#allocation3 + $0x8b0] sm:$0xff] }
 0xb45   :  { %5797 = vmatprep.subr.bf16.mxu1 %v7320_v43  ;;  %v2727_v30 = vld [vmem:[#allocation3 + $0xc90] sm:$0xff] }
 0xb46   :  { %5837 = vmatpush2.bf16.msra.mxu0 %v7455_v40  ;;  %v7544_v40 = vcombine.high %v2615_v38, %v2619_v14  ;;  %v2591_v20 = vld [vmem:[#allocation3 + $0x850] sm:$0xff] }
 0xb47   :  { %5838 = vmatprep.subr.bf16.mxu0 %v7448_v44  ;;  %v2719_v60 = vld [vmem:[#allocation3 + $0xc50] sm:$0xff] }
 0xb48   :  { %5798 = vmatpush2.bf16.msra.mxu1 %v7319_v50  ;;  %v2739_v50 = vld [vmem:[#allocation3 + $0xcf0] sm:$0xff] }
 0xb49   :  { %5849 = vmatprep.subr.bf16.mxu1 %v7568_v53  ;;  %v7671_v53 = vcombine.low %v2743_v18, %v2747_v11  ;;  %v7664_v39 = vcombine.high %v2735_v49, %v2739_v50  ;;  %v2723_v52 = vld [vmem:[#allocation3 + $0xc70] sm:$0xff] }
 0xb4a   :  { %5839 = vmatpush2.bf16.msra.mxu0 %v7447_v51  ;;  %v7543_v51 = vcombine.low %v2615_v38, %v2619_v14  ;;  %v7647_v38 = vcombine.low %v2719_v60, %v2723_v52  ;;  %v2703_v18 = vld [vmem:[#allocation3 + $0xbd0] sm:$0xff] }
 0xb4b   :  { %5890 = vmatprep.subr.bf16.mxu0 %v7696_v22  ;;  %v5555_v57 = vpop.f32.mrf.mxu1  ;;  %5800 = vmatmul.mubr.bf16.vlgmr.msra.gmra.mxu1 %v9971_v58  ;;  %v7536_v22 = vcombine.high %v2607_v29, %v2611_v48  ;;  %v2707_v11 = vld [vmem:[#allocation3 + $0xbf0] sm:$0xff] }
 0xb4c   :  { %v5556_v7 = vadd.f32 %v5555_v57, %v10018_v31  ;;  %5850 = vmatpush1.bf16.msra.mxu1 %v7567_v8  ;;  %5881 = vmatprep.mubr.bf16.mxu1 %v9981_v45  ;;  %v2731_v8 = vld [vmem:[#allocation3 + $0xcb0] sm:$0xff] }
 0xb4d   :  { %v5596_v54 = vpop.f32.mrf.mxu0  ;;  %5841 = vmatmul.mubr.bf16.vlgmr.msra.gmra.mxu0 %v9976_v15  ;;  %v5557_v56 = vpop.f32.mrf.mxu1  ;;  %5851 = vmatprep.subr.bf16.mxu1 %v7560_v28  ;;  %v7663_v28 = vcombine.low %v2735_v49, %v2739_v50  ;;  %v7656_v42 = vcombine.high %v2727_v30, %v2731_v8  ;;  %v2595_v57 = vld [vmem:[#allocation3 + $0x870] sm:$0xff]  ;;  %v7631_v50 = vcombine.low %v2703_v18, %v2707_v11 }
 0xb4e   :  { %5891 = vmatpush1.bf16.msra.mxu0 %v7695_v4  ;;  %v10027_v63 = vadd.f32 %v5596_v54, %v5556_v7  ;;  %v5558_v12 = vadd.f32 %v5557_v56, %v10022_v3  ;;  %5922 = vmatprep.mubr.bf16.mxu0 %v9987_v46  ;;  %v7535_v4 = vcombine.low %v2607_v29, %v2611_v48  ;;  %v2699_v29 = vld [vmem:[#allocation3 + $0xbb0] sm:$0xff] }
 0xb4f   :  { %v5598_v55 = vpop.f32.mrf.mxu0  ;;  %5892 = vmatprep.subr.bf16.mxu0 %v7688_v34  ;;  %v5559_v31 = vpop.f32.mrf.mxu1  ;;  %v7528_v34 = vcombine.high %v2599_v10, %v2603_v41  ;;  %v7527_v7 = vcombine.low %v2599_v10, %v2603_v41  ;;  %v7655_v54 = vcombine.low %v2727_v30, %v2731_v8  ;;  %v7648_v56 = vcombine.high %v2719_v60, %v2723_v52  ;;  %v2823_v48 = vld [vmem:[#allocation3 + $0xf90] sm:$0xff] }
 0xb50   :  { %v6095_v1 = vmax.f32 %v10027_v63, 0.0  ;;  %v10033_v27 = vadd.f32 %v5598_v55, %v5558_v12  ;;  %5852 = vmatpush1.bf16.msra.mxu1 %v7559_v6  ;;  %v7520_v6 = vcombine.high %v2591_v20, %v2595_v57  ;;  %v2711_v12 = vld [vmem:[#allocation3 + $0xc10] sm:$0xff] }
 0xb51   :  { %v5600_v61 = vpop.f32.mrf.mxu0  ;;  %v5560_v3 = vpop.f32.mrf.mxu1  ;;  %5853 = vmatprep.subr.bf16.mxu1 %v7552_v2  ;;  %v2587_v2 = vld [vmem:[#allocation3 + $0x830] sm:$0xff] }
 0xb52   :  { %5893 = vmatpush1.bf16.msra.mxu0 %v7687_v13  ;;  %v6096_v43 = vmax.f32 %v10033_v27, 0.0  ;;  %v2583_v13 = vld [vmem:[#allocation3 + $0x810] sm:$0xff] }
 0xb53   :  { %v5601_v44 = vpop.f32.mrf.mxu0  ;;  %5894 = vmatprep.subr.bf16.mxu0 %v7680_v32  ;;  %v2715_v55 = vld [vmem:[#allocation3 + $0xc30] sm:$0xff]  ;;  %v7519_v32 = vcombine.low %v2591_v20, %v2595_v57  ;;  %v7512_v14 = vcombine.high %v2583_v13, %v2587_v2  ;;  %v7511_v3 = vcombine.low %v2583_v13, %v2587_v2 }
 0xb54   :  { %5854 = vmatpush1.bf16.msra.mxu1 %v7551_v35  ;;  %v7640_v31 = vcombine.high %v2711_v12, %v2715_v55  ;;  %v2831_v61 = vld [vmem:[#allocation3 + $0xfd0] sm:$0xff] }
 0xb55   :  { %5855 = vmatprep.subr.bf16.mxu1 %v7544_v40  ;;  %v2835_v35 = vld [vmem:[#allocation3 + $0xff0] sm:$0xff]  ;;  %v7632_v40 = vcombine.high %v2703_v18, %v2707_v11 }
 0xb56   :  { %5895 = vmatpush1.bf16.msra.mxu0 %v7679_v36  ;;  %v7639_v36 = vcombine.low %v2711_v12, %v2715_v55  ;;  %v7760_v44 = vcombine.high %v2831_v61, %v2835_v35  ;;  %v2827_v49 = vld [vmem:[#allocation3 + $0xfb0] sm:$0xff] }
 0xb57   :  { %5896 = vmatprep.subr.bf16.mxu0 %v7672_v47  ;;  %v2695_v47 = vld [vmem:[#allocation3 + $0xb90] sm:$0xff] }
 0xb58   :  { %5856 = vmatpush1.bf16.msra.mxu1 %v7543_v51  ;;  %v7759_v51 = vcombine.low %v2831_v61, %v2835_v35  ;;  %v2691_v10 = vld [vmem:[#allocation3 + $0xb70] sm:$0xff]  ;;  %v7623_v8 = vcombine.low %v2695_v47, %v2699_v29 }
 0xb59   :  { %5857 = vmatprep.subr.bf16.mxu1 %v7536_v22  ;;  %v7752_v22 = vcombine.high %v2823_v48, %v2827_v49  ;;  %v2815_v41 = vld [vmem:[#allocation3 + $0xf50] sm:$0xff] }
 0xb5a   :  { %5897 = vmatpush1.bf16.msra.mxu0 %v7671_v53  ;;  %v7624_v53 = vcombine.high %v2695_v47, %v2699_v29  ;;  %v2819_v30 = vld [vmem:[#allocation3 + $0xf70] sm:$0xff] }
 0xb5b   :  { %5898 = vmatprep.subr.bf16.mxu0 %v7664_v39  ;;  %v2687_v39 = vld [vmem:[#allocation3 + $0xb50] sm:$0xff] }
 0xb5c   :  { %5858 = vmatpush1.bf16.msra.mxu1 %v7535_v4  ;;  %v7751_v4 = vcombine.low %v2823_v48, %v2827_v49  ;;  %v2683_v20 = vld [vmem:[#allocation3 + $0xb30] sm:$0xff]  ;;  %v7615_v52 = vcombine.low %v2687_v39, %v2691_v10 }
 0xb5d   :  { %5859 = vmatprep.subr.bf16.mxu1 %v7528_v34  ;;  %v7744_v34 = vcombine.high %v2815_v41, %v2819_v30  ;;  %v2807_v57 = vld [vmem:[#allocation3 + $0xf10] sm:$0xff] }
 0xb5e   :  { %5899 = vmatpush1.bf16.msra.mxu0 %v7663_v28  ;;  %v7616_v28 = vcombine.high %v2687_v39, %v2691_v10  ;;  %v2811_v60 = vld [vmem:[#allocation3 + $0xf30] sm:$0xff] }
 0xb5f   :  { %5900 = vmatprep.subr.bf16.mxu0 %v7656_v42  ;;  %v2679_v42 = vld [vmem:[#allocation3 + $0xb10] sm:$0xff] }
 0xb60   :  { %5860 = vmatpush1.bf16.msra.mxu1 %v7527_v7  ;;  %v7743_v7 = vcombine.low %v2815_v41, %v2819_v30  ;;  %v2675_v13 = vld [vmem:[#allocation3 + $0xaf0] sm:$0xff]  ;;  %v7607_v55 = vcombine.low %v2679_v42, %v2683_v20 }
 0xb61   :  { %5861 = vmatprep.subr.bf16.mxu1 %v7520_v6  ;;  %v7736_v6 = vcombine.high %v2807_v57, %v2811_v60  ;;  %v2799_v2 = vld [vmem:[#allocation3 + $0xed0] sm:$0xff] }
 0xb62   :  { %5901 = vmatpush1.bf16.msra.mxu0 %v7655_v54  ;;  %v7608_v54 = vcombine.high %v2679_v42, %v2683_v20  ;;  %v2803_v12 = vld [vmem:[#allocation3 + $0xef0] sm:$0xff]  ;;  %v2388_v42 = vld [vmem:[#allocation3 + $0x1f8] sm:$0xff] }
 0xb63   :  { %5902 = vmatprep.subr.bf16.mxu0 %v7648_v56  ;;  %v2671_v56 = vld [vmem:[#allocation3 + $0xad0] sm:$0xff]  ;;  %v2512_v20 = vld [vmem:[#allocation3 + $0x5d8] sm:$0xff] }
 0xb64   :  { %5862 = vmatpush1.bf16.msra.mxu1 %v7519_v32  ;;  %v7735_v32 = vcombine.low %v2807_v57, %v2811_v60  ;;  %v2667_v18 = vld [vmem:[#allocation3 + $0xab0] sm:$0xff]  ;;  %v7599_v35 = vcombine.low %v2671_v56, %v2675_v13  ;;  %v2516_v57 = vld [vmem:[#allocation3 + $0x5f8] sm:$0xff] }
 0xb65   :  { %5863 = vmatprep.subr.bf16.mxu1 %v7512_v14  ;;  %v7728_v14 = vcombine.high %v2799_v2, %v2803_v12  ;;  %v2791_v11 = vld [vmem:[#allocation3 + $0xe90] sm:$0xff] }
 0xb66   :  { %5903 = vmatpush1.bf16.msra.mxu0 %v7647_v38  ;;  %v7600_v38 = vcombine.high %v2671_v56, %v2675_v13  ;;  %v2795_v61 = vld [vmem:[#allocation3 + $0xeb0] sm:$0xff]  ;;  %v2380_v56 = vld [vmem:[#allocation3 + $0x1b8] sm:$0xff] }
 0xb67   :  { %5904 = vmatprep.subr.bf16.mxu0 %v7640_v31  ;;  %v2663_v31 = vld [vmem:[#allocation3 + $0xa90] sm:$0xff]  ;;  %v2504_v13 = vld [vmem:[#allocation3 + $0x598] sm:$0xff] }
 0xb68   :  { %5864 = vmatpush1.bf16.msra.mxu1 %v7511_v3  ;;  %v7727_v3 = vcombine.low %v2799_v2, %v2803_v12  ;;  %v2659_v47 = vld [vmem:[#allocation3 + $0xa70] sm:$0xff]  ;;  %v7591_v49 = vcombine.low %v2663_v31, %v2667_v18  ;;  %v2508_v2 = vld [vmem:[#allocation3 + $0x5b8] sm:$0xff]  ;;  %v2850_v12 = vrot.slane %v10010_v33, %v9521_v62 }
 0xb69   :  { %5865 = vmatprep.subr.bf16.mxu1 %v7632_v40  ;;  %v7720_v40 = vcombine.high %v2791_v11, %v2795_v61  ;;  %v2783_v29 = vld [vmem:[#allocation3 + $0xe50] sm:$0xff] }
 0xb6a   :  { %5905 = vmatpush1.bf16.msra.mxu0 %v7639_v36  ;;  %v7592_v36 = vcombine.high %v2663_v31, %v2667_v18  ;;  %v2787_v48 = vld [vmem:[#allocation3 + $0xe70] sm:$0xff]  ;;  %v7434_v31 = vcombine.high %v2504_v13, %v2508_v2  ;;  %v2368_v18 = vld [vmem:[#allocation3 + $0x158] sm:$0xff] }
 0xb6b   :  { %5906 = vmatprep.subr.bf16.mxu0 %v7760_v44  ;;  %v2655_v44 = vld [vmem:[#allocation3 + $0xa50] sm:$0xff] }
 0xb6c   :  { %5866 = vmatpush2.bf16.msra.mxu1 %v7631_v50  ;;  %v7719_v50 = vcombine.low %v2791_v11, %v2795_v61  ;;  %v2651_v39 = vld [vmem:[#allocation3 + $0xa30] sm:$0xff]  ;;  %v7583_v30 = vcombine.low %v2655_v44, %v2659_v47  ;;  %v2372_v11 = vld [vmem:[#allocation3 + $0x178] sm:$0xff] }
 0xb6d   :  { %5867 = vmatprep.subr.bf16.mxu1 %v7624_v53  ;;  %v7712_v53 = vcombine.high %v2783_v29, %v2787_v48  ;;  %v2775_v10 = vld [vmem:[#allocation3 + $0xe10] sm:$0xff] }
 0xb6e   :  { %5907 = vmatpush2.bf16.msra.mxu0 %v7759_v51  ;;  %v7584_v51 = vcombine.high %v2655_v44, %v2659_v47  ;;  %v2779_v41 = vld [vmem:[#allocation3 + $0xe30] sm:$0xff]  ;;  %v7433_v47 = vcombine.low %v2504_v13, %v2508_v2  ;;  %v2472_v13 = vld [vmem:[#allocation3 + $0x498] sm:$0xff] }
 0xb6f   :  { %5908 = vmatprep.subr.bf16.mxu0 %v7752_v22  ;;  %v2647_v22 = vld [vmem:[#allocation3 + $0xa10] sm:$0xff]  ;;  %v2476_v2 = vld [vmem:[#allocation3 + $0x4b8] sm:$0xff] }
 0xb70   :  { %5868 = vmatpush2.bf16.msra.mxu1 %v7623_v8  ;;  %v7711_v8 = vcombine.low %v2783_v29, %v2787_v48  ;;  %v7575_v60 = vcombine.low %v2647_v22, %v2651_v39  ;;  %v7298_v29 = vcombine.high %v2368_v18, %v2372_v11 }
 0xb71   :  { %5869 = vmatprep.subr.bf16.mxu1 %v7616_v28  ;;  %v7704_v28 = vcombine.high %v2775_v10, %v2779_v41 }
 0xb72   :  { %5909 = vmatpush2.bf16.msra.mxu0 %v7751_v4  ;;  %v7576_v4 = vcombine.high %v2647_v22, %v2651_v39  ;;  %v2488_v22 = vld [vmem:[#allocation3 + $0x518] sm:$0xff] }
 0xb73   :  { %5910 = vmatprep.subr.bf16.mxu0 %v7744_v34  ;;  %v2384_v34 = vld [vmem:[#allocation3 + $0x1d8] sm:$0xff] }
 0xb74   :  { %5870 = vmatpush2.bf16.msra.mxu1 %v7615_v52  ;;  %v7703_v52 = vcombine.low %v2775_v10, %v2779_v41  ;;  %v2492_v39 = vld [vmem:[#allocation3 + $0x538] sm:$0xff] }
 0xb75   :  { %5871 = vmatprep.subr.bf16.mxu1 %v7608_v54  ;;  %v7442_v54 = vcombine.high %v2512_v20, %v2516_v57 }
 0xb76   :  { %5911 = vmatpush2.bf16.msra.mxu0 %v7743_v7  ;;  %v7314_v7 = vcombine.high %v2384_v34, %v2388_v42 }
 0xb77   :  { %5912 = vmatprep.subr.bf16.mxu0 %v7736_v6  ;;  %v2376_v6 = vld [vmem:[#allocation3 + $0x198] sm:$0xff] }
 0xb78   :  { %5872 = vmatpush2.bf16.msra.mxu1 %v7607_v55  ;;  %v7313_v55 = vcombine.low %v2384_v34, %v2388_v42  ;;  %v7418_v42 = vcombine.high %v2488_v22, %v2492_v39 }
 0xb79   :  { %5873 = vmatprep.subr.bf16.mxu1 %v7600_v38  ;;  %v7306_v38 = vcombine.high %v2376_v6, %v2380_v56 }
 0xb7a   :  { %5913 = vmatpush2.bf16.msra.mxu0 %v7735_v32  ;;  %v7441_v32 = vcombine.low %v2512_v20, %v2516_v57  ;;  %v2352_v20 = vld [vmem:[#allocation3 + $0xd8] sm:$0xff] }
 0xb7b   :  { %5914 = vmatprep.subr.bf16.mxu0 %v7728_v14  ;;  %v2854_v14 = vrot.slane %v10010_v33, %v1906_v19  ;;  %v2480_v57 = vld [vmem:[#allocation3 + $0x4d8] sm:$0xff] }
 0xb7c   :  { %5874 = vmatpush2.bf16.msra.mxu1 %v7599_v35  ;;  %v2496_v35 = vld [vmem:[#allocation3 + $0x558] sm:$0xff] }
 0xb7d   :  { %5875 = vmatprep.subr.bf16.mxu1 %v7592_v36 }
 0xb7e   :  { %5915 = vmatpush2.bf16.msra.mxu0 %v7727_v3  ;;  %v2500_v3 = vld [vmem:[#allocation3 + $0x578] sm:$0xff] }
 0xb7f   :  { %5916 = vmatprep.subr.bf16.mxu0 %v7720_v40  ;;  %v7305_v40 = vcombine.low %v2376_v6, %v2380_v56  ;;  %v2344_v6 = vld [vmem:[#allocation3 + $0x98] sm:$0xff] }
 0xb80   :  { %5876 = vmatpush2.bf16.msra.mxu1 %v7591_v49  ;;  %v7426_v49 = vcombine.high %v2496_v35, %v2500_v3  ;;  %v2348_v56 = vld [vmem:[#allocation3 + $0xb8] sm:$0xff] }
 0xb81   :  { %5877 = vmatprep.subr.bf16.mxu1 %v7584_v51  ;;  %v2364_v51 = vld [vmem:[#allocation3 + $0x138] sm:$0xff] }
 0xb82   :  { %5917 = vmatpush2.bf16.msra.mxu0 %v7719_v50  ;;  %v2360_v50 = vld [vmem:[#allocation3 + $0x118] sm:$0xff] }
 0xb83   :  { %5918 = vmatprep.subr.bf16.mxu0 %v7712_v53 }
 0xb84   :  { %5878 = vmatpush2.bf16.msra.mxu1 %v7583_v30  ;;  %v7297_v30 = vcombine.low %v2368_v18, %v2372_v11  ;;  %v2464_v18 = vld [vmem:[#allocation3 + $0x458] sm:$0xff] }
 0xb85   :  { %5879 = vmatprep.subr.bf16.mxu1 %v7576_v4  ;;  %v7425_v4 = vcombine.low %v2496_v35, %v2500_v3  ;;  %v2468_v11 = vld [vmem:[#allocation3 + $0x478] sm:$0xff]  ;;  %v7401_v35 = vcombine.low %v2472_v13, %v2476_v2 }
 0xb86   :  { %5919 = vmatpush2.bf16.msra.mxu0 %v7711_v8 }
 0xb87   :  { %5920 = vmatprep.subr.bf16.mxu0 %v7704_v28  ;;  %v7290_v28 = vcombine.high %v2360_v50, %v2364_v51 }
 0xb88   :  { %5880 = vmatpush2.bf16.msra.mxu1 %v7575_v60  ;;  %v2484_v60 = vld [vmem:[#allocation3 + $0x4f8] sm:$0xff] }
 0xb89   :  { %5931 = vmatprep.subr.bf16.mxu1 %v7314_v7 }
 0xb8a   :  { %5921 = vmatpush2.bf16.msra.mxu0 %v7703_v52  ;;  %v7289_v52 = vcombine.low %v2360_v50, %v2364_v51  ;;  %v2448_v50 = vld [vmem:[#allocation3 + $0x3d8] sm:$0xff] }
 0xb8b   :  { %5972 = vmatprep.subr.bf16.mxu0 %v7442_v54  ;;  %v5637_v61 = vpop.f32.mrf.mxu1  ;;  %5882 = vmatmul.mubr.bf16.vlgmr.msra.gmra.mxu1 %v9995_v25  ;;  %v7410_v54 = vcombine.high %v2480_v57, %v2484_v60  ;;  %v2452_v51 = vld [vmem:[#allocation3 + $0x3f8] sm:$0xff] }
 0xb8c   :  { %v5638_v36 = vadd.f32 %v5637_v61, %v2850_v12  ;;  %5932 = vmatpush1.bf16.msra.mxu1 %v7313_v55  ;;  %5963 = vmatprep.mubr.bf16.mxu1 %v9962_v26  ;;  %v2356_v26 = vld [vmem:[#allocation3 + $0xf8] sm:$0xff]  ;;  %v7409_v55 = vcombine.low %v2480_v57, %v2484_v60  ;;  %v7273_v61 = vcombine.low %v2344_v6, %v2348_v56 }
 0xb8d   :  { %v5678_v62 = vpop.f32.mrf.mxu0  ;;  %5923 = vmatmul.mubr.bf16.vlgmr.msra.gmra.mxu0 %v10000_v9  ;;  %v5639_v44 = vpop.f32.mrf.mxu1  ;;  %5933 = vmatprep.subr.bf16.mxu1 %v7306_v38  ;;  %v7282_v7 = vcombine.high %v2352_v20, %v2356_v26  ;;  %v7281_v12 = vcombine.low %v2352_v20, %v2356_v26  ;;  %v7402_v38 = vcombine.high %v2472_v13, %v2476_v2 }
 0xb8e   :  { %5973 = vmatpush1.bf16.msra.mxu0 %v7441_v32  ;;  %v10043_v19 = vadd.f32 %v5678_v62, %v5638_v36  ;;  %v5640_v33 = vadd.f32 %v5639_v44, %v2854_v14  ;;  %6004 = vmatprep.mubr.bf16.mxu0 %v9964_v37  ;;  %v7417_v37 = vcombine.low %v2488_v22, %v2492_v39  ;;  %v2336_v14 = vld [vmem:[#allocation3 + $0x58] sm:$0xff] }
 0xb8f   :  { %v5680_v48 = vpop.f32.mrf.mxu0  ;;  %5974 = vmatprep.subr.bf16.mxu0 %v7434_v31  ;;  %v5641_v53 = vpop.f32.mrf.mxu1  ;;  %v7274_v32 = vcombine.high %v2344_v6, %v2348_v56  ;;  %v2340_v31 = vld [vmem:[#allocation3 + $0x78] sm:$0xff]  ;;  %v7394_v36 = vcombine.high %v2464_v18, %v2468_v11  ;;  %v7377_v20 = vcombine.low %v2448_v50, %v2452_v51 }
 0xb90   :  { %v10047_v10 = vadd.f32 %v5680_v48, %v5640_v33  ;;  %5934 = vmatpush1.bf16.msra.mxu1 %v7305_v40  ;;  %v7266_v3 = vcombine.high %v2336_v14, %v2340_v31  ;;  %v2328_v62 = vld [vmem:[#allocation3 + $0x18] sm:$0xff]  ;;  %v7393_v33 = vcombine.low %v2464_v18, %v2468_v11 }
 0xb91   :  { %v5682_v41 = vpop.f32.mrf.mxu0  ;;  %v5642_v8 = vpop.f32.mrf.mxu1  ;;  %5935 = vmatprep.subr.bf16.mxu1 %v7298_v29  ;;  %v2332_v40 = vld [vmem:[#allocation3 + $0x38] sm:$0xff]  ;;  %v7265_v29 = vcombine.low %v2336_v14, %v2340_v31 }
 0xb92   :  { %5975 = vmatpush1.bf16.msra.mxu0 %v7433_v47  ;;  %v2456_v44 = vld [vmem:[#allocation3 + $0x418] sm:$0xff]  ;;  %v7258_v48 = vcombine.high %v2328_v62, %v2332_v40  ;;  %v7257_v39 = vcombine.low %v2328_v62, %v2332_v40 }
 0xb93   :  { %v5683_v34 = vpop.f32.mrf.mxu0  ;;  %5976 = vmatprep.subr.bf16.mxu0 %v7426_v49  ;;  %v2460_v47 = vld [vmem:[#allocation3 + $0x438] sm:$0xff] }
 0xb94   :  { %5936 = vmatpush1.bf16.msra.mxu1 %v7297_v30  ;;  %v7386_v49 = vcombine.high %v2456_v44, %v2460_v47  ;;  %v2576_v53 = vld [vmem:[#allocation3 + $0x7d8] sm:$0xff]  ;;  %v7385_v41 = vcombine.low %v2456_v44, %v2460_v47  ;;  %v7378_v30 = vcombine.high %v2448_v50, %v2452_v51 }
 0xb95   :  { %5937 = vmatprep.subr.bf16.mxu1 %v7290_v28  ;;  %v2580_v22 = vld [vmem:[#allocation3 + $0x7f8] sm:$0xff] }
 0xb96   :  { %5977 = vmatpush1.bf16.msra.mxu0 %v7425_v4  ;;  %v7506_v8 = vcombine.high %v2576_v53, %v2580_v22  ;;  %v2440_v4 = vld [vmem:[#allocation3 + $0x398] sm:$0xff]  ;;  %v7505_v26 = vcombine.low %v2576_v53, %v2580_v22 }
 0xb97   :  { %5978 = vmatprep.subr.bf16.mxu0 %v7418_v42  ;;  %v2444_v28 = vld [vmem:[#allocation3 + $0x3b8] sm:$0xff] }
 0xb98   :  { %5938 = vmatpush1.bf16.msra.mxu1 %v7289_v52  ;;  %v2568_v34 = vld [vmem:[#allocation3 + $0x798] sm:$0xff]  ;;  %v7370_v57 = vcombine.high %v2440_v4, %v2444_v28  ;;  %v7369_v6 = vcombine.low %v2440_v4, %v2444_v28 }
 0xb99   :  { %5939 = vmatprep.subr.bf16.mxu1 %v7282_v7  ;;  %v2572_v42 = vld [vmem:[#allocation3 + $0x7b8] sm:$0xff] }
 0xb9a   :  { %5979 = vmatpush1.bf16.msra.mxu0 %v7417_v37  ;;  %v7498_v60 = vcombine.high %v2568_v34, %v2572_v42  ;;  %v2432_v52 = vld [vmem:[#allocation3 + $0x358] sm:$0xff]  ;;  %v7497_v56 = vcombine.low %v2568_v34, %v2572_v42 }
 0xb9b   :  { %5980 = vmatprep.subr.bf16.mxu0 %v7410_v54  ;;  %v2436_v37 = vld [vmem:[#allocation3 + $0x378] sm:$0xff] }
 0xb9c   :  { %5940 = vmatpush1.bf16.msra.mxu1 %v7281_v12  ;;  %v2560_v7 = vld [vmem:[#allocation3 + $0x758] sm:$0xff]  ;;  %v7362_v13 = vcombine.high %v2432_v52, %v2436_v37  ;;  %v7361_v14 = vcombine.low %v2432_v52, %v2436_v37 }
 0xb9d   :  { %5941 = vmatprep.subr.bf16.mxu1 %v7274_v32  ;;  %v2564_v54 = vld [vmem:[#allocation3 + $0x778] sm:$0xff] }
 0xb9e   :  { %5981 = vmatpush1.bf16.msra.mxu0 %v7409_v55  ;;  %v7490_v2 = vcombine.high %v2560_v7, %v2564_v54  ;;  %v2424_v12 = vld [vmem:[#allocation3 + $0x318] sm:$0xff]  ;;  %v7489_v31 = vcombine.low %v2560_v7, %v2564_v54 }
 0xb9f   :  { %5982 = vmatprep.subr.bf16.mxu0 %v7402_v38  ;;  %v2428_v55 = vld [vmem:[#allocation3 + $0x338] sm:$0xff] }
 0xba0   :  { %5942 = vmatpush1.bf16.msra.mxu1 %v7273_v61  ;;  %v2552_v32 = vld [vmem:[#allocation3 + $0x718] sm:$0xff]  ;;  %v7354_v18 = vcombine.high %v2424_v12, %v2428_v55  ;;  %v7353_v62 = vcombine.low %v2424_v12, %v2428_v55 }
 0xba1   :  { %5943 = vmatprep.subr.bf16.mxu1 %v7266_v3  ;;  %v2556_v38 = vld [vmem:[#allocation3 + $0x738] sm:$0xff] }
 0xba2   :  { %5983 = vmatpush1.bf16.msra.mxu0 %v7401_v35  ;;  %v7482_v11 = vcombine.high %v2552_v32, %v2556_v38  ;;  %v2416_v61 = vld [vmem:[#allocation3 + $0x2d8] sm:$0xff]  ;;  %v7481_v40 = vcombine.low %v2552_v32, %v2556_v38 }
 0xba3   :  { %5984 = vmatprep.subr.bf16.mxu0 %v7394_v36  ;;  %v2420_v35 = vld [vmem:[#allocation3 + $0x2f8] sm:$0xff] }
 0xba4   :  { %5944 = vmatpush1.bf16.msra.mxu1 %v7265_v29  ;;  %v2544_v3 = vld [vmem:[#allocation3 + $0x6d8] sm:$0xff]  ;;  %v7346_v44 = vcombine.high %v2416_v61, %v2420_v35  ;;  %v7345_v50 = vcombine.low %v2416_v61, %v2420_v35 }
 0xba5   :  { %5945 = vmatprep.subr.bf16.mxu1 %v7258_v48  ;;  %v2548_v36 = vld [vmem:[#allocation3 + $0x6f8] sm:$0xff] }
 0xba6   :  { %5985 = vmatpush1.bf16.msra.mxu0 %v7393_v33  ;;  %v7474_v47 = vcombine.high %v2544_v3, %v2548_v36  ;;  %v2408_v29 = vld [vmem:[#allocation3 + $0x298] sm:$0xff]  ;;  %v7473_v51 = vcombine.low %v2544_v3, %v2548_v36 }
 0xba7   :  { %5986 = vmatprep.subr.bf16.mxu0 %v7386_v49  ;;  %v2412_v33 = vld [vmem:[#allocation3 + $0x2b8] sm:$0xff] }
 0xba8   :  { %5946 = vmatpush1.bf16.msra.mxu1 %v7257_v39  ;;  %v2536_v48 = vld [vmem:[#allocation3 + $0x698] sm:$0xff]  ;;  %v7338_v53 = vcombine.high %v2408_v29, %v2412_v33  ;;  %v7337_v4 = vcombine.low %v2408_v29, %v2412_v33 }
 0xba9   :  { %5947 = vmatprep.subr.bf16.mxu1 %v7378_v30  ;;  %v2540_v49 = vld [vmem:[#allocation3 + $0x6b8] sm:$0xff] }
 0xbaa   :  { %5987 = vmatpush1.bf16.msra.mxu0 %v7385_v41  ;;  %v7466_v22 = vcombine.high %v2536_v48, %v2540_v49  ;;  %v2400_v39 = vld [vmem:[#allocation3 + $0x258] sm:$0xff]  ;;  %v7465_v28 = vcombine.low %v2536_v48, %v2540_v49 }
 0xbab   :  { %5988 = vmatprep.subr.bf16.mxu0 %v7506_v8  ;;  %v2404_v41 = vld [vmem:[#allocation3 + $0x278] sm:$0xff] }
 0xbac   :  { %5948 = vmatpush2.bf16.msra.mxu1 %v7377_v20  ;;  %v2528_v30 = vld [vmem:[#allocation3 + $0x658] sm:$0xff]  ;;  %v7330_v34 = vcombine.high %v2400_v39, %v2404_v41  ;;  %v7329_v52 = vcombine.low %v2400_v39, %v2404_v41 }
 0xbad   :  { %5949 = vmatprep.subr.bf16.mxu1 %v7370_v57  ;;  %v2532_v8 = vld [vmem:[#allocation3 + $0x678] sm:$0xff] }
 0xbae   :  { %5989 = vmatpush2.bf16.msra.mxu0 %v7505_v26  ;;  %v7458_v42 = vcombine.high %v2528_v30, %v2532_v8  ;;  %v2392_v20 = vld [vmem:[#allocation3 + $0x218] sm:$0xff]  ;;  %v7457_v37 = vcombine.low %v2528_v30, %v2532_v8 }
 0xbaf   :  { %5990 = vmatprep.subr.bf16.mxu0 %v7498_v60  ;;  %v2396_v26 = vld [vmem:[#allocation3 + $0x238] sm:$0xff] }
 0xbb0   :  { %5950 = vmatpush2.bf16.msra.mxu1 %v7369_v6  ;;  %v2520_v57 = vld [vmem:[#allocation3 + $0x618] sm:$0xff]  ;;  %v7322_v7 = vcombine.high %v2392_v20, %v2396_v26  ;;  %v7321_v12 = vcombine.low %v2392_v20, %v2396_v26 }
 0xbb1   :  { %5951 = vmatprep.subr.bf16.mxu1 %v7362_v13  ;;  %v2524_v60 = vld [vmem:[#allocation3 + $0x638] sm:$0xff] }
 0xbb2   :  { %5991 = vmatpush2.bf16.msra.mxu0 %v7497_v56  ;;  %v7450_v54 = vcombine.high %v2520_v57, %v2524_v60  ;;  %v2640_v6 = vld [vmem:[#allocation3 + $0x9d8] sm:$0xff]  ;;  %v7449_v55 = vcombine.low %v2520_v57, %v2524_v60 }
 0xbb3   :  { %5992 = vmatprep.subr.bf16.mxu0 %v7490_v2  ;;  %v2644_v56 = vld [vmem:[#allocation3 + $0x9f8] sm:$0xff] }
 0xbb4   :  { %5952 = vmatpush2.bf16.msra.mxu1 %v7361_v14  ;;  %v2768_v13 = vld [vmem:[#allocation3 + $0xdd8] sm:$0xff]  ;;  %v7570_v32 = vcombine.high %v2640_v6, %v2644_v56  ;;  %v7569_v61 = vcombine.low %v2640_v6, %v2644_v56 }
 0xbb5   :  { %5953 = vmatprep.subr.bf16.mxu1 %v7354_v18  ;;  %v2772_v2 = vld [vmem:[#allocation3 + $0xdf8] sm:$0xff] }
 0xbb6   :  { %5993 = vmatpush2.bf16.msra.mxu0 %v7489_v31  ;;  %v7698_v38 = vcombine.high %v2768_v13, %v2772_v2  ;;  %v2632_v14 = vld [vmem:[#allocation3 + $0x998] sm:$0xff]  ;;  %v7697_v35 = vcombine.low %v2768_v13, %v2772_v2 }
 0xbb7   :  { %5994 = vmatprep.subr.bf16.mxu0 %v7482_v11  ;;  %v2636_v31 = vld [vmem:[#allocation3 + $0x9b8] sm:$0xff] }
 0xbb8   :  { %5954 = vmatpush2.bf16.msra.mxu1 %v7353_v62  ;;  %v2760_v18 = vld [vmem:[#allocation3 + $0xd98] sm:$0xff]  ;;  %v7562_v3 = vcombine.high %v2632_v14, %v2636_v31  ;;  %v7561_v49 = vcombine.low %v2632_v14, %v2636_v31 }
 0xbb9   :  { %5955 = vmatprep.subr.bf16.mxu1 %v7346_v44  ;;  %v2764_v11 = vld [vmem:[#allocation3 + $0xdb8] sm:$0xff] }
 0xbba   :  { %5995 = vmatpush2.bf16.msra.mxu0 %v7481_v40  ;;  %v7690_v36 = vcombine.high %v2760_v18, %v2764_v11  ;;  %v2624_v62 = vld [vmem:[#allocation3 + $0x958] sm:$0xff] }
 0xbbb   :  { %5996 = vmatprep.subr.bf16.mxu0 %v7474_v47  ;;  %v2628_v40 = vld [vmem:[#allocation3 + $0x978] sm:$0xff] }
 0xbbc   :  { %5956 = vmatpush2.bf16.msra.mxu1 %v7345_v50  ;;  %v2752_v47 = vld [vmem:[#allocation3 + $0xd58] sm:$0xff]  ;;  %v7553_v20 = vcombine.low %v2624_v62, %v2628_v40 }
 0xbbd   :  { %5957 = vmatprep.subr.bf16.mxu1 %v7338_v53  ;;  %v2756_v29 = vld [vmem:[#allocation3 + $0xd78] sm:$0xff]  ;;  %v7554_v53 = vcombine.high %v2624_v62, %v2628_v40 }
 0xbbe   :  { %5997 = vmatpush2.bf16.msra.mxu0 %v7473_v51  ;;  %v7689_v51 = vcombine.low %v2760_v18, %v2764_v11  ;;  %v2616_v30 = vld [vmem:[#allocation3 + $0x918] sm:$0xff]  ;;  %v7681_v26 = vcombine.low %v2752_v47, %v2756_v29 }
 0xbbf   :  { %5998 = vmatprep.subr.bf16.mxu0 %v7466_v22  ;;  %v2620_v8 = vld [vmem:[#allocation3 + $0x938] sm:$0xff] }
 0xbc0   :  { %5958 = vmatpush2.bf16.msra.mxu1 %v7337_v4  ;;  %v2748_v4 = vld [vmem:[#allocation3 + $0xd38] sm:$0xff]  ;;  %v7546_v57 = vcombine.high %v2616_v30, %v2620_v8  ;;  %v7545_v6 = vcombine.low %v2616_v30, %v2620_v8 }
 0xbc1   :  { %5959 = vmatprep.subr.bf16.mxu1 %v7330_v34  ;;  %v2832_v30 = vld [vmem:[#allocation3 + $0xfd8] sm:$0xff] }
 0xbc2   :  { %5999 = vmatpush2.bf16.msra.mxu0 %v7465_v28  ;;  %v2836_v8 = vld [vmem:[#allocation3 + $0xff8] sm:$0xff] }
 0xbc3   :  { %6000 = vmatprep.subr.bf16.mxu0 %v7458_v42 }
 0xbc4   :  { %5960 = vmatpush2.bf16.msra.mxu1 %v7329_v52 }
 0xbc5   :  { %5961 = vmatprep.subr.bf16.mxu1 %v7322_v7  ;;  %v2612_v7 = vld [vmem:[#allocation3 + $0x8f8] sm:$0xff] }
 0xbc6   :  { %6001 = vmatpush2.bf16.msra.mxu0 %v7457_v37  ;;  %v2608_v37 = vld [vmem:[#allocation3 + $0x8d8] sm:$0xff] }
 0xbc7   :  { %6002 = vmatprep.subr.bf16.mxu0 %v7450_v54  ;;  %v2740_v54 = vld [vmem:[#allocation3 + $0xcf8] sm:$0xff]  ;;  %v7538_v13 = vcombine.high %v2608_v37, %v2612_v7  ;;  %v7537_v14 = vcombine.low %v2608_v37, %v2612_v7 }
 0xbc8   :  { %5962 = vmatpush2.bf16.msra.mxu1 %v7321_v12  ;;  %v2600_v12 = vld [vmem:[#allocation3 + $0x898] sm:$0xff] }
 0xbc9   :  { %6013 = vmatprep.subr.bf16.mxu1 %v7570_v32  ;;  %v2728_v32 = vld [vmem:[#allocation3 + $0xc98] sm:$0xff] }
 0xbca   :  { %6003 = vmatpush2.bf16.msra.mxu0 %v7449_v55  ;;  %v2604_v55 = vld [vmem:[#allocation3 + $0x8b8] sm:$0xff] }
 0xbcb   :  { %6054 = vmatprep.subr.bf16.mxu0 %v7698_v38  ;;  %v5719_v44 = vpop.f32.mrf.mxu1  ;;  %5964 = vmatmul.mubr.bf16.vlgmr.msra.gmra.mxu1 %v9971_v58  ;;  %v7682_v58 = vcombine.high %v2752_v47, %v2756_v29  ;;  %v2732_v38 = vld [vmem:[#allocation3 + $0xcb8] sm:$0xff]  ;;  %v7530_v18 = vcombine.high %v2600_v12, %v2604_v55  ;;  %v7529_v62 = vcombine.low %v2600_v12, %v2604_v55 }
 0xbcc   :  { %v5720_v33 = vadd.f32 %v5719_v44, %v10043_v19  ;;  %6014 = vmatpush1.bf16.msra.mxu1 %v7569_v61  ;;  %6045 = vmatprep.mubr.bf16.mxu1 %v9981_v45  ;;  %v7658_v11 = vcombine.high %v2728_v32, %v2732_v38  ;;  %v2592_v61 = vld [vmem:[#allocation3 + $0x858] sm:$0xff]  ;;  %v7657_v40 = vcombine.low %v2728_v32, %v2732_v38 }
 0xbcd   :  { %v5760_v48 = vpop.f32.mrf.mxu0  ;;  %6005 = vmatmul.mubr.bf16.vlgmr.msra.gmra.mxu0 %v9976_v15  ;;  %v5721_v50 = vpop.f32.mrf.mxu1  ;;  %6015 = vmatprep.subr.bf16.mxu1 %v7562_v3  ;;  %v2744_v15 = vld [vmem:[#allocation3 + $0xd18] sm:$0xff] }
 0xbce   :  { %6055 = vmatpush1.bf16.msra.mxu0 %v7697_v35  ;;  %v10052_v22 = vadd.f32 %v5760_v48, %v5720_v33  ;;  %v5722_v39 = vadd.f32 %v5721_v50, %v10047_v10  ;;  %6086 = vmatprep.mubr.bf16.mxu0 %v9987_v46  ;;  %v7674_v52 = vcombine.high %v2744_v15, %v2748_v4  ;;  %v2736_v46 = vld [vmem:[#allocation3 + $0xcd8] sm:$0xff] }
 0xbcf   :  { %v5762_v41 = vpop.f32.mrf.mxu0  ;;  %6056 = vmatprep.subr.bf16.mxu0 %v7690_v36  ;;  %v5723_v19 = vpop.f32.mrf.mxu1  ;;  %v7673_v56 = vcombine.low %v2744_v15, %v2748_v4  ;;  %v7666_v2 = vcombine.high %v2736_v46, %v2740_v54  ;;  %v7665_v31 = vcombine.low %v2736_v46, %v2740_v54  ;;  %v2596_v35 = vld [vmem:[#allocation3 + $0x878] sm:$0xff] }
 0xbd0   :  { %v6097_v28 = vmax.f32 %v10052_v22, 0.0  ;;  %v10058_v34 = vadd.f32 %v5762_v41, %v5722_v39  ;;  %6016 = vmatpush1.bf16.msra.mxu1 %v7561_v49  ;;  %v2720_v3 = vld [vmem:[#allocation3 + $0xc58] sm:$0xff]  ;;  %v7522_v44 = vcombine.high %v2592_v61, %v2596_v35  ;;  %v7521_v50 = vcombine.low %v2592_v61, %v2596_v35 }
 0xbd1   :  { %v5764_v42 = vpop.f32.mrf.mxu0  ;;  %v5724_v10 = vpop.f32.mrf.mxu1  ;;  %6017 = vmatprep.subr.bf16.mxu1 %v7554_v53  ;;  %v2724_v36 = vld [vmem:[#allocation3 + $0xc78] sm:$0xff] }
 0xbd2   :  { %6057 = vmatpush1.bf16.msra.mxu0 %v7689_v51  ;;  %v6098_v60 = vmax.f32 %v10058_v34, 0.0  ;;  %v7650_v47 = vcombine.high %v2720_v3, %v2724_v36  ;;  %v2584_v29 = vld [vmem:[#allocation3 + $0x818] sm:$0xff]  ;;  %v7649_v51 = vcombine.low %v2720_v3, %v2724_v36  ;;  %v7762_v42 = vcombine.high %v2832_v30, %v2836_v8 }
 0xbd3   :  { %v5765_v45 = vpop.f32.mrf.mxu0  ;;  %6058 = vmatprep.subr.bf16.mxu0 %v7682_v58  ;;  %v2588_v33 = vld [vmem:[#allocation3 + $0x838] sm:$0xff] }
 0xbd4   :  { %6018 = vmatpush1.bf16.msra.mxu1 %v7553_v20  ;;  %v2712_v48 = vld [vmem:[#allocation3 + $0xc18] sm:$0xff]  ;;  %v7514_v53 = vcombine.high %v2584_v29, %v2588_v33  ;;  %v7513_v19 = vcombine.low %v2584_v29, %v2588_v33 }
 0xbd5   :  { %6019 = vmatprep.subr.bf16.mxu1 %v7546_v57  ;;  %v2716_v49 = vld [vmem:[#allocation3 + $0xc38] sm:$0xff] }
 0xbd6   :  { %6059 = vmatpush1.bf16.msra.mxu0 %v7681_v26  ;;  %v7642_v39 = vcombine.high %v2712_v48, %v2716_v49  ;;  %v2704_v41 = vld [vmem:[#allocation3 + $0xbd8] sm:$0xff]  ;;  %v7641_v15 = vcombine.low %v2712_v48, %v2716_v49 }
 0xbd7   :  { %6060 = vmatprep.subr.bf16.mxu0 %v7674_v52  ;;  %v2708_v58 = vld [vmem:[#allocation3 + $0xbf8] sm:$0xff]  ;;  %v7761_v52 = vcombine.low %v2832_v30, %v2836_v8 }
 0xbd8   :  { %6020 = vmatpush1.bf16.msra.mxu1 %v7545_v6  ;;  %v7634_v4 = vcombine.high %v2704_v41, %v2708_v58  ;;  %v2696_v20 = vld [vmem:[#allocation3 + $0xb98] sm:$0xff]  ;;  %v7633_v45 = vcombine.low %v2704_v41, %v2708_v58 }
 0xbd9   :  { %6021 = vmatprep.subr.bf16.mxu1 %v7538_v13  ;;  %v2700_v10 = vld [vmem:[#allocation3 + $0xbb8] sm:$0xff] }
 0xbda   :  { %6061 = vmatpush1.bf16.msra.mxu0 %v7673_v56  ;;  %v2824_v26 = vld [vmem:[#allocation3 + $0xf98] sm:$0xff]  ;;  %v7626_v37 = vcombine.high %v2696_v20, %v2700_v10  ;;  %v7625_v13 = vcombine.low %v2696_v20, %v2700_v10 }
 0xbdb   :  { %6062 = vmatprep.subr.bf16.mxu0 %v7666_v2  ;;  %v2828_v57 = vld [vmem:[#allocation3 + $0xfb8] sm:$0xff] }
 0xbdc   :  { %6022 = vmatpush1.bf16.msra.mxu1 %v7537_v14  ;;  %v7754_v7 = vcombine.high %v2824_v26, %v2828_v57  ;;  %v2688_v46 = vld [vmem:[#allocation3 + $0xb58] sm:$0xff]  ;;  %v7753_v2 = vcombine.low %v2824_v26, %v2828_v57 }
 0xbdd   :  { %6023 = vmatprep.subr.bf16.mxu1 %v7530_v18  ;;  %v2692_v54 = vld [vmem:[#allocation3 + $0xb78] sm:$0xff] }
 0xbde   :  { %6063 = vmatpush1.bf16.msra.mxu0 %v7665_v31  ;;  %v2816_v6 = vld [vmem:[#allocation3 + $0xf58] sm:$0xff]  ;;  %v7618_v12 = vcombine.high %v2688_v46, %v2692_v54  ;;  %v7617_v18 = vcombine.low %v2688_v46, %v2692_v54 }
 0xbdf   :  { %6064 = vmatprep.subr.bf16.mxu0 %v7658_v11  ;;  %v2820_v56 = vld [vmem:[#allocation3 + $0xf78] sm:$0xff] }
 0xbe0   :  { %6024 = vmatpush1.bf16.msra.mxu1 %v7529_v62  ;;  %v7746_v55 = vcombine.high %v2816_v6, %v2820_v56  ;;  %v2680_v32 = vld [vmem:[#allocation3 + $0xb18] sm:$0xff]  ;;  %v7745_v11 = vcombine.low %v2816_v6, %v2820_v56 }
 0xbe1   :  { %6025 = vmatprep.subr.bf16.mxu1 %v7522_v44  ;;  %v2684_v38 = vld [vmem:[#allocation3 + $0xb38] sm:$0xff] }
 0xbe2   :  { %6065 = vmatpush1.bf16.msra.mxu0 %v7657_v40  ;;  %v2808_v14 = vld [vmem:[#allocation3 + $0xf18] sm:$0xff]  ;;  %v7610_v61 = vcombine.high %v2680_v32, %v2684_v38  ;;  %v7609_v44 = vcombine.low %v2680_v32, %v2684_v38 }
 0xbe3   :  { %6066 = vmatprep.subr.bf16.mxu0 %v7650_v47  ;;  %v2812_v31 = vld [vmem:[#allocation3 + $0xf38] sm:$0xff] }
 0xbe4   :  { %6026 = vmatpush1.bf16.msra.mxu1 %v7521_v50  ;;  %v7738_v35 = vcombine.high %v2808_v14, %v2812_v31  ;;  %v2672_v3 = vld [vmem:[#allocation3 + $0xad8] sm:$0xff]  ;;  %v7737_v47 = vcombine.low %v2808_v14, %v2812_v31 }
 0xbe5   :  { %6027 = vmatprep.subr.bf16.mxu1 %v7514_v53  ;;  %v2676_v36 = vld [vmem:[#allocation3 + $0xaf8] sm:$0xff] }
 0xbe6   :  { %6067 = vmatpush1.bf16.msra.mxu0 %v7649_v51  ;;  %v2800_v62 = vld [vmem:[#allocation3 + $0xed8] sm:$0xff]  ;;  %v7602_v29 = vcombine.high %v2672_v3, %v2676_v36  ;;  %v7601_v53 = vcombine.low %v2672_v3, %v2676_v36 }
 0xbe7   :  { %6068 = vmatprep.subr.bf16.mxu0 %v7642_v39  ;;  %v2804_v40 = vld [vmem:[#allocation3 + $0xef8] sm:$0xff] }
 0xbe8   :  { %6028 = vmatpush1.bf16.msra.mxu1 %v7513_v19  ;;  %v7730_v33 = vcombine.high %v2800_v62, %v2804_v40  ;;  %v2664_v48 = vld [vmem:[#allocation3 + $0xa98] sm:$0xff]  ;;  %v7729_v39 = vcombine.low %v2800_v62, %v2804_v40 }
 0xbe9   :  { %6029 = vmatprep.subr.bf16.mxu1 %v7634_v4  ;;  %v2668_v49 = vld [vmem:[#allocation3 + $0xab8] sm:$0xff] }
 0xbea   :  { %6069 = vmatpush1.bf16.msra.mxu0 %v7641_v15  ;;  %v2792_v50 = vld [vmem:[#allocation3 + $0xe98] sm:$0xff]  ;;  %v7594_v41 = vcombine.high %v2664_v48, %v2668_v49  ;;  %v7593_v4 = vcombine.low %v2664_v48, %v2668_v49 }
 0xbeb   :  { %6070 = vmatprep.subr.bf16.mxu0 %v7762_v42  ;;  %v2796_v51 = vld [vmem:[#allocation3 + $0xeb8] sm:$0xff] }
 0xbec   :  { %6030 = vmatpush2.bf16.msra.mxu1 %v7633_v45  ;;  %v7722_v58 = vcombine.high %v2792_v50, %v2796_v51  ;;  %v2656_v30 = vld [vmem:[#allocation3 + $0xa58] sm:$0xff]  ;;  %v7721_v42 = vcombine.low %v2792_v50, %v2796_v51 }
 0xbed   :  { %6031 = vmatprep.subr.bf16.mxu1 %v7626_v37  ;;  %v2660_v8 = vld [vmem:[#allocation3 + $0xa78] sm:$0xff] }
 0xbee   :  { %6071 = vmatpush2.bf16.msra.mxu0 %v7761_v52  ;;  %v2784_v19 = vld [vmem:[#allocation3 + $0xe58] sm:$0xff]  ;;  %v7586_v20 = vcombine.high %v2656_v30, %v2660_v8  ;;  %v7585_v37 = vcombine.low %v2656_v30, %v2660_v8 }
 0xbef   :  { %6072 = vmatprep.subr.bf16.mxu0 %v7754_v7  ;;  %v2788_v15 = vld [vmem:[#allocation3 + $0xe78] sm:$0xff] }
 0xbf0   :  { %6032 = vmatpush2.bf16.msra.mxu1 %v7625_v13  ;;  %v7714_v10 = vcombine.high %v2784_v19, %v2788_v15  ;;  %v2648_v26 = vld [vmem:[#allocation3 + $0xa18] sm:$0xff]  ;;  %v7713_v7 = vcombine.low %v2784_v19, %v2788_v15  ;;  %v8467_v13 = vld [vmem:[#allocation20] sm:$0xff] }
 0xbf1   :  { %6033 = vmatprep.subr.bf16.mxu1 %v7618_v12  ;;  %v2652_v57 = vld [vmem:[#allocation3 + $0xa38] sm:$0xff]  ;;  %v2862_v12 = vrot.slane %v8467_v13, %v1914_v21 }
 0xbf2   :  { %6073 = vmatpush2.bf16.msra.mxu0 %v7753_v2  ;;  %v2776_v45 = vld [vmem:[#allocation3 + $0xe18] sm:$0xff]  ;;  %v7578_v46 = vcombine.high %v2648_v26, %v2652_v57  ;;  %v7577_v6 = vcombine.low %v2648_v26, %v2652_v57  ;;  %v2858_v2 = vrot.slane %v8467_v13, %v1910_v16 }
 0xbf3   :  { %6074 = vmatprep.subr.bf16.mxu0 %v7746_v55  ;;  %v2780_v52 = vld [vmem:[#allocation3 + $0xe38] sm:$0xff] }
 0xbf4   :  { %6034 = vmatpush2.bf16.msra.mxu1 %v7617_v18  ;;  %v7706_v54 = vcombine.high %v2776_v45, %v2780_v52  ;;  %v7705_v56 = vcombine.low %v2776_v45, %v2780_v52 }
 0xbf5   :  { %6035 = vmatprep.subr.bf16.mxu1 %v7610_v61 }
 0xbf6   :  { %6075 = vmatpush2.bf16.msra.mxu0 %v7745_v11 }
 0xbf7   :  { %6076 = vmatprep.subr.bf16.mxu0 %v7738_v35 }
 0xbf8   :  { %6036 = vmatpush2.bf16.msra.mxu1 %v7609_v44 }
 0xbf9   :  { %6037 = vmatprep.subr.bf16.mxu1 %v7602_v29 }
 0xbfa   :  { %6077 = vmatpush2.bf16.msra.mxu0 %v7737_v47 }
 0xbfb   :  { %6078 = vmatprep.subr.bf16.mxu0 %v7730_v33 }
 0xbfc   :  { %6038 = vmatpush2.bf16.msra.mxu1 %v7601_v53 }
 0xbfd   :  { %6039 = vmatprep.subr.bf16.mxu1 %v7594_v41 }
 0xbfe   :  { %6079 = vmatpush2.bf16.msra.mxu0 %v7729_v39 }
 0xbff   :  { %6080 = vmatprep.subr.bf16.mxu0 %v7722_v58 }
 0xc00   :  { %6040 = vmatpush2.bf16.msra.mxu1 %v7593_v4 }
 0xc01   :  { %6041 = vmatprep.subr.bf16.mxu1 %v7586_v20  ;;  %v2870_v20 = vrot.slane %v8467_v13, %v1922_v24 }
 0xc02   :  { %6081 = vmatpush2.bf16.msra.mxu0 %v7721_v42  ;;  %v2866_v42 = vrot.slane %v8467_v13, %v1918_v17 }
 0xc03   :  { %6082 = vmatprep.subr.bf16.mxu0 %v7714_v10 }
 0xc04   :  { %6042 = vmatpush2.bf16.msra.mxu1 %v7585_v37 }
 0xc05   :  { %6043 = vmatprep.subr.bf16.mxu1 %v7578_v46 }
 0xc06   :  { %6083 = vmatpush2.bf16.msra.mxu0 %v7713_v7 }
 0xc07   :  { %6084 = vmatprep.subr.bf16.mxu0 %v7706_v54 }
 0xc08   :  { %6044 = vmatpush2.bf16.msra.mxu1 %v7577_v6 }
 0xc0a   :  { %6085 = vmatpush2.bf16.msra.mxu0 %v7705_v56 }
 0xc0b   :  { %v5801_v55 = vpop.f32.mrf.mxu1  ;;  %6046 = vmatmul.mubr.bf16.vlgmr.msra.gmra.mxu1 %v9995_v25 }
 0xc0c   :  { %v5802_v32 = vadd.f32 %v5801_v55, %v2858_v2 }
 0xc0d   :  { %v5842_v38 = vpop.f32.mrf.mxu0  ;;  %6087 = vmatmul.mubr.bf16.vlgmr.msra.gmra.mxu0 %v10000_v9  ;;  %v5803_v14 = vpop.f32.mrf.mxu1 }
 0xc0e   :  { %v5843_v31 = vadd.f32 %v5842_v38, %v5802_v32  ;;  %v5804_v18 = vadd.f32 %v5803_v14, %v2862_v12 }
 0xc0f   :  { %v5844_v11 = vpop.f32.mrf.mxu0  ;;  %v5805_v61 = vpop.f32.mrf.mxu1 }
 0xc10   :  { %v5845_v35 = vadd.f32 %v5844_v11, %v5804_v18 }
 0xc11   :  { %v5846_v3 = vpop.f32.mrf.mxu0  ;;  %v5806_v36 = vpop.f32.mrf.mxu1 }
 0xc13   :  { %v5847_v16 = vpop.f32.mrf.mxu0 }
 0xc4b   :  { %v5883_v62 = vpop.f32.mrf.mxu1 }
 0xc4c   :  { %v5884_v40 = vadd.f32 %v5883_v62, %v5843_v31 }
 0xc4d   :  { %v5924_v44 = vpop.f32.mrf.mxu0  ;;  %v5885_v21 = vpop.f32.mrf.mxu1 }
 0xc4e   :  { %v10067_v47 = vadd.f32 %v5924_v44, %v5884_v40  ;;  %v5886_v25 = vadd.f32 %v5885_v21, %v5845_v35 }
 0xc4f   :  { %v5926_v29 = vpop.f32.mrf.mxu0  ;;  %v5887_v33 = vpop.f32.mrf.mxu1 }
 0xc50   :  { %v6099_v9 = vmax.f32 %v10067_v47, 0.0  ;;  %v10070_v48 = vadd.f32 %v5926_v29, %v5886_v25 }
 0xc51   :  { %v5928_v49 = vpop.f32.mrf.mxu0  ;;  %v5888_v50 = vpop.f32.mrf.mxu1 }
 0xc52   :  { %v6100_v51 = vmax.f32 %v10070_v48, 0.0 }
 0xc53   :  { %v5929_v53 = vpop.f32.mrf.mxu0 }
 0xc8b   :  { %v5965_v39 = vpop.f32.mrf.mxu1 }
 0xc8c   :  { %v5966_v10 = vadd.f32 %v5965_v39, %v2866_v42 }
 0xc8d   :  { %v6006_v41 = vpop.f32.mrf.mxu0  ;;  %v5967_v58 = vpop.f32.mrf.mxu1 }
 0xc8e   :  { %v5968_v26 = vadd.f32 %v5967_v58, %v2870_v20  ;;  %v6007_v57 = vadd.f32 %v6006_v41, %v5966_v10 }
 0xc8f   :  { %v6008_v30 = vpop.f32.mrf.mxu0  ;;  %v5969_v8 = vpop.f32.mrf.mxu1 }
 0xc90   :  { %v6009_v52 = vadd.f32 %v6008_v30, %v5968_v26 }
 0xc91   :  { %v6010_v19 = vpop.f32.mrf.mxu0  ;;  %v5970_v15 = vpop.f32.mrf.mxu1 }
 0xc93   :  { %v6011_v4 = vpop.f32.mrf.mxu0 }
 0xccb   :  { %v6047_v45 = vpop.f32.mrf.mxu1 }
 0xccc   :  { %v6048_v37 = vadd.f32 %v6047_v45, %v6007_v57 }
 0xccd   :  { %v6088_v7 = vpop.f32.mrf.mxu0  ;;  %v6049_v46 = vpop.f32.mrf.mxu1 }
 0xcce   :  { %v10077_v54 = vadd.f32 %v6088_v7, %v6048_v37  ;;  %v6050_v6 = vadd.f32 %v6049_v46, %v6009_v52 }
 0xccf   :  { %v6090_v56 = vpop.f32.mrf.mxu0  ;;  %v6051_v2 = vpop.f32.mrf.mxu1 }
 0xcd0   :  { %v6101_v12 = vmax.f32 %v10077_v54, 0.0  ;;  %v10080_v55 = vadd.f32 %v6090_v56, %v6050_v6 }
 0xcd1   :  { %v6092_v17 = vpop.f32.mrf.mxu0  ;;  %v6052_v59 = vpop.f32.mrf.mxu1 }
 0xcd2   :  { %v6102_v24 = vmax.f32 %v10080_v55, 0.0 }
 0xcd3   :  { %v6093_v13 = vpop.f32.mrf.mxu0 }
 0xcd4   :  { %8934 = dma.done.wait [#allocation5 + $0x2], 8192 }
 0xcd5   :  { %8935 = vsyncadd [#allocation5 + $0x2], 4294959104  ;;  %v6107_v32 = vpack.c.bf16 %v6096_v43, %v6096_v43  ;;  %v6109_v38 = vpack.c.bf16 %v6098_v60, %v6098_v60  ;;  %v8468_v14 = vld [vmem:[#allocation4 + $0x78] sm:$0xff]   ;;  %v8472_v61 = vld [vmem:[#allocation4 + $0x70] sm:$0xff]   ;;  %v6106_v20 = vpack.c.bf16 %v6095_v1, %v6095_v1  ;;  %v6108_v10 = vpack.c.bf16 %v6097_v28, %v6097_v28  ;;  %s8965_s4 = smov 64  }
 0xcd6   :  { %v8469_v31 = vld [vmem:[#allocation4 + $0xf8] sm:$0xff]   ;;  %7920 = vmatprep.subr.bf16.mxu1 %v8468_v14  ;;  %v8473_v35 = vld [vmem:[#allocation4 + $0xf0] sm:$0xff]   ;;  %v8476_v34 = vld [vmem:[#allocation4 + $0x68] sm:$0xff]   ;;  %v6111_v45 = vpack.c.bf16 %v6100_v51, %v6100_v51  ;;  %v6113_v63 = vpack.c.bf16 %v6102_v24, %v6102_v24 }
 0xcd7   :  { %6665 = vmatprep.mubr.bf16.mxu1 %v6107_v32  ;;  %6705 = vmatprep.mubr.bf16.mxu0 %v6109_v38  ;;  %v8470_v18 = vld [vmem:[#allocation4 + $0x38] sm:$0xff]   ;;  %v8474_v27 = vld [vmem:[#allocation4 + $0x30] sm:$0xff]   ;;  %v8477_v60 = vld [vmem:[#allocation4 + $0xe8] sm:$0xff]  }
 0xcd8   :  { %7942 = vmatprep.subr.bf16.mxu0 %v8469_v31  ;;  %v8471_v11 = vld [vmem:[#allocation4 + $0xb8] sm:$0xff]   ;;  %7921 = vmatpush3.bf16.msra.mxu1 %v8470_v18  ;;  %v8475_v43 = vld [vmem:[#allocation4 + $0xb0] sm:$0xff]   ;;  %v8478_v3 = vld [vmem:[#allocation4 + $0x28] sm:$0xff]  }
 0xcd9   :  { %7943 = vmatpush3.bf16.msra.mxu0 %v8471_v11  ;;  %7922 = vmatprep.subr.bf16.mxu1 %v8472_v61  ;;  %v8479_v36 = vld [vmem:[#allocation4 + $0xa8] sm:$0xff]   ;;  %v8480_v16 = vld [vmem:[#allocation4 + $0x60] sm:$0xff]   ;;  %v8484_v21 = vld [vmem:[#allocation4 + $0x58] sm:$0xff]  }
 0xcda   :  { %7944 = vmatprep.subr.bf16.mxu0 %v8473_v35  ;;  %v8481_v62 = vld [vmem:[#allocation4 + $0xe0] sm:$0xff]   ;;  %v8485_v25 = vld [vmem:[#allocation4 + $0xd8] sm:$0xff]   ;;  %v8488_v49 = vld [vmem:[#allocation4 + $0x50] sm:$0xff]  }
 0xcdb   :  { %v8482_v40 = vld [vmem:[#allocation4 + $0x20] sm:$0xff]   ;;  %v8486_v29 = vld [vmem:[#allocation4 + $0x18] sm:$0xff]   ;;  %v8489_v50 = vld [vmem:[#allocation4 + $0xd0] sm:$0xff]  }
 0xcdc   :  { %7923 = vmatpush3.bf16.msra.mxu1 %v8474_v27  ;;  %v8483_v44 = vld [vmem:[#allocation4 + $0xa0] sm:$0xff]   ;;  %v8487_v33 = vld [vmem:[#allocation4 + $0x98] sm:$0xff]   ;;  %v8490_v53 = vld [vmem:[#allocation4 + $0x10] sm:$0xff]  }
 0xcdd   :  { %7945 = vmatpush3.bf16.msra.mxu0 %v8475_v43  ;;  %7924 = vmatprep.subr.bf16.mxu1 %v8476_v34  ;;  %v8491_v39 = vld [vmem:[#allocation4 + $0x90] sm:$0xff]   ;;  %v8492_v41 = vld [vmem:[#allocation4 + $0x48] sm:$0xff]   ;;  %v8496_v19 = vld [vmem:[#allocation4 + $0x40] sm:$0xff]  }
 0xcde   :  { %7946 = vmatprep.subr.bf16.mxu0 %v8477_v60  ;;  %v8493_v58 = vld [vmem:[#allocation4 + $0xc8] sm:$0xff]   ;;  %v8497_v15 = vld [vmem:[#allocation4 + $0xc0] sm:$0xff]   ;;  %v8500_v26 = vld [vmem:[#allocation4 + $0x178] sm:$0xff]  }
 0xcdf   :  { %v8494_v30 = vld [vmem:[#allocation4 + $0x8] sm:$0xff]   ;;  %v8498_v4 = vld [vmem:[#allocation4] sm:$0xff]   ;;  %v8501_v57 = vld [vmem:[#allocation4 + $0x1f8] sm:$0xff]  }
 0xce0   :  { %7925 = vmatpush3.bf16.msra.mxu1 %v8478_v3  ;;  %v8495_v8 = vld [vmem:[#allocation4 + $0x88] sm:$0xff]   ;;  %v8499_v42 = vld [vmem:[#allocation4 + $0x80] sm:$0xff]   ;;  %v8502_v52 = vld [vmem:[#allocation4 + $0x138] sm:$0xff]  }
 0xce1   :  { %7947 = vmatpush3.bf16.msra.mxu0 %v8479_v36  ;;  %7926 = vmatprep.subr.bf16.mxu1 %v8480_v16  ;;  %v8503_v1 = vld [vmem:[#allocation4 + $0x1b8] sm:$0xff]   ;;  %v8504_v22 = vld [vmem:[#allocation4 + $0x170] sm:$0xff]   ;;  %v8508_v51 = vld [vmem:[#allocation4 + $0x168] sm:$0xff]   ;;  %v6110_v36 = vpack.c.bf16 %v6099_v9, %v6099_v9  ;;  %v6112_v16 = vpack.c.bf16 %v6101_v12, %v6101_v12 }
 0xce2   :  { %7948 = vmatprep.subr.bf16.mxu0 %v8481_v62  ;;  %v8505_v28 = vld [vmem:[#allocation4 + $0x1f0] sm:$0xff]   ;;  %v8509_v7 = vld [vmem:[#allocation4 + $0x1e8] sm:$0xff]   ;;  %v8512_v56 = vld [vmem:[#allocation4 + $0x160] sm:$0xff]  }
 0xce3   :  { %v8506_v37 = vld [vmem:[#allocation4 + $0x130] sm:$0xff]   ;;  %v8510_v46 = vld [vmem:[#allocation4 + $0x128] sm:$0xff]   ;;  %v8513_v2 = vld [vmem:[#allocation4 + $0x1e0] sm:$0xff]  }
 0xce4   :  { %7927 = vmatpush3.bf16.msra.mxu1 %v8482_v40  ;;  %v8507_v48 = vld [vmem:[#allocation4 + $0x1b0] sm:$0xff]   ;;  %v8511_v6 = vld [vmem:[#allocation4 + $0x1a8] sm:$0xff]   ;;  %v8514_v55 = vld [vmem:[#allocation4 + $0x120] sm:$0xff]  }
 0xce5   :  { %7949 = vmatpush3.bf16.msra.mxu0 %v8483_v44  ;;  %7928 = vmatprep.subr.bf16.mxu1 %v8484_v21  ;;  %v8515_v17 = vld [vmem:[#allocation4 + $0x1a0] sm:$0xff]   ;;  %v8516_v59 = vld [vmem:[#allocation4 + $0x158] sm:$0xff]   ;;  %v8520_v38 = vld [vmem:[#allocation4 + $0x150] sm:$0xff]  }
 0xce6   :  { %7950 = vmatprep.subr.bf16.mxu0 %v8485_v25  ;;  %v8517_v24 = vld [vmem:[#allocation4 + $0x1d8] sm:$0xff]   ;;  %v8521_v14 = vld [vmem:[#allocation4 + $0x1d0] sm:$0xff]   ;;  %v8524_v11 = vld [vmem:[#allocation4 + $0x148] sm:$0xff]  }
 0xce7   :  { %v8518_v13 = vld [vmem:[#allocation4 + $0x118] sm:$0xff]   ;;  %v8522_v31 = vld [vmem:[#allocation4 + $0x110] sm:$0xff]   ;;  %v8525_v61 = vld [vmem:[#allocation4 + $0x1c8] sm:$0xff]  }
 0xce8   :  { %7929 = vmatpush3.bf16.msra.mxu1 %v8486_v29  ;;  %v8519_v32 = vld [vmem:[#allocation4 + $0x198] sm:$0xff]   ;;  %v8523_v18 = vld [vmem:[#allocation4 + $0x190] sm:$0xff]   ;;  %v8526_v35 = vld [vmem:[#allocation4 + $0x108] sm:$0xff]  }
 0xce9   :  { %7951 = vmatpush3.bf16.msra.mxu0 %v8487_v33  ;;  %7930 = vmatprep.subr.bf16.mxu1 %v8488_v49  ;;  %v8527_v27 = vld [vmem:[#allocation4 + $0x188] sm:$0xff]   ;;  %v8528_v43 = vld [vmem:[#allocation4 + $0x140] sm:$0xff]  }
 0xcea   :  { %7952 = vmatprep.subr.bf16.mxu0 %v8489_v50  ;;  %v8529_v34 = vld [vmem:[#allocation4 + $0x1c0] sm:$0xff]   ;;  %v7763_v29 = vld [vmem:[#allocation21] ss:$0 sm:$0xff] }
 0xceb   :  { %v8530_v60 = vld [vmem:[#allocation4 + $0x100] sm:$0xff]  }
 0xcec   :  { %7931 = vmatpush3.bf16.msra.mxu1 %v8490_v53  ;;  %v8531_v3 = vld [vmem:[#allocation4 + $0x180] sm:$0xff]  }
 0xced   :  { %7953 = vmatpush3.bf16.msra.mxu0 %v8491_v39  ;;  %7932 = vmatprep.subr.bf16.mxu1 %v8492_v41  ;;  %v6806_v53 = vld [vmem:[#allocation23 + $0x38] sm:$0xff]  ;;  %v6805_v39 = vld [vmem:[#allocation23 + $0x30] sm:$0xff] }
 0xcee   :  { %7954 = vmatprep.subr.bf16.mxu0 %v8493_v58 }
 0xcf0   :  { %7933 = vmatpush3.bf16.msra.mxu1 %v8494_v30  ;;  %v6804_v30 = vld [vmem:[#allocation23 + $0x28] sm:$0xff] }
 0xcf1   :  { %7955 = vmatpush3.bf16.msra.mxu0 %v8495_v8  ;;  %7934 = vmatprep.subr.bf16.mxu1 %v8496_v19 }
 0xcf2   :  { %7956 = vmatprep.subr.bf16.mxu0 %v8497_v15 }
 0xcf4   :  { %7935 = vmatpush3.bf16.msra.mxu1 %v8498_v4 }
 0xcf5   :  { %7957 = vmatpush3.bf16.msra.mxu0 %v8499_v42  ;;  %7964 = vmatprep.subr.bf16.mxu1 %v8500_v26  ;;  %v6803_v42 = vld [vmem:[#allocation23 + $0x20] sm:$0xff] }
 0xcf6   :  { %7986 = vmatprep.subr.bf16.mxu0 %v8501_v57 }
 0xcf7   :  { %6666 = vmatmul.mubr.bf16.vlgmr.msra.gmra.mxu1 %v6106_v20 }
 0xcf8   :  { %6706 = vmatmul.mubr.bf16.vlgmr.msra.gmra.mxu0 %v6108_v10  ;;  %7965 = vmatpush3.bf16.msra.mxu1 %v8502_v52 }
 0xcf9   :  { %7987 = vmatpush3.bf16.msra.mxu0 %v8503_v1  ;;  %6745 = vmatprep.mubr.bf16.mxu1 %v6111_v45  ;;  %v6802_v45 = vld [vmem:[#allocation23 + $0x18] sm:$0xff]  ;;  %v6801_v1 = vld [vmem:[#allocation23 + $0x10] sm:$0xff] }
 0xcfa   :  { %7966 = vmatprep.subr.bf16.mxu1 %v8504_v22  ;;  %6785 = vmatprep.mubr.bf16.mxu0 %v6113_v63  ;;  %v6800_v22 = vld [vmem:[#allocation23 + $0x8] sm:$0xff] }
 0xcfb   :  { %7988 = vmatprep.subr.bf16.mxu0 %v8505_v28  ;;  %v6799_v28 = vld [vmem:[#allocation23] sm:$0xff] }
 0xcfc   :  { %7967 = vmatpush3.bf16.msra.mxu1 %v8506_v37  ;;  %v6897_v37 = vld [vmem:[#allocation26 + $0x38] sm:$0xff] }
 0xcfd   :  { %7989 = vmatpush3.bf16.msra.mxu0 %v8507_v48  ;;  %7968 = vmatprep.subr.bf16.mxu1 %v8508_v51  ;;  %v6896_v48 = vld [vmem:[#allocation26 + $0x30] sm:$0xff]  ;;  %v6895_v51 = vld [vmem:[#allocation26 + $0x28] sm:$0xff] }
 0xcfe   :  { %7990 = vmatprep.subr.bf16.mxu0 %v8509_v7  ;;  %v6894_v7 = vld [vmem:[#allocation26 + $0x20] sm:$0xff] }
 0xd00   :  { %7969 = vmatpush3.bf16.msra.mxu1 %v8510_v46  ;;  %v6893_v46 = vld [vmem:[#allocation26 + $0x18] sm:$0xff] }
 0xd01   :  { %7991 = vmatpush3.bf16.msra.mxu0 %v8511_v6  ;;  %7970 = vmatprep.subr.bf16.mxu1 %v8512_v56 }
 0xd02   :  { %7992 = vmatprep.subr.bf16.mxu0 %v8513_v2 }
 0xd04   :  { %7971 = vmatpush3.bf16.msra.mxu1 %v8514_v55 }
 0xd05   :  { %7993 = vmatpush3.bf16.msra.mxu0 %v8515_v17  ;;  %7972 = vmatprep.subr.bf16.mxu1 %v8516_v59  ;;  %v6892_v17 = vld [vmem:[#allocation26 + $0x10] sm:$0xff]  ;;  %v6891_v59 = vld [vmem:[#allocation26 + $0x8] sm:$0xff] }
 0xd06   :  { %7994 = vmatprep.subr.bf16.mxu0 %v8517_v24  ;;  %v6890_v24 = vld [vmem:[#allocation26] sm:$0xff] }
 0xd08   :  { %7973 = vmatpush3.bf16.msra.mxu1 %v8518_v13  ;;  %v6984_v13 = vld [vmem:[%s10190_s16 + $0x28] sm:$0xff] }
 0xd09   :  { %7995 = vmatpush3.bf16.msra.mxu0 %v8519_v32  ;;  %7974 = vmatprep.subr.bf16.mxu1 %v8520_v38  ;;  %v6983_v32 = vld [vmem:[%s10190_s16 + $0x20] sm:$0xff]  ;;  %v6982_v38 = vld [vmem:[%s10190_s16 + $0x18] sm:$0xff] }
 0xd0a   :  { %7996 = vmatprep.subr.bf16.mxu0 %v8521_v14  ;;  %v7828_v14 = vld [vmem:[#allocation24] ss:$0 sm:$0xff] }
 0xd0c   :  { %7975 = vmatpush3.bf16.msra.mxu1 %v8522_v31 }
 0xd0d   :  { %7997 = vmatpush3.bf16.msra.mxu0 %v8523_v18  ;;  %7976 = vmatprep.subr.bf16.mxu1 %v8524_v11 }
 0xd0e   :  { %7998 = vmatprep.subr.bf16.mxu0 %v8525_v61 }
 0xd10   :  { %7977 = vmatpush3.bf16.msra.mxu1 %v8526_v35  ;;  %v6981_v35 = vld [vmem:[%s10190_s16 + $0x10] sm:$0xff] }
 0xd11   :  { %7999 = vmatpush3.bf16.msra.mxu0 %v8527_v27  ;;  %7978 = vmatprep.subr.bf16.mxu1 %v8528_v43  ;;  %v6980_v27 = vld [vmem:[%s10190_s16 + $0x8] sm:$0xff]  ;;  %v6979_v43 = vld [vmem:[%s10190_s16] sm:$0xff] }
 0xd12   :  { %8000 = vmatprep.subr.bf16.mxu0 %v8529_v34  ;;  %v7830_v34 = vld [vmem:[#allocation27] ss:$0 sm:$0xff] }
 0xd14   :  { %7979 = vmatpush3.bf16.msra.mxu1 %v8530_v60 }
 0xd15   :  { %8001 = vmatpush3.bf16.msra.mxu0 %v8531_v3  ;;  %8218 = vmatprep.subr.mxu1 %v10234_v5 }
 0xd16   :  { %8237 = vmatprep.subr.mxu0 %v10234_v5 }
 0xd17   :  { %6746 = vmatmul.mubr.bf16.vlgmr.msra.gmra.mxu1 %v6110_v36 }
 0xd18   :  { %6786 = vmatmul.mubr.bf16.vlgmr.msra.gmra.mxu0 %v6112_v16  ;;  %8234 = vmatprep.mubr.msk.f32.mxu1 %vm8963_vm2, %v10234_v5 }
 0xd19   :  { %8253 = vmatprep.mubr.msk.f32.mxu0 %vm8963_vm2, %v10234_v5  ;;  %8219 = vmatpush3.msra.mxu1 %v6806_v53 }
 0xd1a   :  { %8220 = vmatprep.subr.mxu1 %v10234_v5  ;;  %8238 = vmatpush3.msra.mxu0 %v6897_v37 }
 0xd1b   :  { %8221 = vmatpush3.msra.mxu1 %v6805_v39  ;;  %8239 = vmatprep.subr.mxu0 %v10234_v5 }
 0xd1c   :  { %8222 = vmatprep.subr.mxu1 %v10234_v5  ;;  %8240 = vmatpush3.msra.mxu0 %v6896_v48 }
 0xd1d   :  { %8223 = vmatpush3.msra.mxu1 %v6804_v30  ;;  %8241 = vmatprep.subr.mxu0 %v10234_v5 }
 0xd1e   :  { %8224 = vmatprep.subr.mxu1 %v10234_v5  ;;  %8242 = vmatpush3.msra.mxu0 %v6895_v51 }
 0xd1f   :  { %8225 = vmatpush3.msra.mxu1 %v6803_v42  ;;  %8243 = vmatprep.subr.mxu0 %v10234_v5 }
 0xd20   :  { %8226 = vmatprep.subr.mxu1 %v10234_v5  ;;  %8244 = vmatpush3.msra.mxu0 %v6894_v7 }
 0xd21   :  { %8227 = vmatpush3.msra.mxu1 %v6802_v45  ;;  %8245 = vmatprep.subr.mxu0 %v10234_v5 }
 0xd22   :  { %8228 = vmatprep.subr.mxu1 %v10234_v5  ;;  %8246 = vmatpush3.msra.mxu0 %v6893_v46 }
 0xd23   :  { %8229 = vmatpush3.msra.mxu1 %v6801_v1  ;;  %8247 = vmatprep.subr.mxu0 %v10234_v5 }
 0xd24   :  { %8230 = vmatprep.subr.mxu1 %v10234_v5  ;;  %8248 = vmatpush3.msra.mxu0 %v6892_v17 }
 0xd25   :  { %8231 = vmatpush3.msra.mxu1 %v6800_v22  ;;  %8249 = vmatprep.subr.mxu0 %v10234_v5 }
 0xd26   :  { %8232 = vmatprep.subr.mxu1 %v10234_v5  ;;  %8250 = vmatpush3.msra.mxu0 %v6891_v59 }
 0xd27   :  { %8233 = vmatpush3.msra.mxu1 %v6799_v28  ;;  %8251 = vmatprep.subr.mxu0 %v10234_v5 }
 0xd28   :  { %8256 = vmatprep.subr.mxu1 %v10234_v5  ;;  %8252 = vmatpush3.msra.mxu0 %v6890_v24 }
 0xdb7   :  { %v7936_v47 = vpop.f32.mrf.mxu1 }
 0xdb8   :  { %v7958_v9 = vpop.f32.mrf.mxu0 }
 0xdb9   :  { %v7937_v62 = vpop.f32.mrf.mxu1 }
 0xdba   :  { %v7959_v40 = vpop.f32.mrf.mxu0  ;;  %v7938_v25 = vadd.f32 %v7937_v62, %v7936_v47  ;;  %v7832_v47 = vld [vmem:[#allocation29] ss:$0 sm:$0xff] }
 0xdbb   :  { %v7939_v54 = vpop.f32.mrf.mxu1  ;;  %v7960_v49 = vadd.f32 %v7959_v40, %v7958_v9 }
 0xdbc   :  { %v7961_v44 = vpop.f32.mrf.mxu0  ;;  %v6668_v33 = vadd.f32 %v7938_v25, %v7763_v29 }
 0xdbd   :  { %v7940_v12 = vpop.f32.mrf.mxu1 }
 0xdbe   :  { %v7962_v21 = vpop.f32.mrf.mxu0  ;;  %v6708_v8 = vadd.f32 %v7960_v49, %v6668_v33 }
 0xdd7   :  { %v7980_v50 = vpop.f32.mrf.mxu1 }
 0xdd8   :  { %v8002_v41 = vpop.f32.mrf.mxu0 }
 0xdd9   :  { %v7981_v58 = vpop.f32.mrf.mxu1 }
 0xdda   :  { %v7982_v19 = vadd.f32 %v7981_v58, %v7980_v50  ;;  %v8003_v15 = vpop.f32.mrf.mxu0 }
 0xddb   :  { %v7983_v4 = vpop.f32.mrf.mxu1  ;;  %v8004_v10 = vadd.f32 %v8003_v15, %v8002_v41 }
 0xddc   :  { %v6748_v20 = vadd.f32 %v7982_v19, %v6708_v8  ;;  %v8005_v26 = vpop.f32.mrf.mxu0 }
 0xddd   :  { %v7984_v57 = vpop.f32.mrf.mxu1 }
 0xdde   :  { %v8006_v52 = vpop.f32.mrf.mxu0  ;;  %v6788_v63 = vadd.f32 %v8004_v10, %v6748_v20 }
 0xde0   :  { %6794 = vrot.lane.b32.xlu0 %v6788_v63, %s8965_s4 }
 0xe52   :  { %v6795_v6 = vpop.permute.xlu0 %6794 }
 0xe53   :  { %v6797_v56 = vadd.f32 %v6795_v6, %v9901_v0  ;;  %v6985_v0 = vld [vmem:[%s10190_s16 + $0x30] sm:$0xff] }
 0xe55   :  { %v6798_v2 = vadd.f32 %v6797_v56, %v9897_v23  ;;  %v6986_v23 = vld [vmem:[%s10190_s16 + $0x38] sm:$0xff]  ;;  %s8966_s16 = smov [#allocation30]  }
 0xe56   :  { %s7083_s18 = sshll.u32 %s8966_s16, 4  ;;  %s7084_s18 = int_to_ptr.vmem [resolvable:$true] %s7083_s18 }
 0xe57   :  { %6815 = vrot.lane.b32.xlu0 %v6798_v2, %s8965_s4  ;;  %s8874_s25 = scalar_lea.vmem %s7084_s18, 32  ;;  %p8879_p2 = scmp.lt.s32.totalorder %s7084_s18, %s7084_s18 }
 0xe58   :  { %p8875_p1 = scmp.ne.s32.totalorder %s7084_s18, %s8874_s25  ;;  %p8880_p3 = scmp.lt.s32.totalorder %s8874_s25, %s8874_s25 }
 0xe5a   :  { %p8881_p4 = por %p8880_p3, %p8879_p2 }
 0xe5c   :  { %p8882_p5 = pnand %p8881_p4, %p8875_p1 }
 0xec9   :  { %v6816_v55 = vpop.permute.xlu0 %6815 }
 0xeca   :  { %8235 = vmatmul.mubr.msk.f32.vlgmr.msra.gmra.mxu1 %vm586_vm0, %v6816_v55 }
 0xecb   :  { %8272 = vmatprep.mubr.msk.f32.mxu1 %vm8963_vm2, %v10234_v5  ;;  %8257 = vmatpush3.msra.mxu1 %v6986_v23  ;;  %vm7067_vm2 = vcmask 123904  }
 0xecc   :  { %8258 = vmatprep.subr.mxu1 %v10234_v5 }
 0xecd   :  { %8259 = vmatpush3.msra.mxu1 %v6985_v0 }
 0xece   :  { %8260 = vmatprep.subr.mxu1 %v10234_v5 }
 0xecf   :  { %8261 = vmatpush3.msra.mxu1 %v6984_v13 }
 0xed0   :  { %8262 = vmatprep.subr.mxu1 %v10234_v5 }
 0xed1   :  { %8263 = vmatpush3.msra.mxu1 %v6983_v32 }
 0xed2   :  { %8264 = vmatprep.subr.mxu1 %v10234_v5 }
 0xed3   :  { %8265 = vmatpush3.msra.mxu1 %v6982_v38 }
 0xed4   :  { %8266 = vmatprep.subr.mxu1 %v10234_v5 }
 0xed5   :  { %8267 = vmatpush3.msra.mxu1 %v6981_v35 }
 0xed6   :  { %8268 = vmatprep.subr.mxu1 %v10234_v5 }
 0xed7   :  { %8269 = vmatpush3.msra.mxu1 %v6980_v27 }
 0xed8   :  { %8270 = vmatprep.subr.mxu1 %v10234_v5 }
 0xed9   :  { %8271 = vmatpush3.msra.mxu1 %v6979_v43 }
 0xf8a   :  { %v6885_v31 = vpop.f32.mrf.mxu1 }
 0xf8b   :  { %v6886_v18 = vadd.f32 %v7828_v14, %v6885_v31 }
 0xf8c   :  { %v8236_v11 = vpop.f32.mrf.mxu1 }
 0xf8d   :  { %v6889_v61 = vmax.f32 %v6886_v18, 0.0 }
 0xf8f   :  { %8254 = vmatmul.mubr.msk.f32.vlgmr.msra.gmra.mxu0 %vm586_vm0, %v6889_v61 }
0x104f   :  { %v6974_v60 = vpop.f32.mrf.mxu0 }
0x1050   :  { %v6975_v3 = vadd.f32 %v7830_v34, %v6974_v60 }
0x1051   :  { %v8255_v36 = vpop.f32.mrf.mxu0 }
0x1052   :  { %v6978_v16 = vmax.f32 %v6975_v3, 0.0 }
0x1054   :  { %8273 = vmatmul.mubr.msk.f32.vlgmr.msra.gmra.mxu1 %vm586_vm0, %v6978_v16 }
0x1114   :  { %v7063_v9 = vpop.f32.mrf.mxu1 }
0x1115   :  { %v7064_v62 = vadd.f32 %v7832_v47, %v7063_v9 }
0x1116   :  { %v8274_v40 = vpop.f32.mrf.mxu1 }
0x1117   :  { %v7069_v54 = vmul.f32 1.442695, %v7064_v62  ;;  %7068 = vst.msk [vmem:[#allocation30] sm:$0x3] %vm7067_vm2, %v7064_v62 }
0x1119   :  { %8532 = vpow2.f32 %v7069_v54 }
0x111a   :  { %8885 = shalt.err (!%p8882_p5)
}
0x111b   :  { %7086 = dma.vmem_to_hbm [thread:$0]  %s7084_s18, 32, %s10195_s21, [#allocation8]  }
0x111c   :  { %s8967_s19 = smov 112   ;;  %s8968_s10 = smov [#allocation31]  }
0x111d   :  { %s7093_s3 = sshll.u32 %s8968_s10, 4  ;;  %s7094_s3 = int_to_ptr.vmem [resolvable:$true] %s7093_s3 }
0x111e   :  { %s8894_s13 = scalar_lea.vmem %s7094_s3, 32  ;;  %p8899_p7 = scmp.lt.s32.totalorder %s7094_s3, %s7094_s3 }
0x111f   :  { %p8895_p6 = scmp.ne.s32.totalorder %s7094_s3, %s8894_s13  ;;  %p8900_p8 = scmp.lt.s32.totalorder %s8894_s13, %s8894_s13 }
0x1121   :  { %p8901_p9 = por %p8900_p8, %p8899_p7 }
0x1123   :  { %p8902_p10 = pnand %p8901_p9, %p8895_p6 }
0x1126   :  { %v8533_v5 = vpop.eup %8532 }
0x1127   :  { %v7071_v44 = vadd.f32 1e-08, %v8533_v5 }
0x1129   :  { %7073 = vrot.lane.b32.xlu1 %v7071_v44, %s8967_s19 }
0x119b   :  { %v7074_v12 = vpop.permute.xlu1 %7073 }
0x119c   :  { %7076 = vst.msk [vmem:[#allocation31] sm:$0x3] %vm7067_vm2, %v7074_v12 }
0x119d   :  { %8905 = shalt.err (!%p8902_p10)
}
0x119e   :  { %7096 = dma.vmem_to_hbm [thread:$0]  %s7094_s3, 32, %s10196_s22, [#allocation32]  }
0x119f   :  { %8936 = dma.done.wait [#allocation8], 32  }
0x11a0   :  { %8937 = vsyncadd [#allocation8], 4294967264 }
0x11a1   :  { %8938 = dma.done.wait [#allocation32], 32  }
0x11a2   :  { %8939 = vsyncadd [#allocation32], 4294967264 }
0x11a3   :  { %7103 = vsyncpa [#allocation7], 1 }
0x11a4   :  { %7104 = vsyncpa [#allocation10], 1 }
0x11a5   :  { %7105 = vsyncpa [#allocation13], 1 }
0x11a6   :  { %7106 = vsyncpa [#allocation16], 1 }
0x11a7   :  { %7107 = vsyncpa [#allocation19], 1 }
0x11a8   :  { %7108 = vsyncpa [#allocation22], 1 }
0x11a9   :  { %7109 = vsyncpa [#allocation25], 1 }
0x11aa   :  { %7110 = vsyncpa [#allocation28], 1 }
0x11ab   :  { %7111 = vsyncpa [#allocation8], 1 }
0x11ac   :  { %7112 = vsyncpa [#allocation32], 1 }
0x11ad   :  { %7113 = vsyncmov [#allocation5] }
0x11b0   :  { %s7114_s21 = vpop.sfrf %7113 }
0x11b1   :  { %p7834_p11 = scmp.ne.s32.totalorder %s7114_s21, 0 }
0x11b3   :  { %7118 = shalt.err (%p7834_p11)  }
0x11b4   :  { %7120 = vsyncmov [#allocation5 + $0x1] }
0x11b7   :  { %s7121_s22 = vpop.sfrf %7120 }
0x11b8   :  { %p7835_p12 = scmp.ne.s32.totalorder %s7121_s22, 0 }
0x11ba   :  { %7125 = shalt.err (%p7835_p12)  }
0x11bb   :  { %7127 = vsyncmov [#allocation5 + $0x2] }
0x11be   :  { %s7128_s30 = vpop.sfrf %7127 }
0x11bf   :  { %p7836_p13 = scmp.ne.s32.totalorder %s7128_s30, 0 }
0x11c1   :  { %7132 = shalt.err (%p7836_p13)  }

</bundles_post_ra>
